<compile_context>
chip_gen: v5e
topology: v5e:2x2
jax: 0.10.0
libtpu: 0.0.40
codegen_flags: <defaults>
</compile_context>

<pallas_src>
import functools

import jax
import jax.numpy as jnp
from jax.experimental import pallas as pl
from jax.experimental.pallas import tpu as pltpu


def _round_up(a, m):
    return ((a + m - 1) // m) * m


def _layer_norm(x, gamma, beta, eps=1e-6):
    # Matches nn.LayerNorm(d_model, eps=1e-06): biased variance over last dim.
    mu = jnp.mean(x, axis=-1, keepdims=True)
    var = jnp.mean((x - mu) * (x - mu), axis=-1, keepdims=True)
    return (x - mu) * jax.lax.rsqrt(var + eps) * gamma + beta


def encoder_layer_kernel(
    xq_ref, xf_ref,
    wq_ref, bq_ref, wkv_ref, bkv_ref, wo_ref, bo_ref,
    w1_ref, b1_ref, w2_ref, b2_ref,
    g1_ref, beta1_ref, g2_ref, beta2_ref,
    o_ref,
    kh_scr, vh_scr,
    *, num_heads, seq_len, kv_chunk, matmul_dtype, exact_softmax_div,
):
    md = matmul_dtype
    d_model = wq_ref.shape[1]
    depth = d_model // num_heads
    tq = xq_ref.shape[1]
    s_pad = kh_scr.shape[1]

    def mm(a, w_ref, b_ref):
        # (bf16|fp32) operands on the MXU, fp32 accumulation, fp32 bias add.
        return (jnp.dot(a.astype(md), w_ref[...],
                        preferred_element_type=jnp.float32) + b_ref[...])

    # ---- K/V projection: once per batch element (t == 0), cached in VMEM ----
    @pl.when(pl.program_id(1) == 0)
    def _project_kv():
        xf = xf_ref[0]                                   # (S_pad, Dx)
        kv = mm(xf, wkv_ref, bkv_ref)                    # (S_pad, 2*d_model) fp32
        k = kv[:, :d_model].astype(md)
        v = kv[:, d_model:].astype(md)
        # TODO(synk): pltpu.einshape for the head-major relayout (sub-lane
        # transpose when depth < 128); it runs once per batch element only.
        kh_scr[...] = jnp.transpose(k.reshape(s_pad, num_heads, depth), (1, 0, 2))
        vh_scr[...] = jnp.transpose(v.reshape(s_pad, num_heads, depth), (1, 0, 2))

    # ---- query tile: projection + multi-head attention (online softmax) ----
    xq = xq_ref[0]                                       # (TQ, Dx) fp32 residual path
    q = mm(xq, wq_ref, bq_ref) * (1.0 / float(depth) ** 0.5)   # scale folded into q
    qh = jnp.transpose(q.reshape(tq, num_heads, depth), (1, 0, 2)).astype(md)

    n_kc = s_pad // kv_chunk      # static; unrolled flash loop over K/V chunks
    m_i = jnp.full((num_heads, tq, 1), -1e30, jnp.float32)
    l_i = jnp.zeros((num_heads, tq, 1), jnp.float32)
    acc = jnp.zeros((num_heads, tq, depth), jnp.float32)
    for c in range(n_kc):
        k_c = kh_scr[:, c * kv_chunk:(c + 1) * kv_chunk, :]    # (H, TK, depth)
        v_c = vh_scr[:, c * kv_chunk:(c + 1) * kv_chunk, :]
        s_c = jnp.einsum("hqd,hkd->hqk", qh, k_c,
                         preferred_element_type=jnp.float32)   # (H, TQ, TK) fp32
        if (c + 1) * kv_chunk > seq_len:     # chunk touches padded keys: mask them
            ids = (jax.lax.broadcasted_iota(jnp.int32, (1, tq, kv_chunk), 2)
                   + c * kv_chunk)
            s_c = jnp.where(ids < seq_len, s_c, -1e30)
        m_new = jnp.maximum(m_i, jnp.max(s_c, axis=-1, keepdims=True))
        alpha = jnp.exp(m_i - m_new)
        p = jnp.exp(s_c - m_new)
        l_i = alpha * l_i + jnp.sum(p, axis=-1, keepdims=True)
        acc = alpha * acc + jnp.einsum("hqk,hkd->hqd", p.astype(md), v_c,
                                       preferred_element_type=jnp.float32)
        m_i = m_new

    if exact_softmax_div:
        ctx = acc / l_i                                  # strict fp32 parity
    else:
        ctx = acc * pl.reciprocal(l_i, approx=True)      # EUP slot, ~free
    concat = jnp.transpose(ctx, (1, 0, 2)).reshape(tq, d_model)

    attn_out = mm(concat, wo_ref, bo_ref)

    # dropout1: identity (eval)
    out1 = _layer_norm(xq + attn_out, g1_ref[...], beta1_ref[...])

    # ---- point-wise feed-forward ----
    # TODO(synk): for very large d_ff, stream W1/W2 over a d_ff grid axis.
    h1 = jnp.maximum(mm(out1, w1_ref, b1_ref), 0.0)
    ffn = mm(h1, w2_ref, b2_ref)

    # dropout2: identity (eval)
    out2 = _layer_norm(out1 + ffn, g2_ref[...], beta2_ref[...])
    o_ref[0] = out2.astype(o_ref.dtype)


def transformer_encoder_layer(x, params, num_heads, *, tq=256, kv_chunk=512,
                              matmul_dtype=jnp.bfloat16, out_dtype=jnp.float32,
                              vmem_limit_bytes=None, single_buffer_weights=True):
    """x: (B, S, d_x) fp32. params: dict of [in,out] weights / (1,out) biases.

    tq: query-tile rows (256 is the v6e/v7x sweet spot; use 128 on v5e).
    kv_chunk: K/V chunk size of the online-softmax attention loop.
    matmul_dtype: MXU operand dtype (bf16 default; fp32 for strict parity).
    out_dtype: output dtype (set jnp.bfloat16 to halve writeback bytes).
    """
    B, S, Dx = x.shape
    d_model = params["wq"].shape[1]
    d_ff = params["w1"].shape[1]
    assert Dx == d_model, "residual x + attn_out requires d_x == d_model"
    assert d_model % num_heads == 0
    depth = d_model // num_heads

    # ---- query tiling: pad S up to a multiple of tq (never one giant tile) ----
    tq = max(8, _round_up(min(tq, _round_up(S, 8)), 8))
    s_pad = _round_up(S, tq)
    n_qt = s_pad // tq
    kv_chunk = min(kv_chunk, s_pad)
    if s_pad % kv_chunk != 0:
        kv_chunk = s_pad                 # fall back to a single K/V chunk

    x_pad = x if s_pad == S else jnp.pad(x, ((0, 0), (0, s_pad - S), (0, 0)))
    x_q = x_pad                          # fp32: residual / LayerNorm path
    x_kv = x_pad.astype(matmul_dtype)    # K/V input: half the DMA bytes in bf16

    # Host-side fusion of the K|V projection; host-side cast of matmul weights.
    w_kv = jnp.concatenate([params["wk"], params["wv"]], axis=1)
    b_kv = jnp.concatenate([params["bk"], params["bv"]], axis=1)
    cast = lambda w: w.astype(matmul_dtype)
    weights = [cast(params["wq"]), params["bq"],
               cast(w_kv), b_kv,
               cast(params["wo"]), params["bo"],
               cast(params["w1"]), params["b1"],
               cast(params["w2"]), params["b2"],
               params["g1"], params["beta1"], params["g2"], params["beta2"]]

    md_size = jnp.dtype(matmul_dtype).itemsize
    out_size = jnp.dtype(out_dtype).itemsize
    w_bytes = sum(int(w.size) * w.dtype.itemsize for w in weights)

    if vmem_limit_bytes is None:
        n_wbuf = 1 if single_buffer_weights else 2
        est = (n_wbuf * w_bytes
               + 2 * tq * Dx * 4                       # xq double-buffer
               + 2 * s_pad * Dx * md_size              # xf double-buffer
               + 2 * tq * d_model * out_size           # output double-buffer
               + 2 * s_pad * d_model * md_size         # K/V head-major scratch
               + 2 * num_heads * tq * kv_chunk * 4     # per-chunk logits / p
               + 2 * tq * d_ff * 4                     # FFN hidden
               + 8 * tq * d_model * 4)                 # q/ctx/residual/LN temps
        # v5e/v6e have 128 MiB physical VMEM; v7x only 64 MiB -> for very large
        # shapes on v7x pass an explicit vmem_limit_bytes <= ~56 MiB.
        vmem_limit_bytes = min(max(int(est * 1.25), 32 * 1024 * 1024),
                               100 * 1024 * 1024)

    # Advisory cost estimate (K/V projection counted once per batch element).
    flops = int(2 * B * s_pad * Dx * 3 * d_model       # fused K|V + Q projections
                + 4 * B * s_pad * s_pad * d_model      # logits + attn @ V
                + 2 * B * s_pad * d_model * d_model    # output projection
                + 4 * B * s_pad * d_model * d_ff)      # FFN
    transcendentals = int(B * num_heads * s_pad * s_pad + 2 * B * s_pad)
    bytes_accessed = int(B * s_pad * Dx * (4 + md_size)
                         + B * s_pad * d_model * out_size + w_bytes)

    kernel = functools.partial(
        encoder_layer_kernel, num_heads=num_heads, seq_len=S, kv_chunk=kv_chunk,
        matmul_dtype=matmul_dtype,
        exact_softmax_div=(jnp.dtype(matmul_dtype) == jnp.dtype(jnp.float32)))

    def weight_spec(arr, single_buffer):
        nd = arr.ndim
        idx = lambda b, t, _nd=nd: (0,) * _nd   # grid-invariant: VMEM-resident
        if single_buffer:
            # Grid-invariant blocks never revolve -> a single buffer halves
            # their VMEM footprint (matters on v7x with large d_model / d_ff).
            return pl.BlockSpec(arr.shape, idx, pipeline_mode=pl.Buffered(1))
        return pl.BlockSpec(arr.shape, idx)

    def run(single_buffer):
        return pl.pallas_call(
            kernel,
            out_shape=jax.ShapeDtypeStruct((B, s_pad, d_model), out_dtype),
            grid_spec=pltpu.PrefetchScalarGridSpec(
                num_scalar_prefetch=0,
                grid=(B, n_qt),                 # t innermost -> K/V cached per b
                in_specs=[pl.BlockSpec((1, tq, Dx), lambda b, t: (b, t, 0)),
                          pl.BlockSpec((1, s_pad, Dx), lambda b, t: (b, 0, 0))]
                         + [weight_spec(w, single_buffer) for w in weights],
                out_specs=pl.BlockSpec((1, tq, d_model), lambda b, t: (b, t, 0)),
                scratch_shapes=[
                    pltpu.VMEM((num_heads, s_pad, depth), matmul_dtype),  # K heads
                    pltpu.VMEM((num_heads, s_pad, depth), matmul_dtype),  # V heads
                ]),
            compiler_params=pltpu.CompilerParams(
                # b "parallel" (megacore / v7x dual-TC); t "arbitrary" because the
                # K/V scratch is carried across query tiles of the same batch row.
                dimension_semantics=("parallel", "arbitrary"),
                vmem_limit_bytes=vmem_limit_bytes),
            cost_estimate=pl.CostEstimate(flops=flops,
                                          transcendentals=transcendentals,
                                          bytes_accessed=bytes_accessed),
        )(x_q, x_kv, *weights)

    if single_buffer_weights:
        try:
            out = run(True)
        except Exception:   # pl.Buffered(1) unsupported here -> default buffering
            out = run(False)
    else:
        out = run(False)

    return out if s_pad == S else out[:, :S, :]


def _reference(x, params, num_heads, matmul_dtype=jnp.float32):
    """Pure-JAX reference mirroring the PyTorch forward (eval mode), using the
    same matmul-operand dtype as the kernel (fp32 accumulation everywhere)."""
    md = matmul_dtype
    B, S, Dx = x.shape
    d_model = params["wq"].shape[1]
    depth = d_model // num_heads

    def lin(a, w, b):
        return jnp.dot(a.astype(md), w.astype(md),
                       preferred_element_type=jnp.float32) + b

    q = lin(x, params["wq"], params["bq"]) * (1.0 / float(depth) ** 0.5)
    k = lin(x, params["wk"], params["bk"])
    v = lin(x, params["wv"], params["bv"])

    def split(t):
        return t.reshape(B, S, num_heads, depth).transpose(0, 2, 1, 3)

    qh, kh, vh = split(q), split(k), split(v)
    logits = jnp.einsum("bhqd,bhkd->bhqk", qh.astype(md), kh.astype(md),
                        preferred_element_type=jnp.float32)
    logits = logits - jnp.max(logits, axis=-1, keepdims=True)
    p = jnp.exp(logits)
    w = p / jnp.sum(p, axis=-1, keepdims=True)
    attn = jnp.einsum("bhqk,bhkd->bhqd", w.astype(md), vh.astype(md),
                      preferred_element_type=jnp.float32)
    attn = attn.transpose(0, 2, 1, 3).reshape(B, S, d_model)
    attn = lin(attn, params["wo"], params["bo"])

    def ln(t, g, b):
        mu = jnp.mean(t, axis=-1, keepdims=True)
        var = jnp.mean((t - mu) ** 2, axis=-1, keepdims=True)
        return (t - mu) / jnp.sqrt(var + 1e-6) * g + b

    out1 = ln(x + attn, params["g1"], params["beta1"])
    h1 = jnp.maximum(lin(out1, params["w1"], params["b1"]), 0.0)
    ffn = lin(h1, params["w2"], params["b2"])
    return ln(out1 + ffn, params["g2"], params["beta2"])


if __name__ == "__main__":
    # Small but lane-dense shapes: d_model multiple of 128, residual requires
    # d_x == d_model.
    B, S = 2, 16
    d_x = d_model = 128
    num_heads = 4
    d_ff = 256

    key = jax.random.PRNGKey(0)
    ks = jax.random.split(key, 8)

    def w_init(k, shape, fan_in):
        return (jax.random.uniform(k, shape, jnp.float32, -1.0, 1.0)
                / jnp.sqrt(jnp.float32(fan_in)))

    params = {
        "wq": w_init(ks[0], (d_x, d_model), d_x),
        "bq": jnp.zeros((1, d_model), jnp.float32),
        "wk": w_init(ks[1], (d_x, d_model), d_x),
        "bk": jnp.zeros((1, d_model), jnp.float32),
        "wv": w_init(ks[2], (d_x, d_model), d_x),
        "bv": jnp.zeros((1, d_model), jnp.float32),
        "wo": w_init(ks[3], (d_model, d_model), d_model),
        "bo": jnp.full((1, d_model), 0.01, jnp.float32),
        "w1": w_init(ks[4], (d_model, d_ff), d_model),
        "b1": jnp.full((1, d_ff), 0.02, jnp.float32),
        "w2": w_init(ks[5], (d_ff, d_model), d_ff),
        "b2": jnp.full((1, d_model), -0.01, jnp.float32),
        "g1": jnp.ones((1, d_model), jnp.float32),
        "beta1": jnp.zeros((1, d_model), jnp.float32),
        "g2": jnp.ones((1, d_model), jnp.float32),
        "beta2": jnp.zeros((1, d_model), jnp.float32),
    }

    x = jax.random.normal(ks[6], (B, S, d_x), jnp.float32)

    # 1) Strict fp32 path; small tiles/chunks exercise the multi-tile grid,
    #    the per-batch K/V cache carry, and the multi-chunk online softmax.
    out_f32 = jax.block_until_ready(transformer_encoder_layer(
        x, params, num_heads, tq=8, kv_chunk=8, matmul_dtype=jnp.float32))
    ref_f32 = jax.block_until_ready(_reference(x, params, num_heads,
                                               matmul_dtype=jnp.float32))
    assert out_f32.shape == (B, S, d_model)
    assert jnp.allclose(out_f32, ref_f32, rtol=5e-3, atol=5e-3), "fp32 mismatch"

    # 2) Default bf16 MXU-operand path (fp32 accumulation / softmax / LayerNorm),
    #    checked against a reference using the same operand precision.
    out_bf16 = jax.block_until_ready(transformer_encoder_layer(
        x, params, num_heads, matmul_dtype=jnp.bfloat16))
    ref_bf16 = jax.block_until_ready(_reference(x, params, num_heads,
                                                matmul_dtype=jnp.bfloat16))
    assert jnp.allclose(out_bf16, ref_bf16, rtol=2e-2, atol=2e-2), "bf16 mismatch"

    # 3) Non-divisible S -> host-side padding + in-kernel padded-key masking.
    S2 = 20
    x2 = jax.random.normal(ks[7], (B, S2, d_x), jnp.float32)
    out_pad = jax.block_until_ready(transformer_encoder_layer(
        x2, params, num_heads, tq=8, kv_chunk=8, matmul_dtype=jnp.float32))
    ref_pad = jax.block_until_ready(_reference(x2, params, num_heads,
                                               matmul_dtype=jnp.float32))
    assert out_pad.shape == (B, S2, d_model)
    assert jnp.allclose(out_pad, ref_pad, rtol=5e-3, atol=5e-3), "padded mismatch"

    print("KERNEL_OK")
</pallas_src>

<mosaic_0001>
module attributes {stable_mosaic.version = 11 : i64} {
  func.func @encoder_layer_kernel(%arg0: i32, %arg1: i32, %arg2: memref<1x8x128xf32, #tpu.memory_space<vmem>>, %arg3: memref<1x16x128xf32, #tpu.memory_space<vmem>>, %arg4: memref<128x128xf32, #tpu.memory_space<vmem>>, %arg5: memref<1x128xf32, #tpu.memory_space<vmem>>, %arg6: memref<128x256xf32, #tpu.memory_space<vmem>>, %arg7: memref<1x256xf32, #tpu.memory_space<vmem>>, %arg8: memref<128x128xf32, #tpu.memory_space<vmem>>, %arg9: memref<1x128xf32, #tpu.memory_space<vmem>>, %arg10: memref<128x256xf32, #tpu.memory_space<vmem>>, %arg11: memref<1x256xf32, #tpu.memory_space<vmem>>, %arg12: memref<256x128xf32, #tpu.memory_space<vmem>>, %arg13: memref<1x128xf32, #tpu.memory_space<vmem>>, %arg14: memref<1x128xf32, #tpu.memory_space<vmem>>, %arg15: memref<1x128xf32, #tpu.memory_space<vmem>>, %arg16: memref<1x128xf32, #tpu.memory_space<vmem>>, %arg17: memref<1x128xf32, #tpu.memory_space<vmem>>, %arg18: memref<1x8x128xf32, #tpu.memory_space<vmem>>, %arg19: memref<4x16x32xf32, #tpu.memory_space<vmem>>, %arg20: memref<4x16x32xf32, #tpu.memory_space<vmem>>) attributes {dimension_semantics = [#tpu.dimension_semantics<parallel>, #tpu.dimension_semantics<arbitrary>], iteration_bounds = array<i64: 2, 2>, scalar_prefetch = 0 : i64, scratch_operands = 2 : i64, tpu.core_type = #tpu.core_type<tc>, window_params = [{transform_indices = @transform_0, window_bounds = array<i64: 1, 8, 128>}, {transform_indices = @transform_1, window_bounds = array<i64: 1, 16, 128>}, {pipeline_mode = #tpu.pipeline_mode<synchronous>, transform_indices = @transform_2, window_bounds = array<i64: 128, 128>}, {pipeline_mode = #tpu.pipeline_mode<synchronous>, transform_indices = @transform_3, window_bounds = array<i64: 1, 128>}, {pipeline_mode = #tpu.pipeline_mode<synchronous>, transform_indices = @transform_4, window_bounds = array<i64: 128, 256>}, {pipeline_mode = #tpu.pipeline_mode<synchronous>, transform_indices = @transform_5, window_bounds = array<i64: 1, 256>}, {pipeline_mode = #tpu.pipeline_mode<synchronous>, transform_indices = @transform_6, window_bounds = array<i64: 128, 128>}, {pipeline_mode = #tpu.pipeline_mode<synchronous>, transform_indices = @transform_7, window_bounds = array<i64: 1, 128>}, {pipeline_mode = #tpu.pipeline_mode<synchronous>, transform_indices = @transform_8, window_bounds = array<i64: 128, 256>}, {pipeline_mode = #tpu.pipeline_mode<synchronous>, transform_indices = @transform_9, window_bounds = array<i64: 1, 256>}, {pipeline_mode = #tpu.pipeline_mode<synchronous>, transform_indices = @transform_10, window_bounds = array<i64: 256, 128>}, {pipeline_mode = #tpu.pipeline_mode<synchronous>, transform_indices = @transform_11, window_bounds = array<i64: 1, 128>}, {pipeline_mode = #tpu.pipeline_mode<synchronous>, transform_indices = @transform_12, window_bounds = array<i64: 1, 128>}, {pipeline_mode = #tpu.pipeline_mode<synchronous>, transform_indices = @transform_13, window_bounds = array<i64: 1, 128>}, {pipeline_mode = #tpu.pipeline_mode<synchronous>, transform_indices = @transform_14, window_bounds = array<i64: 1, 128>}, {pipeline_mode = #tpu.pipeline_mode<synchronous>, transform_indices = @transform_15, window_bounds = array<i64: 1, 128>}, {transform_indices = @transform_16, window_bounds = array<i64: 1, 8, 128>}]} {
    %c0_i32 = arith.constant 0 : i32
    %0 = arith.cmpi eq, %arg1, %c0_i32 : i32
    %1 = arith.extui %0 : i1 to i32
    %c0_i32_0 = arith.constant 0 : i32
    %2 = arith.cmpi ne, %1, %c0_i32_0 : i32
    scf.if %2 {
      %c0_67 = arith.constant 0 : index
      %c0_68 = arith.constant 0 : index
      %c0_69 = arith.constant 0 : index
      %133 = vector.load %arg3[%c0_67, %c0_68, %c0_69] : memref<1x16x128xf32, #tpu.memory_space<vmem>>, vector<1x16x128xf32>
      %134 = vector.shape_cast %133 : vector<1x16x128xf32> to vector<16x128xf32>
      %c0_70 = arith.constant 0 : index
      %c0_71 = arith.constant 0 : index
      %135 = vector.load %arg6[%c0_70, %c0_71] : memref<128x256xf32, #tpu.memory_space<vmem>>, vector<128x256xf32>
      %cst_72 = arith.constant dense<0.000000e+00> : vector<16x256xf32>
      %136 = tpu.matmul %134, %135, %cst_72 {dimension_numbers = #tpu.dot_dimension_numbers<[1], [0], [0], [1], [0, 0, 1, 1], [], []>} : vector<16x128xf32>, vector<128x256xf32>, vector<16x256xf32> -> vector<16x256xf32>
      %c0_73 = arith.constant 0 : index
      %c0_74 = arith.constant 0 : index
      %137 = vector.load %arg7[%c0_73, %c0_74] : memref<1x256xf32, #tpu.memory_space<vmem>>, vector<1x256xf32>
      %138 = vector.broadcast %137 : vector<1x256xf32> to vector<16x256xf32>
      %139 = arith.addf %136, %138 : vector<16x256xf32>
      %140 = vector.extract_strided_slice %139 {offsets = [0, 0], sizes = [16, 128], strides = [1, 1]} : vector<16x256xf32> to vector<16x128xf32>
      %141 = vector.extract_strided_slice %139 {offsets = [0, 128], sizes = [16, 128], strides = [1, 1]} : vector<16x256xf32> to vector<16x128xf32>
      %142 = vector.shape_cast %140 : vector<16x128xf32> to vector<16x4x32xf32>
      %143 = tpu.transpose %142, [1, 0, 2] : vector<16x4x32xf32> -> vector<4x16x32xf32>
      %c0_75 = arith.constant 0 : index
      %c0_76 = arith.constant 0 : index
      %c0_77 = arith.constant 0 : index
      %144 = vector.load %arg19[%c0_75, %c0_76, %c0_77] : memref<4x16x32xf32, #tpu.memory_space<vmem>>, vector<4x16x32xf32>
      tpu.vector_store %arg19[%c0_75, %c0_76, %c0_77], %143 {strides = array<i32>} : memref<4x16x32xf32, #tpu.memory_space<vmem>>, vector<4x16x32xf32>,
      %145 = vector.shape_cast %141 : vector<16x128xf32> to vector<16x4x32xf32>
      %146 = tpu.transpose %145, [1, 0, 2] : vector<16x4x32xf32> -> vector<4x16x32xf32>
      %c0_78 = arith.constant 0 : index
      %c0_79 = arith.constant 0 : index
      %c0_80 = arith.constant 0 : index
      %147 = vector.load %arg20[%c0_78, %c0_79, %c0_80] : memref<4x16x32xf32, #tpu.memory_space<vmem>>, vector<4x16x32xf32>
      tpu.vector_store %arg20[%c0_78, %c0_79, %c0_80], %146 {strides = array<i32>} : memref<4x16x32xf32, #tpu.memory_space<vmem>>, vector<4x16x32xf32>,
    } else {
    }
    %c0 = arith.constant 0 : index
    %c0_1 = arith.constant 0 : index
    %c0_2 = arith.constant 0 : index
    %3 = vector.load %arg2[%c0, %c0_1, %c0_2] : memref<1x8x128xf32, #tpu.memory_space<vmem>>, vector<1x8x128xf32>
    %4 = vector.shape_cast %3 : vector<1x8x128xf32> to vector<8x128xf32>
    %c0_3 = arith.constant 0 : index
    %c0_4 = arith.constant 0 : index
    %5 = vector.load %arg4[%c0_3, %c0_4] : memref<128x128xf32, #tpu.memory_space<vmem>>, vector<128x128xf32>
    %cst = arith.constant dense<0.000000e+00> : vector<8x128xf32>
    %6 = tpu.matmul %4, %5, %cst {dimension_numbers = #tpu.dot_dimension_numbers<[1], [0], [0], [1], [0, 0, 1, 1], [], []>} : vector<8x128xf32>, vector<128x128xf32>, vector<8x128xf32> -> vector<8x128xf32>
    %c0_5 = arith.constant 0 : index
    %c0_6 = arith.constant 0 : index
    %7 = vector.load %arg5[%c0_5, %c0_6] : memref<1x128xf32, #tpu.memory_space<vmem>>, vector<1x128xf32>
    %8 = vector.broadcast %7 : vector<1x128xf32> to vector<8x128xf32>
    %9 = arith.addf %6, %8 : vector<8x128xf32>
    %cst_7 = arith.constant 0.176776692 : f32
    %10 = vector.broadcast %cst_7 : f32 to vector<8x128xf32>
    %11 = arith.mulf %9, %10 : vector<8x128xf32>
    %12 = vector.shape_cast %11 : vector<8x128xf32> to vector<8x4x32xf32>
    %13 = tpu.transpose %12, [1, 0, 2] : vector<8x4x32xf32> -> vector<4x8x32xf32>
    %cst_8 = arith.constant -1.000000e+30 : f32
    %14 = vector.broadcast %cst_8 : f32 to vector<4x8x1xf32>
    %cst_9 = arith.constant 0.000000e+00 : f32
    %15 = vector.broadcast %cst_9 : f32 to vector<4x8x1xf32>
    %cst_10 = arith.constant 0.000000e+00 : f32
    %16 = vector.broadcast %cst_10 : f32 to vector<4x8x32xf32>
    %c0_11 = arith.constant 0 : index
    %c0_12 = arith.constant 0 : index
    %c0_13 = arith.constant 0 : index
    %17 = vector.load %arg19[%c0_11, %c0_12, %c0_13] : memref<4x16x32xf32, #tpu.memory_space<vmem>>, vector<4x8x32xf32>
    %c0_14 = arith.constant 0 : index
    %c0_15 = arith.constant 0 : index
    %c0_16 = arith.constant 0 : index
    %18 = vector.load %arg20[%c0_14, %c0_15, %c0_16] : memref<4x16x32xf32, #tpu.memory_space<vmem>>, vector<4x8x32xf32>
    "tpu.trace_start"() <{level = 10 : i32, message = "hqd,hkd->hqk"}> : () -> ()
    %cst_17 = arith.constant dense<0.000000e+00> : vector<4x8x8xf32>
    %19 = tpu.matmul %13, %17, %cst_17 {dimension_numbers = #tpu.dot_dimension_numbers<[2], [2], [1], [1], [0, 0, 0, 1, 1, 1], [0], [0]>} : vector<4x8x32xf32>, vector<4x8x32xf32>, vector<4x8x8xf32> -> vector<4x8x8xf32>
    "tpu.trace_stop"() : () -> ()
    %cst_18 = arith.constant dense<0xFF800000> : vector<4x8xf32>
    %20 = vector.multi_reduction <maximumf>, %19, %cst_18 [2] : vector<4x8x8xf32> to vector<4x8xf32>
    %21 = vector.shape_cast %20 : vector<4x8xf32> to vector<4x8x1xf32>
    %22 = arith.maximumf %14, %21 : vector<4x8x1xf32>
    %23 = arith.subf %14, %22 : vector<4x8x1xf32>
    %24 = math.exp %23 : vector<4x8x1xf32>
    %25 = vector.broadcast %22 : vector<4x8x1xf32> to vector<4x8x8xf32>
    %26 = arith.subf %19, %25 : vector<4x8x8xf32>
    %27 = math.exp %26 : vector<4x8x8xf32>
    %28 = arith.mulf %24, %15 : vector<4x8x1xf32>
    %cst_19 = arith.constant dense<0.000000e+00> : vector<4x8xf32>
    %29 = vector.multi_reduction <add>, %27, %cst_19 [2] : vector<4x8x8xf32> to vector<4x8xf32>
    %30 = vector.shape_cast %29 : vector<4x8xf32> to vector<4x8x1xf32>
    %31 = arith.addf %28, %30 : vector<4x8x1xf32>
    %32 = vector.broadcast %24 : vector<4x8x1xf32> to vector<4x8x32xf32>
    %33 = arith.mulf %32, %16 : vector<4x8x32xf32>
    "tpu.trace_start"() <{level = 10 : i32, message = "hqk,hkd->hqd"}> : () -> ()
    %cst_20 = arith.constant dense<0.000000e+00> : vector<4x8x32xf32>
    %34 = tpu.matmul %27, %18, %cst_20 {dimension_numbers = #tpu.dot_dimension_numbers<[2], [1], [1], [2], [0, 0, 0, 1, 1, 2], [0], [0]>} : vector<4x8x8xf32>, vector<4x8x32xf32>, vector<4x8x32xf32> -> vector<4x8x32xf32>
    "tpu.trace_stop"() : () -> ()
    %35 = arith.addf %33, %34 : vector<4x8x32xf32>
    %c0_21 = arith.constant 0 : index
    %c8 = arith.constant 8 : index
    %c0_22 = arith.constant 0 : index
    %36 = vector.load %arg19[%c0_21, %c8, %c0_22] : memref<4x16x32xf32, #tpu.memory_space<vmem>>, vector<4x8x32xf32>
    %c0_23 = arith.constant 0 : index
    %c8_24 = arith.constant 8 : index
    %c0_25 = arith.constant 0 : index
    %37 = vector.load %arg20[%c0_23, %c8_24, %c0_25] : memref<4x16x32xf32, #tpu.memory_space<vmem>>, vector<4x8x32xf32>
    "tpu.trace_start"() <{level = 10 : i32, message = "hqd,hkd->hqk"}> : () -> ()
    %cst_26 = arith.constant dense<0.000000e+00> : vector<4x8x8xf32>
    %38 = tpu.matmul %13, %36, %cst_26 {dimension_numbers = #tpu.dot_dimension_numbers<[2], [2], [1], [1], [0, 0, 0, 1, 1, 1], [0], [0]>} : vector<4x8x32xf32>, vector<4x8x32xf32>, vector<4x8x8xf32> -> vector<4x8x8xf32>
    "tpu.trace_stop"() : () -> ()
    %cst_27 = arith.constant dense<0xFF800000> : vector<4x8xf32>
    %39 = vector.multi_reduction <maximumf>, %38, %cst_27 [2] : vector<4x8x8xf32> to vector<4x8xf32>
    %40 = vector.shape_cast %39 : vector<4x8xf32> to vector<4x8x1xf32>
    %41 = arith.maximumf %22, %40 : vector<4x8x1xf32>
    %42 = arith.subf %22, %41 : vector<4x8x1xf32>
    %43 = math.exp %42 : vector<4x8x1xf32>
    %44 = vector.broadcast %41 : vector<4x8x1xf32> to vector<4x8x8xf32>
    %45 = arith.subf %38, %44 : vector<4x8x8xf32>
    %46 = math.exp %45 : vector<4x8x8xf32>
    %47 = arith.mulf %43, %31 : vector<4x8x1xf32>
    %cst_28 = arith.constant dense<0.000000e+00> : vector<4x8xf32>
    %48 = vector.multi_reduction <add>, %46, %cst_28 [2] : vector<4x8x8xf32> to vector<4x8xf32>
    %49 = vector.shape_cast %48 : vector<4x8xf32> to vector<4x8x1xf32>
    %50 = arith.addf %47, %49 : vector<4x8x1xf32>
    %51 = vector.broadcast %43 : vector<4x8x1xf32> to vector<4x8x32xf32>
    %52 = arith.mulf %51, %35 : vector<4x8x32xf32>
    "tpu.trace_start"() <{level = 10 : i32, message = "hqk,hkd->hqd"}> : () -> ()
    %cst_29 = arith.constant dense<0.000000e+00> : vector<4x8x32xf32>
    %53 = tpu.matmul %46, %37, %cst_29 {dimension_numbers = #tpu.dot_dimension_numbers<[2], [1], [1], [2], [0, 0, 0, 1, 1, 2], [0], [0]>} : vector<4x8x8xf32>, vector<4x8x32xf32>, vector<4x8x32xf32> -> vector<4x8x32xf32>
    "tpu.trace_stop"() : () -> ()
    %54 = arith.addf %52, %53 : vector<4x8x32xf32>
    %55 = vector.broadcast %50 : vector<4x8x1xf32> to vector<4x8x32xf32>
    %56 = arith.divf %54, %55 : vector<4x8x32xf32>
    %57 = tpu.transpose %56, [1, 0, 2] : vector<4x8x32xf32> -> vector<8x4x32xf32>
    %58 = vector.shape_cast %57 : vector<8x4x32xf32> to vector<8x128xf32>
    %c0_30 = arith.constant 0 : index
    %c0_31 = arith.constant 0 : index
    %59 = vector.load %arg8[%c0_30, %c0_31] : memref<128x128xf32, #tpu.memory_space<vmem>>, vector<128x128xf32>
    %cst_32 = arith.constant dense<0.000000e+00> : vector<8x128xf32>
    %60 = tpu.matmul %58, %59, %cst_32 {dimension_numbers = #tpu.dot_dimension_numbers<[1], [0], [0], [1], [0, 0, 1, 1], [], []>} : vector<8x128xf32>, vector<128x128xf32>, vector<8x128xf32> -> vector<8x128xf32>
    %c0_33 = arith.constant 0 : index
    %c0_34 = arith.constant 0 : index
    %61 = vector.load %arg9[%c0_33, %c0_34] : memref<1x128xf32, #tpu.memory_space<vmem>>, vector<1x128xf32>
    %62 = vector.broadcast %61 : vector<1x128xf32> to vector<8x128xf32>
    %63 = arith.addf %60, %62 : vector<8x128xf32>
    %64 = arith.addf %4, %63 : vector<8x128xf32>
    %c0_35 = arith.constant 0 : index
    %c0_36 = arith.constant 0 : index
    %65 = vector.load %arg14[%c0_35, %c0_36] : memref<1x128xf32, #tpu.memory_space<vmem>>, vector<1x128xf32>
    %c0_37 = arith.constant 0 : index
    %c0_38 = arith.constant 0 : index
    %66 = vector.load %arg15[%c0_37, %c0_38] : memref<1x128xf32, #tpu.memory_space<vmem>>, vector<1x128xf32>
    %cst_39 = arith.constant dense<0.000000e+00> : vector<8xf32>
    %67 = vector.multi_reduction <add>, %64, %cst_39 [1] : vector<8x128xf32> to vector<8xf32>
    %68 = vector.shape_cast %67 : vector<8xf32> to vector<8x1xf32>
    %cst_40 = arith.constant 1.280000e+02 : f32
    %69 = vector.broadcast %cst_40 : f32 to vector<8x1xf32>
    %70 = arith.divf %68, %69 : vector<8x1xf32>
    %71 = vector.broadcast %70 : vector<8x1xf32> to vector<8x128xf32>
    %72 = arith.subf %64, %71 : vector<8x128xf32>
    %73 = vector.broadcast %70 : vector<8x1xf32> to vector<8x128xf32>
    %74 = arith.subf %64, %73 : vector<8x128xf32>
    %75 = arith.mulf %72, %74 : vector<8x128xf32>
    %cst_41 = arith.constant dense<0.000000e+00> : vector<8xf32>
    %76 = vector.multi_reduction <add>, %75, %cst_41 [1] : vector<8x128xf32> to vector<8xf32>
    %77 = vector.shape_cast %76 : vector<8xf32> to vector<8x1xf32>
    %cst_42 = arith.constant 1.280000e+02 : f32
    %78 = vector.broadcast %cst_42 : f32 to vector<8x1xf32>
    %79 = arith.divf %77, %78 : vector<8x1xf32>
    %80 = vector.broadcast %70 : vector<8x1xf32> to vector<8x128xf32>
    %81 = arith.subf %64, %80 : vector<8x128xf32>
    %cst_43 = arith.constant 9.99999997E-7 : f32
    %82 = vector.broadcast %cst_43 : f32 to vector<8x1xf32>
    %83 = arith.addf %79, %82 : vector<8x1xf32>
    %84 = math.rsqrt %83 : vector<8x1xf32>
    %85 = vector.broadcast %84 : vector<8x1xf32> to vector<8x128xf32>
    %86 = arith.mulf %81, %85 : vector<8x128xf32>
    %87 = vector.broadcast %65 : vector<1x128xf32> to vector<8x128xf32>
    %88 = arith.mulf %86, %87 : vector<8x128xf32>
    %89 = vector.broadcast %66 : vector<1x128xf32> to vector<8x128xf32>
    %90 = arith.addf %88, %89 : vector<8x128xf32>
    %c0_44 = arith.constant 0 : index
    %c0_45 = arith.constant 0 : index
    %91 = vector.load %arg10[%c0_44, %c0_45] : memref<128x256xf32, #tpu.memory_space<vmem>>, vector<128x256xf32>
    %cst_46 = arith.constant dense<0.000000e+00> : vector<8x256xf32>
    %92 = tpu.matmul %90, %91, %cst_46 {dimension_numbers = #tpu.dot_dimension_numbers<[1], [0], [0], [1], [0, 0, 1, 1], [], []>} : vector<8x128xf32>, vector<128x256xf32>, vector<8x256xf32> -> vector<8x256xf32>
    %c0_47 = arith.constant 0 : index
    %c0_48 = arith.constant 0 : index
    %93 = vector.load %arg11[%c0_47, %c0_48] : memref<1x256xf32, #tpu.memory_space<vmem>>, vector<1x256xf32>
    %94 = vector.broadcast %93 : vector<1x256xf32> to vector<8x256xf32>
    %95 = arith.addf %92, %94 : vector<8x256xf32>
    %cst_49 = arith.constant 0.000000e+00 : f32
    %96 = vector.broadcast %cst_49 : f32 to vector<8x256xf32>
    %97 = arith.maximumf %95, %96 : vector<8x256xf32>
    %c0_50 = arith.constant 0 : index
    %c0_51 = arith.constant 0 : index
    %98 = vector.load %arg12[%c0_50, %c0_51] : memref<256x128xf32, #tpu.memory_space<vmem>>, vector<256x128xf32>
    %cst_52 = arith.constant dense<0.000000e+00> : vector<8x128xf32>
    %99 = tpu.matmul %97, %98, %cst_52 {dimension_numbers = #tpu.dot_dimension_numbers<[1], [0], [0], [1], [0, 0, 1, 1], [], []>} : vector<8x256xf32>, vector<256x128xf32>, vector<8x128xf32> -> vector<8x128xf32>
    %c0_53 = arith.constant 0 : index
    %c0_54 = arith.constant 0 : index
    %100 = vector.load %arg13[%c0_53, %c0_54] : memref<1x128xf32, #tpu.memory_space<vmem>>, vector<1x128xf32>
    %101 = vector.broadcast %100 : vector<1x128xf32> to vector<8x128xf32>
    %102 = arith.addf %99, %101 : vector<8x128xf32>
    %103 = arith.addf %90, %102 : vector<8x128xf32>
    %c0_55 = arith.constant 0 : index
    %c0_56 = arith.constant 0 : index
    %104 = vector.load %arg16[%c0_55, %c0_56] : memref<1x128xf32, #tpu.memory_space<vmem>>, vector<1x128xf32>
    %c0_57 = arith.constant 0 : index
    %c0_58 = arith.constant 0 : index
    %105 = vector.load %arg17[%c0_57, %c0_58] : memref<1x128xf32, #tpu.memory_space<vmem>>, vector<1x128xf32>
    %cst_59 = arith.constant dense<0.000000e+00> : vector<8xf32>
    %106 = vector.multi_reduction <add>, %103, %cst_59 [1] : vector<8x128xf32> to vector<8xf32>
    %107 = vector.shape_cast %106 : vector<8xf32> to vector<8x1xf32>
    %cst_60 = arith.constant 1.280000e+02 : f32
    %108 = vector.broadcast %cst_60 : f32 to vector<8x1xf32>
    %109 = arith.divf %107, %108 : vector<8x1xf32>
    %110 = vector.broadcast %109 : vector<8x1xf32> to vector<8x128xf32>
    %111 = arith.subf %103, %110 : vector<8x128xf32>
    %112 = vector.broadcast %109 : vector<8x1xf32> to vector<8x128xf32>
    %113 = arith.subf %103, %112 : vector<8x128xf32>
    %114 = arith.mulf %111, %113 : vector<8x128xf32>
    %cst_61 = arith.constant dense<0.000000e+00> : vector<8xf32>
    %115 = vector.multi_reduction <add>, %114, %cst_61 [1] : vector<8x128xf32> to vector<8xf32>
    %116 = vector.shape_cast %115 : vector<8xf32> to vector<8x1xf32>
    %cst_62 = arith.constant 1.280000e+02 : f32
    %117 = vector.broadcast %cst_62 : f32 to vector<8x1xf32>
    %118 = arith.divf %116, %117 : vector<8x1xf32>
    %119 = vector.broadcast %109 : vector<8x1xf32> to vector<8x128xf32>
    %120 = arith.subf %103, %119 : vector<8x128xf32>
    %cst_63 = arith.constant 9.99999997E-7 : f32
    %121 = vector.broadcast %cst_63 : f32 to vector<8x1xf32>
    %122 = arith.addf %118, %121 : vector<8x1xf32>
    %123 = math.rsqrt %122 : vector<8x1xf32>
    %124 = vector.broadcast %123 : vector<8x1xf32> to vector<8x128xf32>
    %125 = arith.mulf %120, %124 : vector<8x128xf32>
    %126 = vector.broadcast %104 : vector<1x128xf32> to vector<8x128xf32>
    %127 = arith.mulf %125, %126 : vector<8x128xf32>
    %128 = vector.broadcast %105 : vector<1x128xf32> to vector<8x128xf32>
    %129 = arith.addf %127, %128 : vector<8x128xf32>
    %c0_64 = arith.constant 0 : index
    %c0_65 = arith.constant 0 : index
    %c0_66 = arith.constant 0 : index
    %130 = vector.load %arg18[%c0_64, %c0_65, %c0_66] : memref<1x8x128xf32, #tpu.memory_space<vmem>>, vector<1x8x128xf32>
    %131 = vector.shape_cast %130 : vector<1x8x128xf32> to vector<8x128xf32>
    %132 = vector.shape_cast %129 : vector<8x128xf32> to vector<1x8x128xf32>
    tpu.vector_store %arg18[%c0_64, %c0_65, %c0_66], %132 {strides = array<i32>} : memref<1x8x128xf32, #tpu.memory_space<vmem>>, vector<1x8x128xf32>,
    return
  }
  func.func @transform_0(%arg0: i32, %arg1: i32) -> (i32, i32, i32) {
    %c0_i32 = arith.constant 0 : i32
    %c0_i32_0 = arith.constant 0 : i32
    return %arg0, %arg1, %c0_i32 : i32, i32, i32
  }
  func.func @transform_1(%arg0: i32, %arg1: i32) -> (i32, i32, i32) {
    %c0_i32 = arith.constant 0 : i32
    %c0_i32_0 = arith.constant 0 : i32
    %c0_i32_1 = arith.constant 0 : i32
    return %arg0, %c0_i32, %c0_i32_0 : i32, i32, i32
  }
  func.func @transform_2(%arg0: i32, %arg1: i32) -> (i32, i32) {
    %c0_i32 = arith.constant 0 : i32
    %c0_i32_0 = arith.constant 0 : i32
    %c0_i32_1 = arith.constant 0 : i32
    return %c0_i32, %c0_i32_0 : i32, i32
  }
  func.func @transform_3(%arg0: i32, %arg1: i32) -> (i32, i32) {
    %c0_i32 = arith.constant 0 : i32
    %c0_i32_0 = arith.constant 0 : i32
    %c0_i32_1 = arith.constant 0 : i32
    return %c0_i32, %c0_i32_0 : i32, i32
  }
  func.func @transform_4(%arg0: i32, %arg1: i32) -> (i32, i32) {
    %c0_i32 = arith.constant 0 : i32
    %c0_i32_0 = arith.constant 0 : i32
    %c0_i32_1 = arith.constant 0 : i32
    return %c0_i32, %c0_i32_0 : i32, i32
  }
  func.func @transform_5(%arg0: i32, %arg1: i32) -> (i32, i32) {
    %c0_i32 = arith.constant 0 : i32
    %c0_i32_0 = arith.constant 0 : i32
    %c0_i32_1 = arith.constant 0 : i32
    return %c0_i32, %c0_i32_0 : i32, i32
  }
  func.func @transform_6(%arg0: i32, %arg1: i32) -> (i32, i32) {
    %c0_i32 = arith.constant 0 : i32
    %c0_i32_0 = arith.constant 0 : i32
    %c0_i32_1 = arith.constant 0 : i32
    return %c0_i32, %c0_i32_0 : i32, i32
  }
  func.func @transform_7(%arg0: i32, %arg1: i32) -> (i32, i32) {
    %c0_i32 = arith.constant 0 : i32
    %c0_i32_0 = arith.constant 0 : i32
    %c0_i32_1 = arith.constant 0 : i32
    return %c0_i32, %c0_i32_0 : i32, i32
  }
  func.func @transform_8(%arg0: i32, %arg1: i32) -> (i32, i32) {
    %c0_i32 = arith.constant 0 : i32
    %c0_i32_0 = arith.constant 0 : i32
    %c0_i32_1 = arith.constant 0 : i32
    return %c0_i32, %c0_i32_0 : i32, i32
  }
  func.func @transform_9(%arg0: i32, %arg1: i32) -> (i32, i32) {
    %c0_i32 = arith.constant 0 : i32
    %c0_i32_0 = arith.constant 0 : i32
    %c0_i32_1 = arith.constant 0 : i32
    return %c0_i32, %c0_i32_0 : i32, i32
  }
  func.func @transform_10(%arg0: i32, %arg1: i32) -> (i32, i32) {
    %c0_i32 = arith.constant 0 : i32
    %c0_i32_0 = arith.constant 0 : i32
    %c0_i32_1 = arith.constant 0 : i32
    return %c0_i32, %c0_i32_0 : i32, i32
  }
  func.func @transform_11(%arg0: i32, %arg1: i32) -> (i32, i32) {
    %c0_i32 = arith.constant 0 : i32
    %c0_i32_0 = arith.constant 0 : i32
    %c0_i32_1 = arith.constant 0 : i32
    return %c0_i32, %c0_i32_0 : i32, i32
  }
  func.func @transform_12(%arg0: i32, %arg1: i32) -> (i32, i32) {
    %c0_i32 = arith.constant 0 : i32
    %c0_i32_0 = arith.constant 0 : i32
    %c0_i32_1 = arith.constant 0 : i32
    return %c0_i32, %c0_i32_0 : i32, i32
  }
  func.func @transform_13(%arg0: i32, %arg1: i32) -> (i32, i32) {
    %c0_i32 = arith.constant 0 : i32
    %c0_i32_0 = arith.constant 0 : i32
    %c0_i32_1 = arith.constant 0 : i32
    return %c0_i32, %c0_i32_0 : i32, i32
  }
  func.func @transform_14(%arg0: i32, %arg1: i32) -> (i32, i32) {
    %c0_i32 = arith.constant 0 : i32
    %c0_i32_0 = arith.constant 0 : i32
    %c0_i32_1 = arith.constant 0 : i32
    return %c0_i32, %c0_i32_0 : i32, i32
  }
  func.func @transform_15(%arg0: i32, %arg1: i32) -> (i32, i32) {
    %c0_i32 = arith.constant 0 : i32
    %c0_i32_0 = arith.constant 0 : i32
    %c0_i32_1 = arith.constant 0 : i32
    return %c0_i32, %c0_i32_0 : i32, i32
  }
  func.func @transform_16(%arg0: i32, %arg1: i32) -> (i32, i32, i32) {
    %c0_i32 = arith.constant 0 : i32
    %c0_i32_0 = arith.constant 0 : i32
    return %arg0, %arg1, %c0_i32 : i32, i32, i32
  }
}

module attributes {stable_mosaic.version = 11 : i64} {
  func.func @encoder_layer_kernel(%arg0: i32, %arg1: i32, %arg2: memref<1x8x128xf32, #tpu.memory_space<vmem>>, %arg3: memref<1x16x128xf32, #tpu.memory_space<vmem>>, %arg4: memref<128x128xf32, #tpu.memory_space<vmem>>, %arg5: memref<1x128xf32, #tpu.memory_space<vmem>>, %arg6: memref<128x256xf32, #tpu.memory_space<vmem>>, %arg7: memref<1x256xf32, #tpu.memory_space<vmem>>, %arg8: memref<128x128xf32, #tpu.memory_space<vmem>>, %arg9: memref<1x128xf32, #tpu.memory_space<vmem>>, %arg10: memref<128x256xf32, #tpu.memory_space<vmem>>, %arg11: memref<1x256xf32, #tpu.memory_space<vmem>>, %arg12: memref<256x128xf32, #tpu.memory_space<vmem>>, %arg13: memref<1x128xf32, #tpu.memory_space<vmem>>, %arg14: memref<1x128xf32, #tpu.memory_space<vmem>>, %arg15: memref<1x128xf32, #tpu.memory_space<vmem>>, %arg16: memref<1x128xf32, #tpu.memory_space<vmem>>, %arg17: memref<1x128xf32, #tpu.memory_space<vmem>>, %arg18: memref<1x8x128xf32, #tpu.memory_space<vmem>>, %arg19: memref<4x16x32xf32, #tpu.memory_space<vmem>>, %arg20: memref<4x16x32xf32, #tpu.memory_space<vmem>>) attributes {dimension_semantics = [#tpu.dimension_semantics<parallel>, #tpu.dimension_semantics<arbitrary>], iteration_bounds = array<i64: 2, 2>, scalar_prefetch = 0 : i64, scratch_operands = 2 : i64, tpu.core_type = #tpu.core_type<tc>, window_params = [{transform_indices = @transform_0, window_bounds = array<i64: 1, 8, 128>}, {transform_indices = @transform_1, window_bounds = array<i64: 1, 16, 128>}, {pipeline_mode = #tpu.pipeline_mode<synchronous>, transform_indices = @transform_2, window_bounds = array<i64: 128, 128>}, {pipeline_mode = #tpu.pipeline_mode<synchronous>, transform_indices = @transform_3, window_bounds = array<i64: 1, 128>}, {pipeline_mode = #tpu.pipeline_mode<synchronous>, transform_indices = @transform_4, window_bounds = array<i64: 128, 256>}, {pipeline_mode = #tpu.pipeline_mode<synchronous>, transform_indices = @transform_5, window_bounds = array<i64: 1, 256>}, {pipeline_mode = #tpu.pipeline_mode<synchronous>, transform_indices = @transform_6, window_bounds = array<i64: 128, 128>}, {pipeline_mode = #tpu.pipeline_mode<synchronous>, transform_indices = @transform_7, window_bounds = array<i64: 1, 128>}, {pipeline_mode = #tpu.pipeline_mode<synchronous>, transform_indices = @transform_8, window_bounds = array<i64: 128, 256>}, {pipeline_mode = #tpu.pipeline_mode<synchronous>, transform_indices = @transform_9, window_bounds = array<i64: 1, 256>}, {pipeline_mode = #tpu.pipeline_mode<synchronous>, transform_indices = @transform_10, window_bounds = array<i64: 256, 128>}, {pipeline_mode = #tpu.pipeline_mode<synchronous>, transform_indices = @transform_11, window_bounds = array<i64: 1, 128>}, {pipeline_mode = #tpu.pipeline_mode<synchronous>, transform_indices = @transform_12, window_bounds = array<i64: 1, 128>}, {pipeline_mode = #tpu.pipeline_mode<synchronous>, transform_indices = @transform_13, window_bounds = array<i64: 1, 128>}, {pipeline_mode = #tpu.pipeline_mode<synchronous>, transform_indices = @transform_14, window_bounds = array<i64: 1, 128>}, {pipeline_mode = #tpu.pipeline_mode<synchronous>, transform_indices = @transform_15, window_bounds = array<i64: 1, 128>}, {transform_indices = @transform_16, window_bounds = array<i64: 1, 8, 128>}]} {
    %c0_i32 = arith.constant 0 : i32
    %0 = arith.cmpi eq, %arg1, %c0_i32 : i32
    %1 = arith.extui %0 : i1 to i32
    %c0_i32_0 = arith.constant 0 : i32
    %2 = arith.cmpi ne, %1, %c0_i32_0 : i32
    scf.if %2 {
      %c0_67 = arith.constant 0 : index
      %c0_68 = arith.constant 0 : index
      %c0_69 = arith.constant 0 : index
      %133 = vector.load %arg3[%c0_67, %c0_68, %c0_69] : memref<1x16x128xf32, #tpu.memory_space<vmem>>, vector<1x16x128xf32>
      %134 = vector.shape_cast %133 : vector<1x16x128xf32> to vector<16x128xf32>
      %c0_70 = arith.constant 0 : index
      %c0_71 = arith.constant 0 : index
      %135 = vector.load %arg6[%c0_70, %c0_71] : memref<128x256xf32, #tpu.memory_space<vmem>>, vector<128x256xf32>
      %cst_72 = arith.constant dense<0.000000e+00> : vector<16x256xf32>
      %136 = tpu.matmul %134, %135, %cst_72 {dimension_numbers = #tpu.dot_dimension_numbers<[1], [0], [0], [1], [0, 0, 1, 1], [], []>} : vector<16x128xf32>, vector<128x256xf32>, vector<16x256xf32> -> vector<16x256xf32>
      %c0_73 = arith.constant 0 : index
      %c0_74 = arith.constant 0 : index
      %137 = vector.load %arg7[%c0_73, %c0_74] : memref<1x256xf32, #tpu.memory_space<vmem>>, vector<1x256xf32>
      %138 = vector.broadcast %137 : vector<1x256xf32> to vector<16x256xf32>
      %139 = arith.addf %136, %138 : vector<16x256xf32>
      %140 = vector.extract_strided_slice %139 {offsets = [0, 0], sizes = [16, 128], strides = [1, 1]} : vector<16x256xf32> to vector<16x128xf32>
      %141 = vector.extract_strided_slice %139 {offsets = [0, 128], sizes = [16, 128], strides = [1, 1]} : vector<16x256xf32> to vector<16x128xf32>
      %142 = vector.shape_cast %140 : vector<16x128xf32> to vector<16x4x32xf32>
      %143 = tpu.transpose %142, [1, 0, 2] : vector<16x4x32xf32> -> vector<4x16x32xf32>
      %c0_75 = arith.constant 0 : index
      %c0_76 = arith.constant 0 : index
      %c0_77 = arith.constant 0 : index
      %144 = vector.load %arg19[%c0_75, %c0_76, %c0_77] : memref<4x16x32xf32, #tpu.memory_space<vmem>>, vector<4x16x32xf32>
      tpu.vector_store %arg19[%c0_75, %c0_76, %c0_77], %143 {strides = array<i32>} : memref<4x16x32xf32, #tpu.memory_space<vmem>>, vector<4x16x32xf32>,
      %145 = vector.shape_cast %141 : vector<16x128xf32> to vector<16x4x32xf32>
      %146 = tpu.transpose %145, [1, 0, 2] : vector<16x4x32xf32> -> vector<4x16x32xf32>
      %c0_78 = arith.constant 0 : index
      %c0_79 = arith.constant 0 : index
      %c0_80 = arith.constant 0 : index
      %147 = vector.load %arg20[%c0_78, %c0_79, %c0_80] : memref<4x16x32xf32, #tpu.memory_space<vmem>>, vector<4x16x32xf32>
      tpu.vector_store %arg20[%c0_78, %c0_79, %c0_80], %146 {strides = array<i32>} : memref<4x16x32xf32, #tpu.memory_space<vmem>>, vector<4x16x32xf32>,
    } else {
    }
    %c0 = arith.constant 0 : index
    %c0_1 = arith.constant 0 : index
    %c0_2 = arith.constant 0 : index
    %3 = vector.load %arg2[%c0, %c0_1, %c0_2] : memref<1x8x128xf32, #tpu.memory_space<vmem>>, vector<1x8x128xf32>
    %4 = vector.shape_cast %3 : vector<1x8x128xf32> to vector<8x128xf32>
    %c0_3 = arith.constant 0 : index
    %c0_4 = arith.constant 0 : index
    %5 = vector.load %arg4[%c0_3, %c0_4] : memref<128x128xf32, #tpu.memory_space<vmem>>, vector<128x128xf32>
    %cst = arith.constant dense<0.000000e+00> : vector<8x128xf32>
    %6 = tpu.matmul %4, %5, %cst {dimension_numbers = #tpu.dot_dimension_numbers<[1], [0], [0], [1], [0, 0, 1, 1], [], []>} : vector<8x128xf32>, vector<128x128xf32>, vector<8x128xf32> -> vector<8x128xf32>
    %c0_5 = arith.constant 0 : index
    %c0_6 = arith.constant 0 : index
    %7 = vector.load %arg5[%c0_5, %c0_6] : memref<1x128xf32, #tpu.memory_space<vmem>>, vector<1x128xf32>
    %8 = vector.broadcast %7 : vector<1x128xf32> to vector<8x128xf32>
    %9 = arith.addf %6, %8 : vector<8x128xf32>
    %cst_7 = arith.constant 0.176776692 : f32
    %10 = vector.broadcast %cst_7 : f32 to vector<8x128xf32>
    %11 = arith.mulf %9, %10 : vector<8x128xf32>
    %12 = vector.shape_cast %11 : vector<8x128xf32> to vector<8x4x32xf32>
    %13 = tpu.transpose %12, [1, 0, 2] : vector<8x4x32xf32> -> vector<4x8x32xf32>
    %cst_8 = arith.constant -1.000000e+30 : f32
    %14 = vector.broadcast %cst_8 : f32 to vector<4x8x1xf32>
    %cst_9 = arith.constant 0.000000e+00 : f32
    %15 = vector.broadcast %cst_9 : f32 to vector<4x8x1xf32>
    %cst_10 = arith.constant 0.000000e+00 : f32
    %16 = vector.broadcast %cst_10 : f32 to vector<4x8x32xf32>
    %c0_11 = arith.constant 0 : index
    %c0_12 = arith.constant 0 : index
    %c0_13 = arith.constant 0 : index
    %17 = vector.load %arg19[%c0_11, %c0_12, %c0_13] : memref<4x16x32xf32, #tpu.memory_space<vmem>>, vector<4x8x32xf32>
    %c0_14 = arith.constant 0 : index
    %c0_15 = arith.constant 0 : index
    %c0_16 = arith.constant 0 : index
    %18 = vector.load %arg20[%c0_14, %c0_15, %c0_16] : memref<4x16x32xf32, #tpu.memory_space<vmem>>, vector<4x8x32xf32>
    "tpu.trace_start"() <{level = 10 : i32, message = "hqd,hkd->hqk"}> : () -> ()
    %cst_17 = arith.constant dense<0.000000e+00> : vector<4x8x8xf32>
    %19 = tpu.matmul %13, %17, %cst_17 {dimension_numbers = #tpu.dot_dimension_numbers<[2], [2], [1], [1], [0, 0, 0, 1, 1, 1], [0], [0]>} : vector<4x8x32xf32>, vector<4x8x32xf32>, vector<4x8x8xf32> -> vector<4x8x8xf32>
    "tpu.trace_stop"() : () -> ()
    %cst_18 = arith.constant dense<0xFF800000> : vector<4x8xf32>
    %20 = vector.multi_reduction <maximumf>, %19, %cst_18 [2] : vector<4x8x8xf32> to vector<4x8xf32>
    %21 = vector.shape_cast %20 : vector<4x8xf32> to vector<4x8x1xf32>
    %22 = arith.maximumf %14, %21 : vector<4x8x1xf32>
    %23 = arith.subf %14, %22 : vector<4x8x1xf32>
    %24 = math.exp %23 : vector<4x8x1xf32>
    %25 = vector.broadcast %22 : vector<4x8x1xf32> to vector<4x8x8xf32>
    %26 = arith.subf %19, %25 : vector<4x8x8xf32>
    %27 = math.exp %26 : vector<4x8x8xf32>
    %28 = arith.mulf %24, %15 : vector<4x8x1xf32>
    %cst_19 = arith.constant dense<0.000000e+00> : vector<4x8xf32>
    %29 = vector.multi_reduction <add>, %27, %cst_19 [2] : vector<4x8x8xf32> to vector<4x8xf32>
    %30 = vector.shape_cast %29 : vector<4x8xf32> to vector<4x8x1xf32>
    %31 = arith.addf %28, %30 : vector<4x8x1xf32>
    %32 = vector.broadcast %24 : vector<4x8x1xf32> to vector<4x8x32xf32>
    %33 = arith.mulf %32, %16 : vector<4x8x32xf32>
    "tpu.trace_start"() <{level = 10 : i32, message = "hqk,hkd->hqd"}> : () -> ()
    %cst_20 = arith.constant dense<0.000000e+00> : vector<4x8x32xf32>
    %34 = tpu.matmul %27, %18, %cst_20 {dimension_numbers = #tpu.dot_dimension_numbers<[2], [1], [1], [2], [0, 0, 0, 1, 1, 2], [0], [0]>} : vector<4x8x8xf32>, vector<4x8x32xf32>, vector<4x8x32xf32> -> vector<4x8x32xf32>
    "tpu.trace_stop"() : () -> ()
    %35 = arith.addf %33, %34 : vector<4x8x32xf32>
    %c0_21 = arith.constant 0 : index
    %c8 = arith.constant 8 : index
    %c0_22 = arith.constant 0 : index
    %36 = vector.load %arg19[%c0_21, %c8, %c0_22] : memref<4x16x32xf32, #tpu.memory_space<vmem>>, vector<4x8x32xf32>
    %c0_23 = arith.constant 0 : index
    %c8_24 = arith.constant 8 : index
    %c0_25 = arith.constant 0 : index
    %37 = vector.load %arg20[%c0_23, %c8_24, %c0_25] : memref<4x16x32xf32, #tpu.memory_space<vmem>>, vector<4x8x32xf32>
    "tpu.trace_start"() <{level = 10 : i32, message = "hqd,hkd->hqk"}> : () -> ()
    %cst_26 = arith.constant dense<0.000000e+00> : vector<4x8x8xf32>
    %38 = tpu.matmul %13, %36, %cst_26 {dimension_numbers = #tpu.dot_dimension_numbers<[2], [2], [1], [1], [0, 0, 0, 1, 1, 1], [0], [0]>} : vector<4x8x32xf32>, vector<4x8x32xf32>, vector<4x8x8xf32> -> vector<4x8x8xf32>
    "tpu.trace_stop"() : () -> ()
    %cst_27 = arith.constant dense<0xFF800000> : vector<4x8xf32>
    %39 = vector.multi_reduction <maximumf>, %38, %cst_27 [2] : vector<4x8x8xf32> to vector<4x8xf32>
    %40 = vector.shape_cast %39 : vector<4x8xf32> to vector<4x8x1xf32>
    %41 = arith.maximumf %22, %40 : vector<4x8x1xf32>
    %42 = arith.subf %22, %41 : vector<4x8x1xf32>
    %43 = math.exp %42 : vector<4x8x1xf32>
    %44 = vector.broadcast %41 : vector<4x8x1xf32> to vector<4x8x8xf32>
    %45 = arith.subf %38, %44 : vector<4x8x8xf32>
    %46 = math.exp %45 : vector<4x8x8xf32>
    %47 = arith.mulf %43, %31 : vector<4x8x1xf32>
    %cst_28 = arith.constant dense<0.000000e+00> : vector<4x8xf32>
    %48 = vector.multi_reduction <add>, %46, %cst_28 [2] : vector<4x8x8xf32> to vector<4x8xf32>
    %49 = vector.shape_cast %48 : vector<4x8xf32> to vector<4x8x1xf32>
    %50 = arith.addf %47, %49 : vector<4x8x1xf32>
    %51 = vector.broadcast %43 : vector<4x8x1xf32> to vector<4x8x32xf32>
    %52 = arith.mulf %51, %35 : vector<4x8x32xf32>
    "tpu.trace_start"() <{level = 10 : i32, message = "hqk,hkd->hqd"}> : () -> ()
    %cst_29 = arith.constant dense<0.000000e+00> : vector<4x8x32xf32>
    %53 = tpu.matmul %46, %37, %cst_29 {dimension_numbers = #tpu.dot_dimension_numbers<[2], [1], [1], [2], [0, 0, 0, 1, 1, 2], [0], [0]>} : vector<4x8x8xf32>, vector<4x8x32xf32>, vector<4x8x32xf32> -> vector<4x8x32xf32>
    "tpu.trace_stop"() : () -> ()
    %54 = arith.addf %52, %53 : vector<4x8x32xf32>
    %55 = vector.broadcast %50 : vector<4x8x1xf32> to vector<4x8x32xf32>
    %56 = arith.divf %54, %55 : vector<4x8x32xf32>
    %57 = tpu.transpose %56, [1, 0, 2] : vector<4x8x32xf32> -> vector<8x4x32xf32>
    %58 = vector.shape_cast %57 : vector<8x4x32xf32> to vector<8x128xf32>
    %c0_30 = arith.constant 0 : index
    %c0_31 = arith.constant 0 : index
    %59 = vector.load %arg8[%c0_30, %c0_31] : memref<128x128xf32, #tpu.memory_space<vmem>>, vector<128x128xf32>
    %cst_32 = arith.constant dense<0.000000e+00> : vector<8x128xf32>
    %60 = tpu.matmul %58, %59, %cst_32 {dimension_numbers = #tpu.dot_dimension_numbers<[1], [0], [0], [1], [0, 0, 1, 1], [], []>} : vector<8x128xf32>, vector<128x128xf32>, vector<8x128xf32> -> vector<8x128xf32>
    %c0_33 = arith.constant 0 : index
    %c0_34 = arith.constant 0 : index
    %61 = vector.load %arg9[%c0_33, %c0_34] : memref<1x128xf32, #tpu.memory_space<vmem>>, vector<1x128xf32>
    %62 = vector.broadcast %61 : vector<1x128xf32> to vector<8x128xf32>
    %63 = arith.addf %60, %62 : vector<8x128xf32>
    %64 = arith.addf %4, %63 : vector<8x128xf32>
    %c0_35 = arith.constant 0 : index
    %c0_36 = arith.constant 0 : index
    %65 = vector.load %arg14[%c0_35, %c0_36] : memref<1x128xf32, #tpu.memory_space<vmem>>, vector<1x128xf32>
    %c0_37 = arith.constant 0 : index
    %c0_38 = arith.constant 0 : index
    %66 = vector.load %arg15[%c0_37, %c0_38] : memref<1x128xf32, #tpu.memory_space<vmem>>, vector<1x128xf32>
    %cst_39 = arith.constant dense<0.000000e+00> : vector<8xf32>
    %67 = vector.multi_reduction <add>, %64, %cst_39 [1] : vector<8x128xf32> to vector<8xf32>
    %68 = vector.shape_cast %67 : vector<8xf32> to vector<8x1xf32>
    %cst_40 = arith.constant 1.280000e+02 : f32
    %69 = vector.broadcast %cst_40 : f32 to vector<8x1xf32>
    %70 = arith.divf %68, %69 : vector<8x1xf32>
    %71 = vector.broadcast %70 : vector<8x1xf32> to vector<8x128xf32>
    %72 = arith.subf %64, %71 : vector<8x128xf32>
    %73 = vector.broadcast %70 : vector<8x1xf32> to vector<8x128xf32>
    %74 = arith.subf %64, %73 : vector<8x128xf32>
    %75 = arith.mulf %72, %74 : vector<8x128xf32>
    %cst_41 = arith.constant dense<0.000000e+00> : vector<8xf32>
    %76 = vector.multi_reduction <add>, %75, %cst_41 [1] : vector<8x128xf32> to vector<8xf32>
    %77 = vector.shape_cast %76 : vector<8xf32> to vector<8x1xf32>
    %cst_42 = arith.constant 1.280000e+02 : f32
    %78 = vector.broadcast %cst_42 : f32 to vector<8x1xf32>
    %79 = arith.divf %77, %78 : vector<8x1xf32>
    %80 = vector.broadcast %70 : vector<8x1xf32> to vector<8x128xf32>
    %81 = arith.subf %64, %80 : vector<8x128xf32>
    %cst_43 = arith.constant 9.99999997E-7 : f32
    %82 = vector.broadcast %cst_43 : f32 to vector<8x1xf32>
    %83 = arith.addf %79, %82 : vector<8x1xf32>
    %84 = math.rsqrt %83 : vector<8x1xf32>
    %85 = vector.broadcast %84 : vector<8x1xf32> to vector<8x128xf32>
    %86 = arith.mulf %81, %85 : vector<8x128xf32>
    %87 = vector.broadcast %65 : vector<1x128xf32> to vector<8x128xf32>
    %88 = arith.mulf %86, %87 : vector<8x128xf32>
    %89 = vector.broadcast %66 : vector<1x128xf32> to vector<8x128xf32>
    %90 = arith.addf %88, %89 : vector<8x128xf32>
    %c0_44 = arith.constant 0 : index
    %c0_45 = arith.constant 0 : index
    %91 = vector.load %arg10[%c0_44, %c0_45] : memref<128x256xf32, #tpu.memory_space<vmem>>, vector<128x256xf32>
    %cst_46 = arith.constant dense<0.000000e+00> : vector<8x256xf32>
    %92 = tpu.matmul %90, %91, %cst_46 {dimension_numbers = #tpu.dot_dimension_numbers<[1], [0], [0], [1], [0, 0, 1, 1], [], []>} : vector<8x128xf32>, vector<128x256xf32>, vector<8x256xf32> -> vector<8x256xf32>
    %c0_47 = arith.constant 0 : index
    %c0_48 = arith.constant 0 : index
    %93 = vector.load %arg11[%c0_47, %c0_48] : memref<1x256xf32, #tpu.memory_space<vmem>>, vector<1x256xf32>
    %94 = vector.broadcast %93 : vector<1x256xf32> to vector<8x256xf32>
    %95 = arith.addf %92, %94 : vector<8x256xf32>
    %cst_49 = arith.constant 0.000000e+00 : f32
    %96 = vector.broadcast %cst_49 : f32 to vector<8x256xf32>
    %97 = arith.maximumf %95, %96 : vector<8x256xf32>
    %c0_50 = arith.constant 0 : index
    %c0_51 = arith.constant 0 : index
    %98 = vector.load %arg12[%c0_50, %c0_51] : memref<256x128xf32, #tpu.memory_space<vmem>>, vector<256x128xf32>
    %cst_52 = arith.constant dense<0.000000e+00> : vector<8x128xf32>
    %99 = tpu.matmul %97, %98, %cst_52 {dimension_numbers = #tpu.dot_dimension_numbers<[1], [0], [0], [1], [0, 0, 1, 1], [], []>} : vector<8x256xf32>, vector<256x128xf32>, vector<8x128xf32> -> vector<8x128xf32>
    %c0_53 = arith.constant 0 : index
    %c0_54 = arith.constant 0 : index
    %100 = vector.load %arg13[%c0_53, %c0_54] : memref<1x128xf32, #tpu.memory_space<vmem>>, vector<1x128xf32>
    %101 = vector.broadcast %100 : vector<1x128xf32> to vector<8x128xf32>
    %102 = arith.addf %99, %101 : vector<8x128xf32>
    %103 = arith.addf %90, %102 : vector<8x128xf32>
    %c0_55 = arith.constant 0 : index
    %c0_56 = arith.constant 0 : index
    %104 = vector.load %arg16[%c0_55, %c0_56] : memref<1x128xf32, #tpu.memory_space<vmem>>, vector<1x128xf32>
    %c0_57 = arith.constant 0 : index
    %c0_58 = arith.constant 0 : index
    %105 = vector.load %arg17[%c0_57, %c0_58] : memref<1x128xf32, #tpu.memory_space<vmem>>, vector<1x128xf32>
    %cst_59 = arith.constant dense<0.000000e+00> : vector<8xf32>
    %106 = vector.multi_reduction <add>, %103, %cst_59 [1] : vector<8x128xf32> to vector<8xf32>
    %107 = vector.shape_cast %106 : vector<8xf32> to vector<8x1xf32>
    %cst_60 = arith.constant 1.280000e+02 : f32
    %108 = vector.broadcast %cst_60 : f32 to vector<8x1xf32>
    %109 = arith.divf %107, %108 : vector<8x1xf32>
    %110 = vector.broadcast %109 : vector<8x1xf32> to vector<8x128xf32>
    %111 = arith.subf %103, %110 : vector<8x128xf32>
    %112 = vector.broadcast %109 : vector<8x1xf32> to vector<8x128xf32>
    %113 = arith.subf %103, %112 : vector<8x128xf32>
    %114 = arith.mulf %111, %113 : vector<8x128xf32>
    %cst_61 = arith.constant dense<0.000000e+00> : vector<8xf32>
    %115 = vector.multi_reduction <add>, %114, %cst_61 [1] : vector<8x128xf32> to vector<8xf32>
    %116 = vector.shape_cast %115 : vector<8xf32> to vector<8x1xf32>
    %cst_62 = arith.constant 1.280000e+02 : f32
    %117 = vector.broadcast %cst_62 : f32 to vector<8x1xf32>
    %118 = arith.divf %116, %117 : vector<8x1xf32>
    %119 = vector.broadcast %109 : vector<8x1xf32> to vector<8x128xf32>
    %120 = arith.subf %103, %119 : vector<8x128xf32>
    %cst_63 = arith.constant 9.99999997E-7 : f32
    %121 = vector.broadcast %cst_63 : f32 to vector<8x1xf32>
    %122 = arith.addf %118, %121 : vector<8x1xf32>
    %123 = math.rsqrt %122 : vector<8x1xf32>
    %124 = vector.broadcast %123 : vector<8x1xf32> to vector<8x128xf32>
    %125 = arith.mulf %120, %124 : vector<8x128xf32>
    %126 = vector.broadcast %104 : vector<1x128xf32> to vector<8x128xf32>
    %127 = arith.mulf %125, %126 : vector<8x128xf32>
    %128 = vector.broadcast %105 : vector<1x128xf32> to vector<8x128xf32>
    %129 = arith.addf %127, %128 : vector<8x128xf32>
    %c0_64 = arith.constant 0 : index
    %c0_65 = arith.constant 0 : index
    %c0_66 = arith.constant 0 : index
    %130 = vector.load %arg18[%c0_64, %c0_65, %c0_66] : memref<1x8x128xf32, #tpu.memory_space<vmem>>, vector<1x8x128xf32>
    %131 = vector.shape_cast %130 : vector<1x8x128xf32> to vector<8x128xf32>
    %132 = vector.shape_cast %129 : vector<8x128xf32> to vector<1x8x128xf32>
    tpu.vector_store %arg18[%c0_64, %c0_65, %c0_66], %132 {strides = array<i32>} : memref<1x8x128xf32, #tpu.memory_space<vmem>>, vector<1x8x128xf32>,
    return
  }
  func.func @transform_0(%arg0: i32, %arg1: i32) -> (i32, i32, i32) {
    %c0_i32 = arith.constant 0 : i32
    %c0_i32_0 = arith.constant 0 : i32
    return %arg0, %arg1, %c0_i32 : i32, i32, i32
  }
  func.func @transform_1(%arg0: i32, %arg1: i32) -> (i32, i32, i32) {
    %c0_i32 = arith.constant 0 : i32
    %c0_i32_0 = arith.constant 0 : i32
    %c0_i32_1 = arith.constant 0 : i32
    return %arg0, %c0_i32, %c0_i32_0 : i32, i32, i32
  }
  func.func @transform_2(%arg0: i32, %arg1: i32) -> (i32, i32) {
    %c0_i32 = arith.constant 0 : i32
    %c0_i32_0 = arith.constant 0 : i32
    %c0_i32_1 = arith.constant 0 : i32
    return %c0_i32, %c0_i32_0 : i32, i32
  }
  func.func @transform_3(%arg0: i32, %arg1: i32) -> (i32, i32) {
    %c0_i32 = arith.constant 0 : i32
    %c0_i32_0 = arith.constant 0 : i32
    %c0_i32_1 = arith.constant 0 : i32
    return %c0_i32, %c0_i32_0 : i32, i32
  }
  func.func @transform_4(%arg0: i32, %arg1: i32) -> (i32, i32) {
    %c0_i32 = arith.constant 0 : i32
    %c0_i32_0 = arith.constant 0 : i32
    %c0_i32_1 = arith.constant 0 : i32
    return %c0_i32, %c0_i32_0 : i32, i32
  }
  func.func @transform_5(%arg0: i32, %arg1: i32) -> (i32, i32) {
    %c0_i32 = arith.constant 0 : i32
    %c0_i32_0 = arith.constant 0 : i32
    %c0_i32_1 = arith.constant 0 : i32
    return %c0_i32, %c0_i32_0 : i32, i32
  }
  func.func @transform_6(%arg0: i32, %arg1: i32) -> (i32, i32) {
    %c0_i32 = arith.constant 0 : i32
    %c0_i32_0 = arith.constant 0 : i32
    %c0_i32_1 = arith.constant 0 : i32
    return %c0_i32, %c0_i32_0 : i32, i32
  }
  func.func @transform_7(%arg0: i32, %arg1: i32) -> (i32, i32) {
    %c0_i32 = arith.constant 0 : i32
    %c0_i32_0 = arith.constant 0 : i32
    %c0_i32_1 = arith.constant 0 : i32
    return %c0_i32, %c0_i32_0 : i32, i32
  }
  func.func @transform_8(%arg0: i32, %arg1: i32) -> (i32, i32) {
    %c0_i32 = arith.constant 0 : i32
    %c0_i32_0 = arith.constant 0 : i32
    %c0_i32_1 = arith.constant 0 : i32
    return %c0_i32, %c0_i32_0 : i32, i32
  }
  func.func @transform_9(%arg0: i32, %arg1: i32) -> (i32, i32) {
    %c0_i32 = arith.constant 0 : i32
    %c0_i32_0 = arith.constant 0 : i32
    %c0_i32_1 = arith.constant 0 : i32
    return %c0_i32, %c0_i32_0 : i32, i32
  }
  func.func @transform_10(%arg0: i32, %arg1: i32) -> (i32, i32) {
    %c0_i32 = arith.constant 0 : i32
    %c0_i32_0 = arith.constant 0 : i32
    %c0_i32_1 = arith.constant 0 : i32
    return %c0_i32, %c0_i32_0 : i32, i32
  }
  func.func @transform_11(%arg0: i32, %arg1: i32) -> (i32, i32) {
    %c0_i32 = arith.constant 0 : i32
    %c0_i32_0 = arith.constant 0 : i32
    %c0_i32_1 = arith.constant 0 : i32
    return %c0_i32, %c0_i32_0 : i32, i32
  }
  func.func @transform_12(%arg0: i32, %arg1: i32) -> (i32, i32) {
    %c0_i32 = arith.constant 0 : i32
    %c0_i32_0 = arith.constant 0 : i32
    %c0_i32_1 = arith.constant 0 : i32
    return %c0_i32, %c0_i32_0 : i32, i32
  }
  func.func @transform_13(%arg0: i32, %arg1: i32) -> (i32, i32) {
    %c0_i32 = arith.constant 0 : i32
    %c0_i32_0 = arith.constant 0 : i32
    %c0_i32_1 = arith.constant 0 : i32
    return %c0_i32, %c0_i32_0 : i32, i32
  }
  func.func @transform_14(%arg0: i32, %arg1: i32) -> (i32, i32) {
    %c0_i32 = arith.constant 0 : i32
    %c0_i32_0 = arith.constant 0 : i32
    %c0_i32_1 = arith.constant 0 : i32
    return %c0_i32, %c0_i32_0 : i32, i32
  }
  func.func @transform_15(%arg0: i32, %arg1: i32) -> (i32, i32) {
    %c0_i32 = arith.constant 0 : i32
    %c0_i32_0 = arith.constant 0 : i32
    %c0_i32_1 = arith.constant 0 : i32
    return %c0_i32, %c0_i32_0 : i32, i32
  }
  func.func @transform_16(%arg0: i32, %arg1: i32) -> (i32, i32, i32) {
    %c0_i32 = arith.constant 0 : i32
    %c0_i32_0 = arith.constant 0 : i32
    return %arg0, %arg1, %c0_i32 : i32, i32, i32
  }
}

</mosaic_0001>

<bundles_post_ra>
// kernel: tpu_custom_call.1
= control target key start
LH: loop header
LB: loop body
LE: loop exit
PB: predicated region body
PF: predicated region fallthrough
CT: control target
= control target key end

     0   :  { %s4210_s0 = inlined_call_operand.hbm [shape: f32[2,16,128], index: 0, kind: input, shape index: {}]   ;;  %s4211_s1 = inlined_call_operand.hbm [shape: f32[2,16,128], index: 1, kind: input, shape index: {}]   ;;  %s4212_s2 = inlined_call_operand.hbm [shape: f32[128,128], index: 2, kind: input, shape index: {}]   ;;  %s4213_s3 = inlined_call_operand.hbm [shape: f32[1,128], index: 3, kind: input, shape index: {}]   ;;  %s4214_s4 = inlined_call_operand.hbm [shape: f32[128,256], index: 4, kind: input, shape index: {}]   ;;  %s4215_s5 = inlined_call_operand.vmem [shape: f32[1,256], index: 5, kind: input, shape index: {}]   ;;  %s4216_s6 = inlined_call_operand.hbm [shape: f32[128,128], index: 6, kind: input, shape index: {}]   ;;  %s4217_s7 = inlined_call_operand.vmem [shape: f32[1,128], index: 7, kind: input, shape index: {}]   ;;  %s4218_s8 = inlined_call_operand.hbm [shape: f32[128,256], index: 8, kind: input, shape index: {}]   ;;  %s4219_s9 = inlined_call_operand.vmem [shape: f32[1,256], index: 9, kind: input, shape index: {}]   ;;  %s4220_s10 = inlined_call_operand.hbm [shape: f32[256,128], index: 10, kind: input, shape index: {}]   ;;  %s4221_s11 = inlined_call_operand.vmem [shape: f32[1,128], index: 11, kind: input, shape index: {}]   ;;  %s4222_s12 = inlined_call_operand.vmem [shape: f32[1,128], index: 12, kind: input, shape index: {}]   ;;  %s4223_s13 = inlined_call_operand.vmem [shape: f32[1,128], index: 13, kind: input, shape index: {}]   ;;  %s4224_s14 = inlined_call_operand.vmem [shape: f32[1,128], index: 14, kind: input, shape index: {}]   ;;  %s4225_s15 = inlined_call_operand.vmem [shape: f32[1,128], index: 15, kind: input, shape index: {}]   ;;  %s4226_s16 = inlined_call_operand.hbm [shape: f32[2,16,128], index: 16, kind: output, shape index: {}]  }
   0x1   :  { %4237 = sst [smem:[#allocation34_spill]] %s4210_s0 }
   0x2   :  { %4238 = sst [smem:[#allocation35_spill]] %s4212_s2 }
   0x3   :  { %4239 = sst [smem:[#allocation36_spill]] %s4213_s3 }
   0x4   :  { %4240 = sst [smem:[#allocation37_spill]] %s4214_s4 }
   0x5   :  { %4241 = sst [smem:[#allocation38_spill]] %s4215_s5 }
   0x6   :  { %4242 = sst [smem:[#allocation39_spill]] %s4216_s6 }
   0x7   :  { %4243 = sst [smem:[#allocation40_spill]] %s4217_s7 }
   0x8   :  { %4244 = sst [smem:[#allocation41_spill]] %s4218_s8 }
   0x9   :  { %4245 = sst [smem:[#allocation42_spill]] %s4219_s9 }
   0xa   :  { %4246 = sst [smem:[#allocation43_spill]] %s4220_s10 }
   0xb   :  { %4247 = sst [smem:[#allocation44_spill]] %s4221_s11 }
   0xc   :  { %4248 = sst [smem:[#allocation45_spill]] %s4222_s12 }
   0xd   :  { %4249 = sst [smem:[#allocation46_spill]] %s4223_s13 }
   0xe   :  { %4250 = sst [smem:[#allocation47_spill]] %s4224_s14 }
   0xf   :  { %4251 = sst [smem:[#allocation48_spill]] %s4225_s15 }
  0x10   :  { %4252 = sst [smem:[#allocation49_spill]] %s4226_s16 }
  0x11   :  { %21 = vsyncpa [#allocation5], 0 }
  0x12   :  { %23 = vsyncpa [#allocation5 + $0x1], 0 }
  0x13   :  { %24 = vsyncpa [#allocation8], 0 }
  0x14   :  { %26 = vsyncpa [#allocation8 + $0x1], 0 }
  0x15   :  { %27 = vsyncpa [#allocation11], 0 }
  0x16   :  { %28 = vsyncpa [#allocation14], 0 }
  0x17   :  { %29 = vsyncpa [#allocation17], 0 }
  0x18   :  { %30 = vsyncpa [#allocation6], 0 }
  0x19   :  { %32 = vsyncpa [#allocation6 + $0x1], 0  ;;  %s3428_s21 = smov 0   ;;  %s3430_s22 = smov 0  }
  0x1a   :  { %s3432_s23 = smov 0   ;;  %s3434_s24 = smov 0  }
  0x1b   :  { %s3436_s25 = smov 0   ;;  %s3438_s26 = smov 0  }
  0x1c   :  { %s3440_s27 = smov 0   ;;  %s3442_s28 = smov 0  }
  0x1d   :  { %s3444_s29 = smov 0   ;;  %s3446_s30 = smov 0  }
  0x1e   :  { %s3448_s0 = smov 0  }
  0x1f LB: > { %4253 = sst [smem:[#allocation26_spill]] %s3300_s26  ;;  %s3484_s17 = sadd.s32 4294967295, %s3320_s0   ;;  %s3320_s0 = sphi %s3448_s0, %s38_s0   ;;  %s3316_s30 = sphi %s3446_s30, %s4307_s30   ;;  %s3312_s29 = sphi %s3444_s29, %s4299_s29   ;;  %s3308_s28 = sphi %s3442_s28, %s4306_s28   ;;  %s3304_s27 = sphi %s3440_s27, %s4298_s27   ;;  %s3300_s26 = sphi %s3438_s26, %s4297_s26   ;;  %s3296_s25 = sphi %s3436_s25, %s4305_s25   ;;  %s3292_s24 = sphi %s3434_s24, %s4304_s24   ;;  %s3288_s23 = sphi %s3432_s23, %s4303_s23   ;;  %s3284_s22 = sphi %s3430_s22, %s4302_s22   ;;  %s3280_s21 = sphi %s3428_s21, %s4301_s21  }
  0x20   : > { %4254 = sst [smem:[#allocation27_spill]] %s3304_s27  ;;  %p2615_p0 = scmp.ge.s32.totalorder %s3320_s0, 1 }
  0x21   : > { %4255 = sst [smem:[#allocation28_spill]] %s3308_s28  ;;  %p73_p1 = scmp.eq.s32.totalorder %s3484_s17, 0 }
  0x22   : > { %4256 = sst [smem:[#allocation29_spill]] %s3312_s29  ;;  %p431_p2 = scmp.lt.s32.totalorder %s3320_s0, 5 }
  0x23   : > { %s4257_s2 = sld [smem:[#allocation35_spill]]  ;;  %s3322_s16 = smov [#allocation9]  }
  0x24   : > { %p3492_p3 = pnand %p2615_p0, %p431_p2  ;;  %s444_s14 = sshll.u32 %s3322_s16, 4  ;;  %s445_s14 = int_to_ptr.vmem [resolvable:$true] %s444_s14 }
  0x25   : > { %s4261_s3 = sld [smem:[#allocation36_spill]]  ;;  %s4231_s19 = smov 128  }
  0x26   : > { %s4258_s15 = scalar_select %p3492_p3, 1, 0 }
  0x27   : > { %p2732_p4 = pneg %p3492_p3  ;;  %s3325_s16 = smov [#allocation10]  }
  0x28   : > { %4259 = sst [smem:[#allocation30_spill]] %s4258_s15  ;;  %s459_s13 = sshll.u32 %s3325_s16, 4  ;;  %s460_s13 = int_to_ptr.vmem [resolvable:$true] %s459_s13 }
  0x29   : > { %s442_s20 = sshll.u32 %s4257_s2, 4  ;;  %p3500_p5 = pnand %p2732_p4, %p73_p1  ;;  %s443_s20 = int_to_ptr.hbm [resolvable:$true] %s442_s20 }
  0x2a   : > { %s4232_s2 = smov 8   ;;  %s4262_s6 = sld [smem:[#allocation39_spill]] }
  0x2b   : > { %s457_s18 = sshll.u32 %s4261_s3, 4  ;;  %s4263_s4 = sld [smem:[#allocation37_spill]]  ;;  %s458_s18 = int_to_ptr.hbm [resolvable:$true] %s457_s18 }
  0x2c   : > { %2735 = dma.hbm_to_vmem [thread:$0]  (!%p3500_p5), %s443_s20, 2048, %s445_s14, [#allocation8], %s4231_s19, %s4231_s19, %s4232_s2  }
  0x2d   : > { %2738 = dma.hbm_to_vmem [thread:$0]  (!%p3500_p5), %s458_s18, 16, %s460_s13, [#allocation11]  }
  0x2e   : > { %s3326_s27 = smov [#allocation13]   ;;  %s3327_s7 = smov [#allocation12]  }
  0x2f   : > { %s487_s15 = sshll.u32 %s3326_s27, 4  ;;  %s470_s12 = sshll.u32 %s3327_s7, 4  ;;  %s488_s15 = int_to_ptr.vmem [resolvable:$true] %s487_s15  ;;  %s471_s12 = int_to_ptr.vmem [resolvable:$true] %s470_s12 }
  0x30   : > { %s485_s5 = sshll.u32 %s4262_s6, 4  ;;  %s3328_s13 = smov 256   ;;  %s486_s5 = int_to_ptr.hbm [resolvable:$true] %s485_s5 }
  0x31   : > { %s468_s3 = sshll.u32 %s4263_s4, 4  ;;  %s3329_s14 = smov 16   ;;  %s469_s3 = int_to_ptr.hbm [resolvable:$true] %s468_s3 }
  0x32   : > { %2744 = dma.hbm_to_vmem [thread:$0]  (!%p3500_p5), %s486_s5, 2048, %s488_s15, [#allocation14], %s4231_s19, %s4231_s19, %s4232_s2  }
  0x33   : > { %2741 = dma.hbm_to_vmem [thread:$0]  (!%p3500_p5), %s469_s3, 4096, %s471_s12, [#allocation11], %s3328_s13, %s3328_s13, %s3329_s14  }
  0x34   : > { %s4264_s8 = sld [smem:[#allocation41_spill]]  ;;  %s3330_s5 = smov [#allocation15]  }
  0x35   : > { %s504_s15 = sshll.u32 %s3330_s5, 4  ;;  %s4265_s10 = sld [smem:[#allocation43_spill]]  ;;  %s505_s15 = int_to_ptr.vmem [resolvable:$true] %s504_s15 }
  0x36   : > { %s3331_s3 = smov [#allocation16]   ;;  %s2614_s12 = sadd.s32 4294967294, %s3320_s0  }
  0x37   : > { %s521_s7 = sshll.u32 %s3331_s3, 4  ;;  %s59_s20 = sadd.s32 1, %s3300_s26  ;;  %s522_s7 = int_to_ptr.vmem [resolvable:$true] %s521_s7 }
  0x38   : > { %p4230_p7 = scmp.ne.s32.totalorder %s3300_s26, %s3296_s25  ;;  %p67_p8 = scmp.eq.s32.totalorder %s3320_s0, 0 }
  0x39   : > { %p4229_p10 = scmp.ne.s32.totalorder %s3296_s25, %s3292_s24  ;;  %p92_p13 = scmp.ne.s32.totalorder %s3288_s23, %s3284_s22 }
  0x3a   : > { %s502_s18 = sshll.u32 %s4264_s8, 4  ;;  %p3559_p11 = por %p67_p8, %p4230_p7  ;;  %s503_s18 = int_to_ptr.hbm [resolvable:$true] %s502_s18 }
  0x3b   : > { %s519_s11 = sshll.u32 %s4265_s10, 4  ;;  %p3571_p12 = por %p73_p1, %p4229_p10  ;;  %s520_s11 = int_to_ptr.hbm [resolvable:$true] %s519_s11 }
  0x3c   : > { %2747 = dma.hbm_to_vmem [thread:$0]  (!%p3500_p5), %s503_s18, 4096, %s505_s15, [#allocation14], %s3328_s13, %s3328_s13, %s3329_s14  }
  0x3d   : > { %2750 = dma.hbm_to_vmem [thread:$0]  (!%p3500_p5), %s520_s11, 4096, %s522_s7, [#allocation17], %s4231_s19, %s4231_s19, %s4232_s2  }
  0x3e   : > { %s47_s13 = sadd.s32 1, %s3312_s29  ;;  %s50_s14 = sadd.s32 1, %s3316_s30 }
  0x3f   : > { %p48_p6 = scmp.ge.s32.totalorder %s47_s13, 2  ;;  %s85_s18 = sadd.s32 1, %s3288_s23 }
  0x40   : > { %p98_p0 = scmp.ne.s32.totalorder %s3284_s22, %s3280_s21  ;;  %p3583_p5 = por %p92_p13, %p67_p8 }
  0x41   : > { %s4309_s13 = smov (%p48_p6, %s47_s13), 0  ;;  %s4311_s14 = smov (!%p48_p6, %s50_s14), %s3316_s30 }
  0x42   : > { %4266 = sst [smem:[#allocation31_spill]] %s4309_s13  ;;  %s55_s28 = ssub.s32 %s3312_s29, %s4309_s13 }
  0x43   : > { %p52_p9 = scmp.ge.s32.totalorder %s4311_s14, 2  ;;  %p3595_p6 = por %p98_p0, %p73_p1 }
  0x44   : > { %p424_p10 = scmp.eq.s32.totalorder %s2614_s12, 3  ;;  %p2768_p7 = scmp.lt.s32.totalorder %s3320_s0, 4 }
  0x45   : > { %s4313_s14 = smov (%p52_p9, %s4311_s14), 0  ;;  %p418_p9 = scmp.eq.s32.totalorder %s3484_s17, 3 }
  0x46   : > { %4268 = sst [smem:[#allocation32_spill]] %s4313_s14  ;;  %s54_s15 = ssub.s32 %s3316_s30, %s4313_s14 }
  0x47   : > { %s56_s16 = sor.u32 %s55_s28, %s54_s15  ;;  %p83_p2 = scmp.eq.s32.totalorder %s54_s15, 0 }
  0x48   : > { %p57_p4 = scmp.eq.s32.totalorder %s56_s16, 0  ;;  %p4273_p8 = scmp.ne.s32.totalorder %s3300_s26, %s3296_s25 }
  0x49   : > { %s3588_s11 = scalar_select %p83_p2, %s3288_s23, %s85_s18  }
  0x4a   : > { %s3591_s3 = scalar_select %p57_p4, %s3300_s26, %s59_s20  }
  0x4b   : > { %p3604_p13 = por %p418_p9, %p4273_p8  ;;  %s550_s20 = sand.u32 1, %s3300_s26  }
  0x4c   : > { %4271 = sst [smem:[#allocation33_spill]] %s3591_s3  ;;  %p4275_p2 = scmp.ne.s32.totalorder %s3296_s25, %s3292_s24 }
  0x4d   : > { %s2623_s18 = sshll.u32 %s550_s20, 3  ;;  %s2624_s15 = sshll.u32 %s3316_s30, 1 }
  0x4e   : > { %p3612_p4 = por %p424_p10, %p4275_p2  ;;  %s558_s12 = sadd.s32 %s3312_s29, %s2624_s15 }
  0x4f   : > { %s2625_s16 = sshll.u32 %s558_s12, 3  ;;  %s554_s19 = scalar_lea.vmem [#allocation4], %s2623_s18 }
  0x50   : > { %s564_s2 = sshll.u32 %s554_s19, 4  ;;  %s4277_s8 = sld [smem:[#allocation34_spill]]  ;;  %s565_s2 = int_to_ptr.vmem [resolvable:$true] %s564_s2 }
  0x51   : > { %p2752_p10 = pnand %p2768_p7, %p3559_p11  ;;  %p3629_p0 = pnand %p2768_p7, %p3583_p5 }
  0x52   : > { %s571_s15 = sand.u32 1, %s3320_s0   ;;  %s551_s18 = scalar_lea.sflag [#allocation5], %s550_s20 }
  0x53   : > { %s573_s19 = sand.u32 1, %s3288_s23   ;;  %s2669_s12 = sshll.u32 %s3316_s30, 4 }
  0x54   : > { %s2626_s4 = sshll.u32 %s573_s19, 4  ;;  %s572_s29 = scalar_lea.sflag [#allocation8], %s571_s15 }
  0x55   : > { %s4279_s3 = smov 8   ;;  %s4280_s26 = smov 128  }
  0x56   : > { %s560_s10 = scalar_lea.hbm %s4277_s8, %s2625_s16  ;;  %s575_s16 = scalar_lea.vmem [#allocation7], %s2626_s4 }
  0x57   : > { %s562_s14 = sshll.u32 %s560_s10, 4  ;;  %s580_s10 = scalar_lea.hbm %s4211_s1, %s2669_s12  ;;  %s563_s14 = int_to_ptr.hbm [resolvable:$true] %s562_s14 }
  0x58   : > { %2754 = dma.hbm_to_vmem [thread:$0]  (!%p2752_p10), %s563_s14, 128, %s565_s2, %s551_s18  }
  0x59   : > { %s581_s27 = sshll.u32 %s580_s10, 4  ;;  %s583_s9 = sshll.u32 %s575_s16, 4  ;;  %s582_s27 = int_to_ptr.hbm [resolvable:$true] %s581_s27  ;;  %s584_s9 = int_to_ptr.vmem [resolvable:$true] %s583_s9 }
  0x5a   : > { %2757 = dma.hbm_to_vmem [thread:$0]  (!%p3629_p0), %s582_s27, 256, %s584_s9, %s572_s29, %s4280_s26, %s4280_s26, %s4279_s3  }
  0x5b   : > { %595 = sbr.rel (%p3492_p3) target bundleno = 2555 (0x9fb), region = 84  ;;  %s3647_s2 = sand.u32 (!%p3492_p3), 1, %s3296_s25  }
  0x5c   : > { %s2630_s14 = sshll.u32 (!%p3492_p3), %s3647_s2, 3  ;;  %s598_s18 = scalar_lea.sflag (!%p3492_p3), [#allocation5], %s3647_s2 }
  0x5d   : > { %s3651_s19 = scalar_lea.vmem (!%p3492_p3), [#allocation4], %s2630_s14 }
  0x60   : > { %3251 = dma.done.wait (%p3571_p12), %s598_s18, 128  }
  0x61   : > { %3253 = vsyncadd (%p3571_p12), %s598_s18, 4294967168  ;;  %s607_s26 = sand.u32 1, %s3484_s17   ;;  %s609_s29 = sand.u32 1, %s3284_s22  }
  0x62   : > { %s3659_s13 = sshll.u32 %s609_s29, 4  ;;  %s608_s3 = scalar_lea.sflag [#allocation8], %s607_s26 }
  0x63   : > { %s611_s15 = scalar_lea.vmem [#allocation7], %s3659_s13 }
  0x64   : > { %3255 = dma.done.wait (%p3595_p6), %s608_s3, 256  }
  0x65   : > { %3257 = vsyncadd (%p3595_p6), %s608_s3, 4294967040 }
  0x66   : > { %3259 = dma.done.wait (%p73_p1), [#allocation8], 2048  }
  0x67   : > { %3261 = vsyncadd (%p73_p1), [#allocation8], 4294965248 }
  0x68   : > { %3263 = dma.done.wait (%p73_p1), [#allocation11], 4112  }
  0x69   : > { %3265 = vsyncadd (%p73_p1), [#allocation11], 4294963184 }
  0x6a   : > { %3267 = dma.done.wait (%p73_p1), [#allocation14], 6144  }
  0x6b   : > { %3269 = vsyncadd (%p73_p1), [#allocation14], 4294961152 }
  0x6c   : > { %3271 = dma.done.wait (%p73_p1), [#allocation17], 4096  }
  0x6d   : > { %3273 = vsyncadd (%p73_p1), [#allocation17], 4294963200  ;;  %s3682_s5 = scalar_lea.vmem [#allocation18], %s2630_s14  ;;  %s4282_s7 = sld [smem:[#allocation27_spill]] }
  0x73   : > { %p2639_p3 = scmp.ne.s32.totalorder %s4282_s7, 0 }
  0x74   : > { %s4283_s4 = sld [smem:[#allocation38_spill]] (!%p2639_p3)  ;;  %s3332_s6 = smov (!%p2639_p3), 64  }
  0x75   : > { %699 = sbr.rel (%p2639_p3) target bundleno = 472 (0x1d8), region = 120  ;;  %s3333_s8 = smov (!%p2639_p3), 96  }
  0x76   : > { %s3334_s10 = smov (!%p2639_p3), 32  }
  0x7a   : > { %v732_v0 = vld [vmem:[#allocation12 + $0xf0] sm:$0xff]  ;;  %v733_v1 = vld [vmem:[#allocation12 + $0xf8] sm:$0xff]  ;;  %v730_v2 = vld [vmem:[#allocation12 + $0xe0] sm:$0xff]  ;;  %v3335_v47 = vmov 1983009808   ;;  %vm807_vm0 = vcmask 1047556  }
  0x7b   : > { %740 = vmatpush.msra.mxu0 %v732_v0  ;;  %763 = vmatpush.msra.mxu1 %v733_v1  ;;  %v731_v3 = vld [vmem:[#allocation12 + $0xe8] sm:$0xff]  ;;  %v728_v4 = vld [vmem:[#allocation12 + $0xd0] sm:$0xff]  ;;  %v729_v5 = vld [vmem:[#allocation12 + $0xd8] sm:$0xff]  ;;  %v812_v48 = vunpack.c.l.s4 %v3335_v47  ;;  %v3336_v59 = vmov 1934713408   ;;  %vm1027_vm1 = vcmask 261120  }
  0x7c   : > { %2686 = vmatpush.msra.mxu3 %v733_v1  ;;  %2670 = vmatpush.msra.mxu2 %v732_v0  ;;  %v726_v6 = vld [vmem:[#allocation12 + $0xc0] sm:$0xff]  ;;  %v727_v7 = vld [vmem:[#allocation12 + $0xc8] sm:$0xff]  ;;  %v724_v8 = vld [vmem:[#allocation12 + $0xb0] sm:$0xff]  ;;  %v836_v60 = vunpack.c.l.s4 %v3336_v59 }
  0x7d   : > { %741 = vmatpush.msra.mxu0 %v730_v2  ;;  %764 = vmatpush.msra.mxu1 %v731_v3  ;;  %v725_v9 = vld [vmem:[#allocation12 + $0xb8] sm:$0xff]  ;;  %v722_v10 = vld [vmem:[#allocation12 + $0xa0] sm:$0xff]  ;;  %v723_v11 = vld [vmem:[#allocation12 + $0xa8] sm:$0xff]  ;;  %v3701_v54 = vunpack.c.0.s8 %v812_v48 }
  0x7e   : > { %2687 = vmatpush.msra.mxu3 %v731_v3  ;;  %2671 = vmatpush.msra.mxu2 %v730_v2  ;;  %v720_v12 = vld [vmem:[#allocation12 + $0x90] sm:$0xff]  ;;  %v721_v13 = vld [vmem:[#allocation12 + $0x98] sm:$0xff]  ;;  %v718_v14 = vld [vmem:[#allocation12 + $0x80] sm:$0xff] }
  0x7f   : > { %742 = vmatpush.msra.mxu0 %v728_v4  ;;  %765 = vmatpush.msra.mxu1 %v729_v5  ;;  %v719_v15 = vld [vmem:[#allocation12 + $0x88] sm:$0xff]  ;;  %v716_v16 = vld [vmem:[#allocation12 + $0x70] sm:$0xff]  ;;  %v717_v17 = vld [vmem:[#allocation12 + $0x78] sm:$0xff] }
  0x80   : > { %2688 = vmatpush.msra.mxu3 %v729_v5  ;;  %2672 = vmatpush.msra.mxu2 %v728_v4  ;;  %v714_v18 = vld [vmem:[#allocation12 + $0x60] sm:$0xff]  ;;  %v715_v19 = vld [vmem:[#allocation12 + $0x68] sm:$0xff]  ;;  %v712_v20 = vld [vmem:[#allocation12 + $0x50] sm:$0xff] }
  0x81   : > { %743 = vmatpush.msra.mxu0 %v726_v6  ;;  %766 = vmatpush.msra.mxu1 %v727_v7  ;;  %v713_v21 = vld [vmem:[#allocation12 + $0x58] sm:$0xff]  ;;  %v710_v22 = vld [vmem:[#allocation12 + $0x40] sm:$0xff]  ;;  %v711_v23 = vld [vmem:[#allocation12 + $0x48] sm:$0xff] }
  0x82   : > { %2689 = vmatpush.msra.mxu3 %v727_v7  ;;  %2673 = vmatpush.msra.mxu2 %v726_v6  ;;  %v708_v24 = vld [vmem:[#allocation12 + $0x30] sm:$0xff]  ;;  %v709_v25 = vld [vmem:[#allocation12 + $0x38] sm:$0xff]  ;;  %v706_v26 = vld [vmem:[#allocation12 + $0x20] sm:$0xff] }
  0x83   : > { %744 = vmatpush.msra.mxu0 %v724_v8  ;;  %767 = vmatpush.msra.mxu1 %v725_v9  ;;  %v707_v27 = vld [vmem:[#allocation12 + $0x28] sm:$0xff]  ;;  %v704_v28 = vld [vmem:[#allocation12 + $0x10] sm:$0xff]  ;;  %v705_v29 = vld [vmem:[#allocation12 + $0x18] sm:$0xff] }
  0x84   : > { %2690 = vmatpush.msra.mxu3 %v725_v9  ;;  %2674 = vmatpush.msra.mxu2 %v724_v8  ;;  %v702_v30 = vld [vmem:[#allocation12] sm:$0xff]  ;;  %v703_v31 = vld [vmem:[#allocation12 + $0x8] sm:$0xff]  ;;  %v3713_v8 = vunpack.c.0.s8 %v836_v60 }
  0x85   : > { %745 = vmatpush.msra.mxu0 %v722_v10  ;;  %768 = vmatpush.msra.mxu1 %v723_v11  ;;  %v700_v32 = vld [vmem:[%s611_s15] sm:$0xff]  ;;  %v701_v33 = vld [vmem:[%s611_s15 + $0x8] sm:$0xff] }
  0x86   : > { %2691 = vmatpush.msra.mxu3 %v723_v11  ;;  %2675 = vmatpush.msra.mxu2 %v722_v10  ;;  %v734_v34 = vld [vmem:[%s4283_s4] sm:$0x3] }
  0x87   : > { %746 = vmatpush.msra.mxu0 %v720_v12  ;;  %769 = vmatpush.msra.mxu1 %v721_v13  ;;  %v736_v35 = vperm.slane %v734_v34, 0  ;;  %v737_v36 = vperm.slane %v734_v34, 1 }
  0x88   : > { %2692 = vmatpush.msra.mxu3 %v721_v13  ;;  %2676 = vmatpush.msra.mxu2 %v720_v12 }
  0x89   : > { %747 = vmatpush.msra.mxu0 %v718_v14  ;;  %770 = vmatpush.msra.mxu1 %v719_v15 }
  0x8a   : > { %2693 = vmatpush.msra.mxu3 %v719_v15  ;;  %2677 = vmatpush.msra.mxu2 %v718_v14 }
  0x8b   : > { %748 = vmatpush.msra.mxu0 %v716_v16  ;;  %771 = vmatpush.msra.mxu1 %v717_v17 }
  0x8c   : > { %2694 = vmatpush.msra.mxu3 %v717_v17  ;;  %2678 = vmatpush.msra.mxu2 %v716_v16 }
  0x8d   : > { %749 = vmatpush.msra.mxu0 %v714_v18  ;;  %772 = vmatpush.msra.mxu1 %v715_v19 }
  0x8e   : > { %2695 = vmatpush.msra.mxu3 %v715_v19  ;;  %2679 = vmatpush.msra.mxu2 %v714_v18 }
  0x8f   : > { %750 = vmatpush.msra.mxu0 %v712_v20  ;;  %773 = vmatpush.msra.mxu1 %v713_v21 }
  0x90   : > { %2696 = vmatpush.msra.mxu3 %v713_v21  ;;  %2680 = vmatpush.msra.mxu2 %v712_v20 }
  0x91   : > { %751 = vmatpush.msra.mxu0 %v710_v22  ;;  %774 = vmatpush.msra.mxu1 %v711_v23 }
  0x92   : > { %2697 = vmatpush.msra.mxu3 %v711_v23  ;;  %2681 = vmatpush.msra.mxu2 %v710_v22 }
  0x93   : > { %752 = vmatpush.msra.mxu0 %v708_v24  ;;  %775 = vmatpush.msra.mxu1 %v709_v25 }
  0x94   : > { %2698 = vmatpush.msra.mxu3 %v709_v25  ;;  %2682 = vmatpush.msra.mxu2 %v708_v24 }
  0x95   : > { %753 = vmatpush.msra.mxu0 %v706_v26  ;;  %776 = vmatpush.msra.mxu1 %v707_v27 }
  0x96   : > { %2699 = vmatpush.msra.mxu3 %v707_v27  ;;  %2683 = vmatpush.msra.mxu2 %v706_v26 }
  0x97   : > { %754 = vmatpush.msra.mxu0 %v704_v28  ;;  %777 = vmatpush.msra.mxu1 %v705_v29 }
  0x98   : > { %2700 = vmatpush.msra.mxu3 %v705_v29  ;;  %2684 = vmatpush.msra.mxu2 %v704_v28 }
  0x99   : > { %755 = vmatpush.msra.mxu0 %v702_v30  ;;  %778 = vmatpush.msra.mxu1 %v703_v31 }
  0x9a   : > { %756 = vmatmul.f32.vlgmr.msra.gmra.mxu0 %v700_v32  ;;  %779 = vmatmul.f32.vlgmr.msra.gmra.mxu1 %v700_v32 }
  0x9b   : > { %2701 = vmatpush.msra.mxu3 %v703_v31  ;;  %2685 = vmatpush.msra.mxu2 %v702_v30 }
  0x9c   : > { %782 = vmatmul.f32.vlgmr.msra.gmra.mxu3 %v701_v33  ;;  %759 = vmatmul.f32.vlgmr.msra.gmra.mxu2 %v701_v33 }
 0x117   : > { %v757_v37 = vpop.f32.mrf.mxu0  ;;  %v780_v38 = vpop.f32.mrf.mxu1 }
 0x118   : > { %v758_v39 = vadd.f32 %v757_v37, %v736_v35  ;;  %v781_v40 = vadd.f32 %v780_v38, %v737_v36 }
 0x11a   : > { %1044 = vrot.lane.b32.xlu1 %v781_v40, %s3332_s6  ;;  %788 = vrot.lane.b32.xlu2 %v758_v39, %s3333_s8  ;;  %v809_v53 = vrot.slane %v758_v39, 4  ;;  %v1058_v57 = vrot.slane %v781_v40, 4 }
 0x11b   : > { %794 = vrot.lane.b32.xlu0 %v758_v39, %s3332_s6 }
 0x11f   : > { %v783_v41 = vpop.f32.mrf.mxu3  ;;  %v760_v43 = vpop.f32.mrf.mxu2 }
 0x120   : > { %v784_v42 = vadd.f32 %v783_v41, %v737_v36  ;;  %v3692_v44 = vadd.f32 %v760_v43, %v736_v35 }
 0x122   : > { %1046 = vrot.lane.b32.xlu1 %v784_v42, %s3332_s6  ;;  %1038 = vrot.lane.b32.xlu2 %v781_v40, %s3333_s8  ;;  %v1114_v63 = vrot.slane %v784_v42, 4  ;;  %v865_v15 = vrot.slane %v3692_v44, 4 }
 0x123   : > { %800 = vrot.lane.b32.xlu0 %v758_v39, %s3334_s10 }
 0x12a   : > { %802 = vrot.lane.b32.xlu1 %v3692_v44, %s3334_s10  ;;  %790 = vrot.lane.b32.xlu2 %v3692_v44, %s3333_s8 }
 0x12b   : > { %796 = vrot.lane.b32.xlu0 %v3692_v44, %s3332_s6 }
 0x132   : > { %1050 = vrot.lane.b32.xlu1 %v781_v40, %s3334_s10  ;;  %1052 = vrot.lane.b32.xlu2 %v784_v42, %s3334_s10 }
 0x133   : > { %1040 = vrot.lane.b32.xlu0 %v784_v42, %s3333_s8 }
 0x174   : > { %v789_v45 = vpop.permute.xlu2 %788 }
 0x175   : > { %v821_v0 = vrot.slane %v789_v45, 4 }
 0x17c   : > { %v3697_v46 = vpop.permute.xlu2 %1038 }
 0x17d   : > { %v1070_v16 = vrot.slane %v3697_v46, 4 }
 0x184   : > { %v3699_v50 = vpop.permute.xlu2 %790 }
 0x185   : > { %v877_v24 = vrot.slane %v3699_v50, 4 }
 0x18c   : > { %v1045_v49 = vpop.permute.xlu1 %1044  ;;  %v3719_v12 = vpop.permute.xlu2 %1052 }
 0x18d   : > { %v795_v51 = vpop.permute.xlu0 %794  ;;  %v1056_v55 = vrot.slane %v1045_v49, 4  ;;  %v1059_v61 = vsel %vm807_vm0, %v1045_v49, %v1058_v57  ;;  %v1124_v26 = vrot.slane %v3719_v12, 4 }
 0x18e   : > { %v806_v52 = vrot.slane %v795_v51, 4  ;;  %v810_v56 = vsel %vm807_vm0, %v795_v51, %v809_v53  ;;  %v3711_v7 = vperm.slane %v1059_v61, %v3701_v54 }
 0x18f   : > { %v818_v62 = vperm.slane %v810_v56, %v3701_v54  ;;  %v1057_v1 = vsel %vm807_vm0, %v1056_v55, %v781_v40 }
 0x190   : > { %v808_v58 = vsel %vm807_vm0, %v806_v52, %v758_v39  ;;  %v3717_v11 = vperm.slane %v1057_v1, %v3701_v54  ;;  %v1094_v25 = vrot.slane %v3711_v7, 4 }
 0x191   : > { %v814_v2 = vperm.slane %v808_v58, %v3701_v54  ;;  %v845_v13 = vrot.slane %v818_v62, 4 }
 0x192   : > { %v1082_v28 = vrot.slane %v3717_v11, 4 }
 0x193   : > { %v833_v17 = vrot.slane %v814_v2, 4 }
 0x194   : > { %v1047_v3 = vpop.permute.xlu1 %1046 }
 0x195   : > { %v1112_v4 = vrot.slane %v1047_v3, 4  ;;  %v1115_v5 = vsel %vm807_vm0, %v1047_v3, %v1114_v63  ;;  %v801_v6 = vpop.permute.xlu0 %800 }
 0x196   : > { %v819_v9 = vrot.slane %v801_v6, 4  ;;  %v822_v10 = vsel %vm807_vm0, %v801_v6, %v821_v0  ;;  %v3725_v18 = vperm.slane %v1115_v5, %v3701_v54 }
 0x197   : > { %v830_v14 = vperm.slane %v822_v10, %v3701_v54  ;;  %v1113_v20 = vsel %vm807_vm0, %v1112_v4, %v784_v42 }
 0x198   : > { %v820_v19 = vsel %vm807_vm0, %v819_v9, %v789_v45  ;;  %v3739_v32 = vperm.slane %v1113_v20, %v3701_v54  ;;  %v1150_v37 = vrot.slane %v3725_v18, 4 }
 0x199   : > { %v826_v21 = vperm.slane %v820_v19, %v3701_v54  ;;  %v843_v22 = vrot.slane %v830_v14, 4  ;;  %v846_v23 = vsel %vm807_vm0, %v830_v14, %v845_v13 }
 0x19a   : > { %v854_v27 = vperm.slane %v846_v23, %v3713_v8 }
 0x19b   : > { %v831_v29 = vrot.slane %v826_v21, 4  ;;  %v834_v30 = vsel %vm807_vm0, %v826_v21, %v833_v17  ;;  %v844_v31 = vsel %vm807_vm0, %v843_v22, %v818_v62 }
 0x19c   : > { %v842_v33 = vperm.slane %v834_v30, %v3713_v8  ;;  %v850_v34 = vperm.slane %v844_v31, %v3713_v8  ;;  %v861_v35 = vrot.slane %v854_v27, 4  ;;  %v803_v36 = vpop.permute.xlu1 %802 }
 0x19d   : > { %v832_v38 = vsel %vm807_vm0, %v831_v29, %v814_v2  ;;  %v875_v39 = vrot.slane %v803_v36, 4  ;;  %v878_v40 = vsel %vm807_vm0, %v803_v36, %v877_v24  ;;  %v797_v57 = vpop.permute.xlu0 %796 }
 0x19e   : > { %v838_v41 = vperm.slane %v832_v38, %v3713_v8  ;;  %v857_v42 = vrot.slane %v842_v33, 4  ;;  %v859_v43 = vrot.slane %v850_v34, 4  ;;  %v862_v45 = vsel %vm807_vm0, 0.0, %v861_v35 }
 0x19f   : > { %v930_v47 = vsel %vm807_vm0, %v861_v35, %v850_v34  ;;  %v935_v48 = vrot.slane %v862_v45, 4  ;;  %v876_v49 = vsel %vm807_vm0, %v875_v39, %v3699_v50  ;;  %v886_v51 = vperm.slane %v878_v40, %v3701_v54 }
 0x1a0   : > { %v855_v52 = vrot.slane %v838_v41, 4  ;;  %v858_v53 = vsel %vm807_vm0, 0.0, %v857_v42  ;;  %v860_v55 = vsel %vm807_vm0, 0.0, %v859_v43  ;;  %v919_v56 = vsel %vm807_vm0, %v857_v42, %v838_v41 }
 0x1a1   : > { %v923_v58 = vperm.slane %v919_v56, %v3701_v54  ;;  %v924_v59 = vrot.slane %v858_v53, 4  ;;  %v934_v60 = vperm.slane %v930_v47, %v3701_v54  ;;  %v936_v61 = vsel %vm807_vm0, %v935_v48, %v860_v55 }
 0x1a2   : > { %v856_v50 = vsel %vm807_vm0, 0.0, %v855_v52  ;;  %v940_v62 = vperm.slane %v936_v61, %v3701_v54  ;;  %v882_v63 = vperm.slane %v876_v49, %v3701_v54  ;;  %v899_v0 = vrot.slane %v886_v51, 4 }
 0x1a3   : > { %v925_v1 = vsel %vm807_vm0, %v924_v59, %v856_v50  ;;  %v943_v2 = vrot.slane %v923_v58, 4  ;;  %v955_v3 = vrot.slane %v934_v60, 4  ;;  %v863_v4 = vrot.slane %v797_v57, 4 }
 0x1a4   : > { %v929_v5 = vperm.slane %v925_v1, %v3701_v54  ;;  %v953_v6 = vrot.slane %v940_v62, 4  ;;  %v887_v9 = vrot.slane %v882_v63, 4  ;;  %v866_v10 = vsel %vm807_vm0, %v797_v57, %v865_v15  ;;  %v1051_v13 = vpop.permute.xlu1 %1050 }
 0x1a5   : > { %v956_v14 = vsel %vm807_vm0, %v940_v62, %v955_v3  ;;  %v864_v17 = vsel %vm807_vm0, %v863_v4, %v3692_v44  ;;  %v874_v19 = vperm.slane %v866_v10, %v3701_v54  ;;  %v1068_v20 = vrot.slane %v1051_v13, 4  ;;  %v3790_v57 = vpop.permute.xlu0 %1040 }
 0x1a6   : > { %v941_v21 = vrot.slane %v929_v5, 4  ;;  %v944_v22 = vsel %vm807_vm0, %v929_v5, %v943_v2  ;;  %v954_v23 = vsel %vm807_vm0, %v953_v6, %v934_v60  ;;  %v964_v24 = vperm.slane %v956_v14, %v3713_v8 }
 0x1a7   : > { %v952_v27 = vperm.slane %v944_v22, %v3713_v8  ;;  %v960_v15 = vperm.slane %v954_v23, %v3713_v8  ;;  %v870_v29 = vperm.slane %v864_v17, %v3701_v54  ;;  %v900_v30 = vsel %vm807_vm0, %v899_v0, %v874_v19 }
 0x1a8   : > { %v942_v44 = vsel %vm807_vm0, %v941_v21, %v923_v58  ;;  %v969_v31 = vrot.slane %v964_v24, 4  ;;  %v901_v33 = vrot.slane %v874_v19, 4  ;;  %v906_v34 = vperm.slane %v900_v30, %v3713_v8 }
 0x1a9   : > { %v948_v35 = vperm.slane %v942_v44, %v3713_v8  ;;  %v965_v36 = vrot.slane %v960_v15, 4  ;;  %v971_v38 = vrot.slane %v952_v27, 4  ;;  %v888_v39 = vsel %vm807_vm0, %v887_v9, %v870_v29 }
 0x1aa   : > { %v970_v40 = vsel %vm807_vm0, %v969_v31, %v952_v27  ;;  %v889_v41 = vrot.slane %v870_v29, 4  ;;  %v894_v42 = vperm.slane %v888_v39, %v3713_v8  ;;  %v902_v43 = vsel %vm807_vm0, %v886_v51, %v901_v33 }
 0x1ab   : > { %v966_v45 = vsel %vm807_vm0, %v965_v36, %v948_v35  ;;  %v967_v47 = vrot.slane %v948_v35, 4  ;;  %v972_v48 = vsel %vm807_vm0, %v964_v24, %v971_v38  ;;  %1032 = vst.msk [vmem:[#allocation2 + $0x20] sm:$0xff] %vm1027_vm1, %v970_v40  ;;  %v910_v49 = vperm.slane %v902_v43, %v3713_v8 }
 0x1ac   : > { %1028 = vst.msk [vmem:[#allocation2] sm:$0xff] %vm1027_vm1, %v966_v45  ;;  %v890_v52 = vsel %vm807_vm0, %v882_v63, %v889_v41  ;;  %v911_v53 = vrot.slane %v894_v42, 4  ;;  %v915_v55 = vrot.slane %v906_v34, 4  ;;  %v1069_v56 = vsel %vm807_vm0, %v1068_v20, %v3697_v46 }
 0x1ad   : > { %v968_v51 = vsel %vm807_vm0, %v960_v15, %v967_v47  ;;  %1034 = vst.msk [vmem:[#allocation2 + $0x30] sm:$0xff] %vm1027_vm1, %v972_v48  ;;  %v898_v58 = vperm.slane %v890_v52, %v3713_v8  ;;  %v917_v59 = vrot.slane %v910_v49, 4  ;;  %v1071_v60 = vsel %vm807_vm0, %v1051_v13, %v1070_v16 }
 0x1ae   : > { %1030 = vst.msk [vmem:[#allocation2 + $0x10] sm:$0xff] %vm1027_vm1, %v968_v51  ;;  %v912_v61 = vsel %vm807_vm0, 0.0, %v911_v53  ;;  %v916_v50 = vsel %vm807_vm0, 0.0, %v915_v55  ;;  %v1075_v62 = vperm.slane %v1069_v56, %v3701_v54  ;;  %v1079_v63 = vperm.slane %v1071_v60, %v3701_v54 }
 0x1af   : > { %v913_v0 = vrot.slane %v898_v58, 4  ;;  %v918_v1 = vsel %vm807_vm0, 0.0, %v917_v59  ;;  %v984_v2 = vsel %vm807_vm0, %v917_v59, %v906_v34  ;;  %v3809_v46 = vsel %vm807_vm0, %v1124_v26, %v3790_v57 }
 0x1b0   : > { %v988_v16 = vperm.slane %v984_v2, %v3701_v54  ;;  %v989_v3 = vrot.slane %v918_v1, 4  ;;  %v1080_v4 = vrot.slane %v1075_v62, 4  ;;  %v1083_v5 = vsel %vm807_vm0, %v1075_v62, %v1082_v28 }
 0x1b1   : > { %v914_v6 = vsel %vm807_vm0, 0.0, %v913_v0  ;;  %v973_v9 = vsel %vm807_vm0, %v913_v0, %v894_v42  ;;  %v1091_v10 = vperm.slane %v1083_v5, %v3713_v8  ;;  %v1092_v13 = vrot.slane %v1079_v63, 4 }
 0x1b2   : > { %v977_v14 = vperm.slane %v973_v9, %v3701_v54  ;;  %v978_v17 = vrot.slane %v914_v6, 4  ;;  %v990_v26 = vsel %vm807_vm0, %v989_v3, %v916_v50  ;;  %v1009_v19 = vrot.slane %v988_v16, 4 }
 0x1b3   : > { %v994_v20 = vperm.slane %v990_v26, %v3701_v54  ;;  %v1081_v21 = vsel %vm807_vm0, %v1080_v4, %v3717_v11  ;;  %v1093_v28 = vsel %vm807_vm0, %v1092_v13, %v3711_v7  ;;  %v1095_v22 = vsel %vm807_vm0, %v1079_v63, %v1094_v25 }
 0x1b4   : > { %v979_v23 = vsel %vm807_vm0, %v978_v17, %v912_v61  ;;  %v997_v24 = vrot.slane %v977_v14, 4  ;;  %v1087_v27 = vperm.slane %v1081_v21, %v3713_v8  ;;  %v1099_v15 = vperm.slane %v1093_v28, %v3713_v8 }
 0x1b5   : > { %v983_v29 = vperm.slane %v979_v23, %v3701_v54  ;;  %v1007_v30 = vrot.slane %v994_v20, 4  ;;  %v1010_v44 = vsel %vm807_vm0, %v994_v20, %v1009_v19  ;;  %v1103_v11 = vperm.slane %v1095_v22, %v3713_v8 }
 0x1b6   : > { %v1018_v31 = vperm.slane %v1010_v44, %v3713_v8  ;;  %v1104_v33 = vrot.slane %v1087_v27, 4  ;;  %v1106_v7 = vrot.slane %v1091_v10, 4  ;;  %v1108_v34 = vrot.slane %v1099_v15, 4 }
 0x1b7   : > { %v995_v25 = vrot.slane %v983_v29, 4  ;;  %v998_v35 = vsel %vm807_vm0, %v983_v29, %v997_v24  ;;  %v1008_v36 = vsel %vm807_vm0, %v1007_v30, %v988_v16  ;;  %v1110_v38 = vrot.slane %v1103_v11, 4 }
 0x1b8   : > { %v1006_v39 = vperm.slane %v998_v35, %v3713_v8  ;;  %v1014_v40 = vperm.slane %v1008_v36, %v3713_v8  ;;  %v1023_v41 = vrot.slane %v1018_v31, 4  ;;  %v1105_v42 = vsel %vm807_vm0, 0.0, %v1104_v33 }
 0x1b9   : > { %v996_v43 = vsel %vm807_vm0, %v995_v25, %v977_v14  ;;  %v1107_v45 = vsel %vm807_vm0, 0.0, %v1106_v7  ;;  %v1109_v47 = vsel %vm807_vm0, 0.0, %v1108_v34  ;;  %v1111_v48 = vsel %vm807_vm0, 0.0, %v1110_v38 }
 0x1ba   : > { %v1002_v49 = vperm.slane %v996_v43, %v3713_v8  ;;  %v1019_v52 = vrot.slane %v1014_v40, 4  ;;  %v1024_v53 = vsel %vm807_vm0, %v1023_v41, %v1006_v39  ;;  %v1025_v55 = vrot.slane %v1006_v39, 4 }
 0x1bb   : > { %1033 = vst.msk [vmem:[#allocation2 + $0x28] sm:$0xff] %vm1027_vm1, %v1024_v53  ;;  %v1168_v56 = vsel %vm807_vm0, %v1106_v7, %v1087_v27  ;;  %v1173_v51 = vrot.slane %v1107_v45, 4  ;;  %v1179_v58 = vsel %vm807_vm0, %v1110_v38, %v1099_v15  ;;  %v1184_v59 = vrot.slane %v1111_v48, 4 }
 0x1bc   : > { %v1020_v60 = vsel %vm807_vm0, %v1019_v52, %v1002_v49  ;;  %v1021_v61 = vrot.slane %v1002_v49, 4  ;;  %v1026_v50 = vsel %vm807_vm0, %v1018_v31, %v1025_v55  ;;  %v1172_v62 = vperm.slane %v1168_v56, %v3701_v54 }
 0x1bd   : > { %1029 = vst.msk [vmem:[#allocation2 + $0x8] sm:$0xff] %vm1027_vm1, %v1020_v60  ;;  %v1174_v63 = vsel %vm807_vm0, %v1173_v51, %v1105_v42  ;;  %v1183_v0 = vperm.slane %v1179_v58, %v3701_v54  ;;  %v1185_v1 = vsel %vm807_vm0, %v1184_v59, %v1109_v47  ;;  %v1126_v2 = vrot.slane %v3790_v57, 4 }
 0x1be   : > { %v1022_v16 = vsel %vm807_vm0, %v1014_v40, %v1021_v61  ;;  %1035 = vst.msk [vmem:[#allocation2 + $0x38] sm:$0xff] %vm1027_vm1, %v1026_v50  ;;  %v1178_v3 = vperm.slane %v1174_v63, %v3701_v54  ;;  %v1189_v4 = vperm.slane %v1185_v1, %v3701_v54  ;;  %v1192_v5 = vrot.slane %v1172_v62, 4 }
 0x1bf   : > { %v1138_v6 = vrot.slane %v3739_v32, 4  ;;  %1031 = vst.msk [vmem:[#allocation2 + $0x18] sm:$0xff] %vm1027_vm1, %v1022_v16  ;;  %v1204_v9 = vrot.slane %v1183_v0, 4  ;;  %v1127_v10 = vsel %vm807_vm0, %v3719_v12, %v1126_v2  ;;  %v1131_v57 = vperm.slane %v3809_v46, %v3701_v54 }
 0x1c0   : > { %v1190_v13 = vrot.slane %v1178_v3, 4  ;;  %v1193_v14 = vsel %vm807_vm0, %v1178_v3, %v1192_v5  ;;  %v1202_v17 = vrot.slane %v1189_v4, 4  ;;  %v1135_v26 = vperm.slane %v1127_v10, %v3701_v54 }
 0x1c1   : > { %v1201_v19 = vperm.slane %v1193_v14, %v3713_v8  ;;  %v1205_v20 = vsel %vm807_vm0, %v1189_v4, %v1204_v9  ;;  %v1136_v21 = vrot.slane %v1131_v57, 4  ;;  %v1139_v28 = vsel %vm807_vm0, %v1131_v57, %v1138_v6 }
 0x1c2   : > { %v1191_v22 = vsel %vm807_vm0, %v1190_v13, %v1172_v62  ;;  %v1203_v12 = vsel %vm807_vm0, %v1202_v17, %v1183_v0  ;;  %v1213_v23 = vperm.slane %v1205_v20, %v3713_v8  ;;  %v1147_v46 = vperm.slane %v1139_v28, %v3713_v8 }
 0x1c3   : > { %v1197_v24 = vperm.slane %v1191_v22, %v3713_v8  ;;  %v1209_v27 = vperm.slane %v1203_v12, %v3713_v8  ;;  %v1220_v15 = vrot.slane %v1201_v19, 4  ;;  %v1137_v29 = vsel %vm807_vm0, %v1136_v21, %v3739_v32 }
 0x1c4   : > { %v1218_v30 = vrot.slane %v1213_v23, 4  ;;  %v1143_v44 = vperm.slane %v1137_v29, %v3713_v8  ;;  %v1148_v11 = vrot.slane %v1135_v26, 4  ;;  %v1151_v31 = vsel %vm807_vm0, %v1135_v26, %v1150_v37 }
 0x1c5   : > { %v1214_v33 = vrot.slane %v1209_v27, 4  ;;  %v1216_v7 = vrot.slane %v1197_v24, 4  ;;  %v1221_v34 = vsel %vm807_vm0, %v1213_v23, %v1220_v15  ;;  %v1159_v25 = vperm.slane %v1151_v31, %v3713_v8 }
 0x1c6   : > { %v1219_v35 = vsel %vm807_vm0, %v1218_v30, %v1201_v19  ;;  %1282 = vst.msk [vmem:[#allocation3 + $0x30] sm:$0xff] %vm1027_vm1, %v1221_v34  ;;  %v1149_v32 = vsel %vm807_vm0, %v1148_v11, %v3725_v18  ;;  %v1160_v36 = vrot.slane %v1143_v44, 4  ;;  %v1162_v38 = vrot.slane %v1147_v46, 4 }
 0x1c7   : > { %v1215_v39 = vsel %vm807_vm0, %v1214_v33, %v1197_v24  ;;  %v1217_v40 = vsel %vm807_vm0, %v1209_v27, %v1216_v7  ;;  %1280 = vst.msk [vmem:[#allocation3 + $0x20] sm:$0xff] %vm1027_vm1, %v1219_v35  ;;  %v1155_v37 = vperm.slane %v1149_v32, %v3713_v8  ;;  %v1166_v41 = vrot.slane %v1159_v25, 4 }
 0x1c8   : > { %1276 = vst.msk [vmem:[#allocation3] sm:$0xff] %vm1027_vm1, %v1215_v39  ;;  %v1161_v42 = vsel %vm807_vm0, 0.0, %v1160_v36  ;;  %v1163_v43 = vsel %vm807_vm0, 0.0, %v1162_v38  ;;  %v1222_v45 = vsel %vm807_vm0, %v1162_v38, %v1143_v44 }
 0x1c9   : > { %1278 = vst.msk [vmem:[#allocation3 + $0x10] sm:$0xff] %vm1027_vm1, %v1217_v40  ;;  %v1164_v18 = vrot.slane %v1155_v37, 4  ;;  %v1167_v47 = vsel %vm807_vm0, 0.0, %v1166_v41  ;;  %v1226_v48 = vperm.slane %v1222_v45, %v3701_v54  ;;  %v1227_v49 = vrot.slane %v1163_v43, 4 }
 0x1ca   : > { %v1233_v52 = vsel %vm807_vm0, %v1166_v41, %v1155_v37  ;;  %v1238_v53 = vrot.slane %v1167_v47, 4 }
 0x1cb   : > { %v1165_v55 = vsel %vm807_vm0, 0.0, %v1164_v18  ;;  %v1228_v56 = vsel %vm807_vm0, %v1227_v49, %v1161_v42  ;;  %v1237_v51 = vperm.slane %v1233_v52, %v3701_v54  ;;  %v1246_v58 = vrot.slane %v1226_v48, 4 }
 0x1cc   : > { %v1232_v59 = vperm.slane %v1228_v56, %v3701_v54  ;;  %v1239_v60 = vsel %vm807_vm0, %v1238_v53, %v1165_v55 }
 0x1cd   : > { %v1243_v61 = vperm.slane %v1239_v60, %v3701_v54  ;;  %v1258_v50 = vrot.slane %v1237_v51, 4 }
 0x1ce   : > { %v1244_v62 = vrot.slane %v1232_v59, 4  ;;  %v1247_v63 = vsel %vm807_vm0, %v1232_v59, %v1246_v58 }
 0x1cf   : > { %v1255_v0 = vperm.slane %v1247_v63, %v3713_v8  ;;  %v1256_v1 = vrot.slane %v1243_v61, 4  ;;  %v1259_v2 = vsel %vm807_vm0, %v1243_v61, %v1258_v50 }
 0x1d0   : > { %v1245_v16 = vsel %vm807_vm0, %v1244_v62, %v1226_v48  ;;  %v1267_v3 = vperm.slane %v1259_v2, %v3713_v8 }
 0x1d1   : > { %v1251_v4 = vperm.slane %v1245_v16, %v3713_v8  ;;  %v1257_v5 = vsel %vm807_vm0, %v1256_v1, %v1237_v51  ;;  %v1274_v6 = vrot.slane %v1255_v0, 4 }
 0x1d2   : > { %v1263_v54 = vperm.slane %v1257_v5, %v3713_v8  ;;  %v1272_v9 = vrot.slane %v1267_v3, 4 }
 0x1d3   : > { %v1270_v10 = vrot.slane %v1251_v4, 4  ;;  %v1275_v57 = vsel %vm807_vm0, %v1267_v3, %v1274_v6 }
 0x1d4   : > { %v1268_v13 = vrot.slane %v1263_v54, 4  ;;  %v1273_v14 = vsel %vm807_vm0, %v1272_v9, %v1255_v0  ;;  %1283 = vst.msk [vmem:[#allocation3 + $0x38] sm:$0xff] %vm1027_vm1, %v1275_v57 }
 0x1d5   : > { %v1271_v17 = vsel %vm807_vm0, %v1263_v54, %v1270_v10  ;;  %1281 = vst.msk [vmem:[#allocation3 + $0x28] sm:$0xff] %vm1027_vm1, %v1273_v14 }
 0x1d6   : > { %v1269_v26 = vsel %vm807_vm0, %v1268_v13, %v1251_v4  ;;  %1279 = vst.msk [vmem:[#allocation3 + $0x18] sm:$0xff] %vm1027_vm1, %v1271_v17 }
 0x1d7   : > { %1277 = vst.msk [vmem:[#allocation3 + $0x8] sm:$0xff] %vm1027_vm1, %v1269_v26 }
 0x1d8 PF: > { %v1300_v8 = vld [vmem:[#allocation9 + $0x78] sm:$0xff]  ;;  %v1299_v19 = vld [vmem:[#allocation9 + $0x70] sm:$0xff]  ;;  %v1298_v20 = vld [vmem:[#allocation9 + $0x68] sm:$0xff]  ;;  %s3337_s27 = smov 32   ;;  %s3338_s16 = smov 96   ;;  %vm1455_vm2 = vcmask 261120  }
 0x1d9   : > { %1305 = vmatpush.msra.mxu0 %v1300_v8  ;;  %v1297_v21 = vld [vmem:[#allocation9 + $0x60] sm:$0xff]  ;;  %v1296_v28 = vld [vmem:[#allocation9 + $0x58] sm:$0xff]  ;;  %v1295_v22 = vld [vmem:[#allocation9 + $0x50] sm:$0xff]  ;;  %s3339_s9 = smov 64   ;;  %v3340_v36 = vmov 1983009808  }
 0x1da   : > { %v1294_v12 = vld [vmem:[#allocation9 + $0x48] sm:$0xff]  ;;  %v1293_v23 = vld [vmem:[#allocation9 + $0x40] sm:$0xff]  ;;  %v1292_v46 = vld [vmem:[#allocation9 + $0x38] sm:$0xff]  ;;  %v1342_v38 = vunpack.c.l.s4 %v3340_v36  ;;  %vm1337_vm3 = vcmask 1047556   ;;  %v3341_v49 = vmov 1934713408  }
 0x1db   : > { %1306 = vmatpush.msra.mxu0 %v1299_v19  ;;  %v1291_v24 = vld [vmem:[#allocation9 + $0x30] sm:$0xff]  ;;  %v1290_v27 = vld [vmem:[#allocation9 + $0x28] sm:$0xff]  ;;  %v1289_v15 = vld [vmem:[#allocation9 + $0x20] sm:$0xff]  ;;  %v1366_v52 = vunpack.c.l.s4 %v3341_v49  ;;  %vm1560_vm4 = vcmask 64512   ;;  %s4286_s18 = sld [smem:[#allocation40_spill]]  ;;  %s2431_s6 = scalar_lea.sflag [#allocation6], %s3647_s2 }
 0x1dc   : > { %v1288_v29 = vld [vmem:[#allocation9 + $0x18] sm:$0xff]  ;;  %v1287_v30 = vld [vmem:[#allocation9 + $0x10] sm:$0xff]  ;;  %v1286_v44 = vld [vmem:[#allocation9 + $0x8] sm:$0xff]  ;;  %v3934_v45 = vunpack.c.0.s8 %v1342_v38  ;;  %s4287_s29 = sld [smem:[#allocation45_spill]] }
 0x1dd   : > { %1307 = vmatpush.msra.mxu0 %v1298_v20  ;;  %v1285_v11 = vld [vmem:[#allocation9] sm:$0xff]  ;;  %v3925_v31 = vld [vmem:[%s3651_s19] sm:$0xff]  ;;  %v1718_v39 = vld [vmem:[#allocation2 + $0x18] sm:$0xff]  ;;  %v3942_v58 = vunpack.c.0.s8 %v1366_v52  ;;  %s4288_s15 = sld [smem:[#allocation46_spill]] }
 0x1de   : > { %v2885_v33 = vld [vmem:[#allocation10] ss:$0 sm:$0xff]  ;;  %v1449_v35 = vld [vmem:[#allocation2 + $0x20] sm:$0xff]  ;;  %2654 = vmatpush.xpose.msk.msra.mxu1 %vm1455_vm2, %v1718_v39  ;;  %s4289_s12 = sld [smem:[#allocation42_spill]] }
 0x1df   : > { %1308 = vmatpush.msra.mxu0 %v1297_v21  ;;  %v1447_v32 = vld [vmem:[#allocation2] sm:$0xff]  ;;  %2644 = vmatpush.xpose.msk.msra.mxu3 %vm1455_vm2, %v1449_v35  ;;  %v1448_v43 = vld [vmem:[#allocation2 + $0x10] sm:$0xff]  ;;  %s4290_s8 = sld [smem:[#allocation44_spill]] }
 0x1e0   : > { %2640 = vmatpush.xpose.msk.msra.mxu2 %vm1455_vm2, %v1447_v32  ;;  %v1450_v47 = vld [vmem:[#allocation2 + $0x30] sm:$0xff]  ;;  %s4291_s10 = sld [smem:[#allocation28_spill]] }
 0x1e1   : > { %1309 = vmatpush.msra.mxu0 %v1296_v28  ;;  %s4293_s19 = sld [smem:[#allocation47_spill]] }
 0x1e2   : > { %s4294_s13 = sld [smem:[#allocation49_spill]] }
 0x1e3   : > { %1310 = vmatpush.msra.mxu0 %v1295_v22  ;;  %2646 = vmatpush.xpose.msk.msrb.mxu3 %vm1455_vm2, %v1450_v47  ;;  %s4295_s17 = sld [smem:[#allocation48_spill]] }
 0x1e4   : > { %2642 = vmatpush.xpose.msk.msrb.mxu2 %vm1455_vm2, %v1448_v43 }
 0x1e5   : > { %1311 = vmatpush.msra.mxu0 %v1294_v12 }
 0x1e7   : > { %1312 = vmatpush.msra.mxu0 %v1293_v23 }
 0x1e9   : > { %1313 = vmatpush.msra.mxu0 %v1292_v46 }
 0x1eb   : > { %1314 = vmatpush.msra.mxu0 %v1291_v24 }
 0x1ed   : > { %1315 = vmatpush.msra.mxu0 %v1290_v27 }
 0x1ef   : > { %1316 = vmatpush.msra.mxu0 %v1289_v15 }
 0x1f1   : > { %1317 = vmatpush.msra.mxu0 %v1288_v29 }
 0x1f3   : > { %1318 = vmatpush.msra.mxu0 %v1287_v30 }
 0x1f5   : > { %1319 = vmatpush.msra.mxu0 %v1286_v44 }
 0x1f7   : > { %1320 = vmatpush.msra.mxu0 %v1285_v11 }
 0x1f8   : > { %1321 = vmatmul.f32.vlgmr.msra.gmra.mxu0 %v3925_v31 }
 0x275   : > { %v1322_v7 = vpop.f32.mrf.mxu0 }
 0x276   : > { %v1323_v34 = vadd.f32 %v2885_v33, %v1322_v7 }
 0x278   : > { %v1325_v25 = vmul.f32 0.17677669, %v1323_v34 }
 0x27a   : > { %1333 = vrot.lane.b32.xlu1 %v1325_v25, %s3337_s27  ;;  %1327 = vrot.lane.b32.xlu0 %v1325_v25, %s3338_s16  ;;  %v1339_v55 = vrot.slane %v1325_v25, 4 }
 0x282   : > { %1330 = vrot.lane.b32.xlu0 %v1325_v25, %s3339_s9 }
 0x2ec   : > { %v1334_v40 = vpop.permute.xlu1 %1333  ;;  %v1328_v37 = vpop.permute.xlu0 %1327 }
 0x2ed   : > { %v1349_v41 = vrot.slane %v1334_v40, 4  ;;  %v1351_v42 = vrot.slane %v1328_v37, 4 }
 0x2ef   : > { %v1352_v18 = vsel %vm1337_vm3, %v1334_v40, %v1351_v42  ;;  %v1350_v48 = vsel %vm1337_vm3, %v1349_v41, %v1328_v37 }
 0x2f0   : > { %v1360_v53 = vperm.slane %v1352_v18, %v3934_v45  ;;  %v1356_v56 = vperm.slane %v1350_v48, %v3934_v45 }
 0x2f2   : > { %v1373_v61 = vrot.slane %v1360_v53, 4  ;;  %v1361_v63 = vrot.slane %v1356_v56, 4 }
 0x2f4   : > { %v1331_v51 = vpop.permute.xlu0 %1330 }
 0x2f5   : > { %v1336_v59 = vrot.slane %v1331_v51, 4  ;;  %v1340_v60 = vsel %vm1337_vm3, %v1331_v51, %v1339_v55 }
 0x2f6   : > { %v1348_v50 = vperm.slane %v1340_v60, %v3934_v45 }
 0x2f7   : > { %v1338_v62 = vsel %vm1337_vm3, %v1336_v59, %v1325_v25 }
 0x2f8   : > { %v1344_v0 = vperm.slane %v1338_v62, %v3934_v45  ;;  %v1374_v1 = vsel %vm1337_vm3, %v1373_v61, %v1348_v50  ;;  %v1375_v2 = vrot.slane %v1348_v50, 4  ;;  %v1453_v62 = vld [vmem:[#allocation3 + $0x20] sm:$0xff] }
 0x2f9   : > { %v1380_v16 = vperm.slane %v1374_v1, %v3942_v58  ;;  %1685 = vmatpush.msrb.mxu0 %v1453_v62  ;;  %v1454_v1 = vld [vmem:[#allocation3 + $0x30] sm:$0xff] }
 0x2fa   : > { %v1362_v3 = vsel %vm1337_vm3, %v1361_v63, %v1344_v0  ;;  %v1363_v4 = vrot.slane %v1344_v0, 4  ;;  %v1376_v5 = vsel %vm1337_vm3, %v1360_v53, %v1375_v2  ;;  %v1451_v63 = vld [vmem:[#allocation3] sm:$0xff]  ;;  %v1452_v0 = vld [vmem:[#allocation3 + $0x10] sm:$0xff]  ;;  %v1717_v2 = vld [vmem:[#allocation2 + $0x8] sm:$0xff] }
 0x2fb   : > { %v1368_v6 = vperm.slane %v1362_v3, %v3942_v58  ;;  %v1384_v54 = vperm.slane %v1376_v5, %v3942_v58  ;;  %v1389_v57 = vrot.slane %v1380_v16, 4 }
 0x2fc   : > { %v1364_v9 = vsel %vm1337_vm3, %v1356_v56, %v1363_v4 }
 0x2fd   : > { %v1372_v10 = vperm.slane %v1364_v9, %v3942_v58  ;;  %v1391_v13 = vrot.slane %v1384_v54, 4  ;;  %v1385_v14 = vrot.slane %v1368_v6, 4  ;;  %v1390_v28 = vsel %vm1337_vm3, 0.0, %v1389_v57 }
 0x2ff   : > { %v1387_v17 = vrot.slane %v1372_v10, 4  ;;  %v1392_v26 = vsel %vm1337_vm3, 0.0, %v1391_v13  ;;  %v1404_v8 = vsel %vm1337_vm3, %v1391_v13, %v1380_v16  ;;  %v1386_v27 = vsel %vm1337_vm3, 0.0, %v1385_v14 }
 0x300   : > { %v1408_v19 = vperm.slane %v1404_v8, %v3934_v45  ;;  %v1409_v20 = vrot.slane %v1392_v26, 4  ;;  %v1719_v26 = vld [vmem:[#allocation2 + $0x28] sm:$0xff] }
 0x301   : > { %v1388_v21 = vsel %vm1337_vm3, 0.0, %v1387_v17  ;;  %v1393_v22 = vsel %vm1337_vm3, %v1387_v17, %v1368_v6 }
 0x302   : > { %v1410_v12 = vsel %vm1337_vm3, %v1409_v20, %v1390_v28  ;;  %v1397_v23 = vperm.slane %v1393_v22, %v3934_v45  ;;  %v1398_v46 = vrot.slane %v1388_v21, 4  ;;  %v1429_v24 = vrot.slane %v1408_v19, 4 }
 0x303   : > { %v1414_v15 = vperm.slane %v1410_v12, %v3934_v45  ;;  %v1720_v12 = vld [vmem:[#allocation2 + $0x38] sm:$0xff] }
 0x304   : > { %v1399_v29 = vsel %vm1337_vm3, %v1398_v46, %v1386_v27  ;;  %v1417_v30 = vrot.slane %v1397_v23, 4 }
 0x305   : > { %v1403_v44 = vperm.slane %v1399_v29, %v3934_v45  ;;  %v1430_v11 = vsel %vm1337_vm3, %v1414_v15, %v1429_v24  ;;  %v1427_v33 = vrot.slane %v1414_v15, 4 }
 0x306   : > { %v1438_v7 = vperm.slane %v1430_v11, %v3942_v58 }
 0x307   : > { %v1418_v34 = vsel %vm1337_vm3, %v1403_v44, %v1417_v30  ;;  %v1415_v25 = vrot.slane %v1403_v44, 4  ;;  %v1428_v35 = vsel %vm1337_vm3, %v1427_v33, %v1408_v19  ;;  %v1722_v30 = vld [vmem:[#allocation3 + $0x18] sm:$0xff] }
 0x308   : > { %v1426_v32 = vperm.slane %v1418_v34, %v3942_v58  ;;  %v1443_v36 = vrot.slane %v1438_v7, 4  ;;  %v1434_v38 = vperm.slane %v1428_v35, %v3942_v58 }
 0x309   : > { %v1416_v39 = vsel %vm1337_vm3, %v1415_v25, %v1397_v23 }
 0x30a   : > { %v3976_v40 = vsel %vm1337_vm3, %v1443_v36, %v1426_v32  ;;  %v1422_v37 = vperm.slane %v1416_v39, %v3942_v58  ;;  %v1439_v41 = vrot.slane %v1434_v38, 4  ;;  %v1445_v47 = vrot.slane %v1426_v32, 4 }
 0x30b   : > { %2645 = vmatmul.msk.f32.vlgmr.msra.gmra.mxu3 %vm1455_vm2, %v3976_v40 }
 0x30c   : > { %v3982_v42 = vsel %vm1337_vm3, %v1439_v41, %v1422_v37  ;;  %v1441_v43 = vrot.slane %v1422_v37, 4  ;;  %v3989_v48 = vsel %vm1337_vm3, %v1438_v7, %v1445_v47  ;;  %1662 = vmatpush.msra.mxu3 %v1452_v0 }
 0x30d   : > { %2641 = vmatmul.msk.f32.vlgmr.msra.gmra.mxu2 %vm1455_vm2, %v3982_v42 }
 0x30e   : > { %v1442_v18 = vsel %vm1337_vm3, %v1434_v38, %v1441_v43  ;;  %1639 = vmatpush.msra.mxu2 %v1451_v63 }
 0x30f   : > { %2655 = vmatmul.msk.f32.vlgmr.msra.gmra.mxu1 %vm1455_vm2, %v1442_v18 }
 0x313   : > { %2647 = vmatmul.msk.f32.vlgmr.msrb.gmra.mxu3 %vm1455_vm2, %v3989_v48 }
 0x314   : > { %2652 = vmatpush.xpose.msk.msrb.mxu3 %vm1455_vm2, %v1717_v2 }
 0x315   : > { %2643 = vmatmul.msk.f32.vlgmr.msrb.gmra.mxu2 %vm1455_vm2, %v1442_v18 }
 0x316   : > { %1708 = vmatpush.msrb.mxu2 %v1454_v1 }
 0x38c   : > { %v1768_v61 = vpop.f32.mrf.mxu1 }
 0x38d   : > { %v1820_v50 = vsel %vm1560_vm4, %v1768_v61, -inf }
 0x38e   : > { %v1531_v49 = vpop.f32.mrf.mxu3 }
 0x38f   : > { %v1567_v52 = vsel %vm1560_vm4, %v1531_v49, -inf }
 0x390   : > { %1568 = vmax.xlane.f32.xlu0 %v1567_v52  ;;  %v1479_v53 = vpop.f32.mrf.mxu2 }
 0x391   : > { %v1561_v55 = vsel %vm1560_vm4, %v1479_v53, -inf }
 0x392   : > { %1562 = vmax.xlane.f32.xlu1 %v1561_v55 }
 0x396   : > { %v1557_v59 = vpop.f32.mrf.mxu3 }
 0x397   : > { %v1570_v60 = vsel %vm1560_vm4, %v1557_v59, -inf }
 0x398   : > { %v1505_v56 = vpop.f32.mrf.mxu2 }
 0x399   : > { %v1564_v51 = vsel %vm1560_vm4, %v1505_v56, -inf }
 0x39a   : > { %1565 = vmax.xlane.f32.xlu2 %v1564_v51 }
 0x3a2   : > { %1571 = vmax.xlane.f32.xlu2 %v1570_v60  ;;  %v1723_v60 = vld [vmem:[#allocation3 + $0x28] sm:$0xff] }
 0x3aa   : > { %1821 = vmax.xlane.f32.xlu2 %v1820_v50  ;;  %v1724_v50 = vld [vmem:[#allocation3 + $0x38] sm:$0xff] }
 0x3ab   : > { %1968 = vmatpush.msra.mxu0 %v1724_v50 }
 0x403   : > { %v1569_v16 = vpop.xlane.xlu0 %1568 }
 0x404   : > { %v4000_v3 = vmax.f32 %v1569_v16, -1e+30 }
 0x405   : > { %v1563_v4 = vpop.xlane.xlu1 %1562 }
 0x406   : > { %v1591_v5 = vsub.f32 %v1531_v49, %v4000_v3  ;;  %v4003_v6 = vmax.f32 %v1563_v4, -1e+30 }
 0x408   : > { %v1597_v54 = vmul.f32 1.442695, %v1591_v5  ;;  %v1589_v9 = vsub.f32 %v1479_v53, %v4003_v6  ;;  %v1577_v63 = vsub.f32 -1e+30, %v4003_v6 }
 0x40a   : > { %2892 = vpow2.f32 %v1597_v54  ;;  %v1593_v10 = vmul.f32 1.442695, %v1589_v9  ;;  %v1581_v2 = vmul.f32 1.442695, %v1577_v63 }
 0x40c   : > { %2894 = vpow2.f32 %v1593_v10 }
 0x40d   : > { %v1566_v57 = vpop.xlane.xlu2 %1565 }
 0x40e   : > { %v1574_v13 = vmax.f32 %v1566_v57, -1e+30 }
 0x410   : > { %v2893_v14 = vpop.eup %2892  ;;  %v1590_v17 = vsub.f32 %v1505_v56, %v1574_v13  ;;  %v1578_v34 = vsub.f32 -1e+30, %v1574_v13 }
 0x411   : > { %2650 = vmatmul.msk.f32.vlgmr.msrb.gmra.mxu0 %vm1560_vm4, %v2893_v14  ;;  %v1611_v51 = vsel %vm1560_vm4, %v2893_v14, 0.0 }
 0x412   : > { %v2895_v8 = vpop.eup %2894  ;;  %v1595_v19 = vmul.f32 1.442695, %v1590_v17  ;;  %v1583_v25 = vmul.f32 1.442695, %v1578_v34 }
 0x413   : > { %2648 = vmatmul.msk.f32.vlgmr.msra.gmra.mxu2 %vm1560_vm4, %v2895_v8  ;;  %v1605_v20 = vsel %vm1560_vm4, %v2895_v8, 0.0 }
 0x414   : > { %2896 = vpow2.f32 %v1595_v19  ;;  %1606 = vadd.xlane.f32.xlu1 %v1605_v20  ;;  %2656 = vmatpush.xpose.msk.msra.mxu2 %vm1455_vm2, %v1719_v26 }
 0x415   : > { %v1572_v21 = vpop.xlane.xlu2 %1571 }
 0x416   : > { %v4010_v28 = vmax.f32 %v1572_v21, -1e+30 }
 0x418   : > { %v1592_v22 = vsub.f32 %v1557_v59, %v4010_v28  ;;  %v1580_v5 = vsub.f32 -1e+30, %v4010_v28 }
 0x41a   : > { %v2897_v23 = vpop.eup %2896  ;;  %v1599_v46 = vmul.f32 1.442695, %v1592_v22  ;;  %v1587_v57 = vmul.f32 1.442695, %v1580_v5 }
 0x41b   : > { %2649 = vmatmul.msk.f32.vlgmr.msra.gmra.mxu3 %vm1560_vm4, %v2897_v23  ;;  %v1608_v24 = vsel %vm1560_vm4, %v2897_v23, 0.0 }
 0x41c   : > { %2898 = vpow2.f32 %v1599_v46  ;;  %1609 = vadd.xlane.f32.xlu0 %v1608_v24  ;;  %2658 = vmatpush.xpose.msk.msra.mxu3 %vm1455_vm2, %v1720_v12 }
 0x41d   : > { %v1822_v27 = vpop.xlane.xlu2 %1821 }
 0x41e   : > { %v1830_v15 = vmax.f32 %v1574_v13, %v1822_v27 }
 0x420   : > { %v1834_v29 = vsub.f32 %v1574_v13, %v1830_v15  ;;  %v1846_v11 = vsub.f32 %v1768_v61, %v1830_v15  ;;  %v1721_v61 = vld [vmem:[#allocation3 + $0x8] sm:$0xff] }
 0x421   : > { %1899 = vmatpush.msrb.mxu1 %v1721_v61 }
 0x422   : > { %v2899_v44 = vpop.eup %2898  ;;  %v1851_v33 = vmul.f32 1.442695, %v1846_v11  ;;  %v1839_v35 = vmul.f32 1.442695, %v1834_v29 }
 0x423   : > { %2651 = vmatmul.msk.f32.vlgmr.msrb.gmra.mxu2 %vm1560_vm4, %v2899_v44  ;;  %2653 = vmatmul.msk.f32.vlgmr.msrb.gmra.mxu3 %vm1455_vm2, %v3982_v42  ;;  %v1614_v59 = vsel %vm1560_vm4, %v2899_v44, 0.0 }
 0x424   : > { %1922 = vmatpush.msrb.mxu2 %v1722_v30  ;;  %2900 = vpow2.f32 %v1851_v33  ;;  %1945 = vmatpush.msrb.mxu3 %v1723_v60 }
 0x425   : > { %2902 = vpow2.f32 %v1583_v25 }
 0x426   : > { %2904 = vpow2.f32 %v1839_v35 }
 0x42a   : > { %v4023_v7 = vpop.eup %2900 }
 0x42b   : > { %2657 = vmatmul.msk.f32.vlgmr.msra.gmra.mxu2 %vm1455_vm2, %v3976_v40  ;;  %2659 = vmatmul.msk.f32.vlgmr.msra.gmra.mxu3 %vm1455_vm2, %v3989_v48  ;;  %v2903_v32 = vpop.eup %2902  ;;  %v1864_v30 = vsel %vm1560_vm4, %v4023_v7, 0.0 }
 0x42c   : > { %v1602_v36 = vmul.f32 0.0, %v2903_v32  ;;  %v2905_v37 = vpop.eup %2904  ;;  %v1579_v32 = vsub.f32 -1e+30, %v4000_v3 }
 0x433   : > { %2661 = vmatmul.msk.f32.vlgmr.msrb.gmra.mxu2 %vm1560_vm4, %v4023_v7  ;;  %v1585_v7 = vmul.f32 1.442695, %v1579_v32 }
 0x48f   : > { %v1610_v38 = vpop.xlane.xlu0 %1609 }
 0x490   : > { %v1618_v39 = vadd.f32 %v1610_v38, %v1602_v36 }
 0x492   : > { %v4027_v40 = vmul.f32 %v2905_v37, %v1618_v39 }
 0x496   : > { %v1641_v41 = vpop.f32.mrf.mxu2 }
 0x49e   : > { %v1664_v42 = vpop.f32.mrf.mxu3 }
 0x49f   : > { %v1714_v43 = vadd.f32 %v1664_v42, %v1602_v36 }
 0x4a1   : > { %v4029_v18 = vmul.f32 %v2905_v37, %v1714_v43 }
 0x4a6   : > { %v4031_v47 = vpop.f32.mrf.mxu2  ;;  %v1745_v52 = vpop.f32.mrf.mxu3 }
 0x4a7   : > { %v1817_v53 = vsel %vm1560_vm4, %v1745_v52, -inf }
 0x4ae   : > { %v1791_v48 = vpop.f32.mrf.mxu2  ;;  %v1814_v55 = vpop.f32.mrf.mxu3 }
 0x4af   : > { %v1823_v49 = vsel %vm1560_vm4, %v1791_v48, -inf  ;;  %v1826_v56 = vsel %vm1560_vm4, %v1814_v55, -inf }
 0x4b0   : > { %1824 = vmax.xlane.f32.xlu2 %v1823_v49 }
 0x4b8   : > { %1818 = vmax.xlane.f32.xlu2 %v1817_v53 }
 0x4c0   : > { %1827 = vmax.xlane.f32.xlu2 %v1826_v56 }
 0x4c8   : > { %1612 = vadd.xlane.f32.xlu2 %v1611_v51 }
 0x4d0   : > { %1615 = vadd.xlane.f32.xlu2 %v1614_v59 }
 0x523   : > { %v1825_v62 = vpop.xlane.xlu2 %1824 }
 0x524   : > { %v1831_v0 = vmax.f32 %v4000_v3, %v1825_v62 }
 0x526   : > { %v1847_v1 = vsub.f32 %v1791_v48, %v1831_v0  ;;  %v1835_v36 = vsub.f32 %v4000_v3, %v1831_v0 }
 0x528   : > { %v1853_v16 = vmul.f32 1.442695, %v1847_v1  ;;  %v1841_v38 = vmul.f32 1.442695, %v1835_v36  ;;  %v1687_v1 = vpop.f32.mrf.mxu0 }
 0x52a   : > { %2906 = vpow2.f32 %v1853_v16 }
 0x52b   : > { %v1819_v4 = vpop.xlane.xlu2 %1818  ;;  %2908 = vpow2.f32 %v1581_v2 }
 0x52c   : > { %v1829_v54 = vmax.f32 %v4003_v6, %v1819_v4 }
 0x52e   : > { %v1833_v9 = vsub.f32 %v4003_v6, %v1829_v54  ;;  %v1845_v10 = vsub.f32 %v1745_v52, %v1829_v54 }
 0x530   : > { %v1837_v13 = vmul.f32 1.442695, %v1833_v9  ;;  %v1849_v14 = vmul.f32 1.442695, %v1845_v10  ;;  %v2907_v17 = vpop.eup %2906 }
 0x531   : > { %v2909_v26 = vpop.eup %2908  ;;  %2662 = vmatmul.msk.f32.vlgmr.msrb.gmra.mxu3 %vm1560_vm4, %v2907_v17  ;;  %v1867_v8 = vsel %vm1560_vm4, %v2907_v17, 0.0 }
 0x532   : > { %2910 = vpow2.f32 %v1837_v13  ;;  %1868 = vadd.xlane.f32.xlu1 %v1867_v8  ;;  %v1601_v21 = vmul.f32 0.0, %v2909_v26 }
 0x533   : > { %2912 = vpow2.f32 %v1849_v14  ;;  %v1828_v19 = vpop.xlane.xlu2 %1827 }
 0x534   : > { %2914 = vpow2.f32 %v1587_v57  ;;  %v1832_v20 = vmax.f32 %v4010_v28, %v1828_v19  ;;  %v1713_v12 = vadd.f32 %v1641_v41, %v1601_v21  ;;  %v1607_v41 = vpop.xlane.xlu1 %1606 }
 0x536   : > { %v1836_v6 = vsub.f32 %v4010_v28, %v1832_v20  ;;  %v1848_v22 = vsub.f32 %v1814_v55, %v1832_v20  ;;  %v1617_v55 = vadd.f32 %v1607_v41, %v1601_v21 }
 0x538   : > { %v2911_v23 = vpop.eup %2910  ;;  %v1843_v46 = vmul.f32 1.442695, %v1836_v6  ;;  %v1855_v24 = vmul.f32 1.442695, %v1848_v22  ;;  %v1924_v6 = vpop.f32.mrf.mxu2 }
 0x539   : > { %v2913_v27 = vpop.eup %2912  ;;  %v4047_v15 = vmul.f32 %v2911_v23, %v1713_v12  ;;  %v1857_v56 = vmul.f32 %v2911_v23, %v1617_v55 }
 0x53a   : > { %v2915_v29 = vpop.eup %2914  ;;  %2916 = vpow2.f32 %v1843_v46  ;;  %2660 = vmatmul.msk.f32.vlgmr.msrb.gmra.mxu1 %vm1560_vm4, %v2913_v27  ;;  %v1861_v44 = vsel %vm1560_vm4, %v2913_v27, 0.0  ;;  %1865 = vadd.xlane.f32.xlu1 %v1864_v30 }
 0x53b   : > { %2918 = vpow2.f32 %v1855_v24  ;;  %1862 = vadd.xlane.f32.xlu2 %v1861_v44  ;;  %v1604_v28 = vmul.f32 0.0, %v2915_v29  ;;  %v1613_v37 = vpop.xlane.xlu2 %1612 }
 0x53c   : > { %2920 = vpow2.f32 %v1585_v7 }
 0x53d   : > { %v1716_v11 = vadd.f32 %v4031_v47, %v1604_v28  ;;  %2922 = vpow2.f32 %v1841_v38 }
 0x540   : > { %v2917_v33 = vpop.eup %2916 }
 0x541   : > { %v2919_v34 = vpop.eup %2918  ;;  %v4054_v25 = vmul.f32 %v2917_v33, %v1716_v11 }
 0x542   : > { %2663 = vmatmul.msk.f32.vlgmr.msra.gmra.mxu0 %vm1560_vm4, %v2919_v34  ;;  %v1870_v35 = vsel %vm1560_vm4, %v2919_v34, 0.0  ;;  %v2921_v39 = vpop.eup %2920 }
 0x543   : > { %1871 = vadd.xlane.f32.xlu0 %v1870_v35  ;;  %v1603_v42 = vmul.f32 0.0, %v2921_v39  ;;  %v2923_v47 = vpop.eup %2922  ;;  %v1616_v49 = vpop.xlane.xlu2 %1615 }
 0x544   : > { %v1620_v62 = vadd.f32 %v1616_v49, %v1604_v28  ;;  %v1974_v28 = vadd.f32 %v1924_v6, %v4029_v18 }
 0x545   : > { %v1619_v43 = vadd.f32 %v1613_v37, %v1603_v42 }
 0x546   : > { %v1860_v2 = vmul.f32 %v2917_v33, %v1620_v62 }
 0x547   : > { %v1859_v48 = vmul.f32 %v2923_v47, %v1619_v43 }
 0x5a5   : > { %v1869_v52 = vpop.xlane.xlu1 %1868 }
 0x5a6   : > { %v1875_v53 = vadd.f32 %v1869_v52, %v1859_v48 }
 0x5a8   : > { %2924 = vrcp.f32 %v1875_v53  ;;  %v2018_v4 = vand.u32 2147483648, %v1875_v53  ;;  %vm2012_vm6 = vweird.f32 %v1875_v53  ;;  %v2016_v9 = vand.u32 2147483647, %v1875_v53 }
 0x5aa   : > { %v2019_v21 = vor.u32 1.1754944e-38, %v2018_v4  ;;  %vm2017_vm8 = vcmp.eq.f32.partialorder %v2016_v9, 8.507059e+37 }
 0x5ad   : > { %v1866_v51 = vpop.xlane.xlu1 %1865 }
 0x5ae   : > { %v1863_v59 = vpop.xlane.xlu2 %1862  ;;  %v2925_v60 = vpop.eup %2924  ;;  %v1874_v3 = vadd.f32 %v1866_v51, %v4027_v40  ;;  %v1715_v40 = vadd.f32 %v1687_v1, %v1603_v42  ;;  %v2178_v51 = vld [vmem:[#allocation13 + $0x70] sm:$0xff]  ;;  %v2176_v1 = vld [vmem:[#allocation13 + $0x60] sm:$0xff] }
 0x5af   : > { %v1873_v61 = vadd.f32 %v1863_v59, %v1857_v56  ;;  %v2008_v50 = vmul.f32 %v2925_v60, %v1875_v53  ;;  %vm2013_vm5 = vweird.f32 %v2925_v60  ;;  %v2179_v56 = vld [vmem:[#allocation13 + $0x78] sm:$0xff] }
 0x5b0   : > { %2926 = vrcp.f32 %v1874_v3  ;;  %vm4063_vm7 = vmor %vm2012_vm6, %vm2013_vm5  ;;  %v1879_v19 = vmul.f32 %v2923_v47, %v1715_v40  ;;  %v2001_v22 = vand.u32 2147483647, %v1874_v3  ;;  %v2003_v12 = vand.u32 2147483648, %v1874_v3  ;;  %2184 = vmatpush.msra.mxu1 %v2179_v56 }
 0x5b1   : > { %v2009_v63 = vsub.f32 1.0, %v2008_v50  ;;  %2928 = vrcp.f32 %v1873_v61  ;;  %v1988_v27 = vand.u32 2147483648, %v1873_v61  ;;  %v1986_v44 = vand.u32 2147483647, %v1873_v61 }
 0x5b2   : > { %vm1997_vm11 = vweird.f32 %v1874_v3  ;;  %v2004_v35 = vor.u32 1.1754944e-38, %v2003_v12  ;;  %vm1982_vm13 = vweird.f32 %v1873_v61  ;;  %vm2002_vm14 = vcmp.eq.f32.partialorder %v2001_v22, 8.507059e+37  ;;  %2185 = vmatpush.msra.mxu1 %v2178_v51 }
 0x5b3   : > { %v2010_v0 = vmul.f32 %v2925_v60, %v2009_v63  ;;  %v1989_v39 = vor.u32 1.1754944e-38, %v1988_v27  ;;  %vm1987_vm0 = vcmp.eq.f32.partialorder %v1986_v44, 8.507059e+37 }
 0x5b4   : > { %v1947_v20 = vpop.f32.mrf.mxu3 }
 0x5b5   : > { %v2011_v16 = vadd.f32 %v2925_v60, %v2010_v0  ;;  %v1975_v29 = vadd.f32 %v1947_v20, %v1879_v19 }
 0x5b6   : > { %v1872_v5 = vpop.xlane.xlu0 %1871  ;;  %v2927_v54 = vpop.eup %2926 }
 0x5b7   : > { %v4061_v10 = vadd.f32 %v1872_v5, %v1860_v2  ;;  %v2929_v57 = vpop.eup %2928  ;;  %v1993_v13 = vmul.f32 %v2927_v54, %v1874_v3  ;;  %v2015_v26 = vsel %vm4063_vm7, %v2925_v60, %v2011_v16  ;;  %vm1998_vm9 = vweird.f32 %v2927_v54  ;;  %v1901_v33 = vpop.f32.mrf.mxu1 }
 0x5b8   : > { %v1978_v17 = vmul.f32 %v2929_v57, %v1873_v61  ;;  %v2020_v24 = vsel %vm2017_vm8, %v2019_v21, %v2015_v26  ;;  %vm1983_vm10 = vweird.f32 %v2929_v57  ;;  %vm1999_vm12 = vmor %vm1997_vm11, %vm1998_vm9  ;;  %v1973_v37 = vadd.f32 %v1901_v33, %v4047_v15  ;;  %v2177_v61 = vld [vmem:[#allocation13 + $0x68] sm:$0xff] }
 0x5b9   : > { %2930 = vrcp.f32 %v4061_v10  ;;  %v1994_v8 = vsub.f32 1.0, %v1993_v13  ;;  %v2021_v32 = vmul.f32 %v2020_v24, %v1975_v29  ;;  %vm1984_vm15 = vmor %vm1982_vm13, %vm1983_vm10  ;;  %v2033_v52 = vand.u32 2147483648, %v4061_v10  ;;  %2186 = vmatpush.msra.mxu1 %v2177_v61 }
 0x5ba   : > { %v1979_v23 = vsub.f32 1.0, %v1978_v17  ;;  %v2031_v55 = vand.u32 2147483647, %v4061_v10  ;;  %vm2027_vm4 = vweird.f32 %v4061_v10  ;;  %vm2162_vm7 = vcmask 785408  }
 0x5bb   : > { %v1995_v46 = vmul.f32 %v2927_v54, %v1994_v8  ;;  %v2037_v48 = vrot.slane %v2021_v32, 4  ;;  %v2034_v62 = vor.u32 1.1754944e-38, %v2033_v52  ;;  %2187 = vmatpush.msra.mxu1 %v2176_v1  ;;  %v2174_v1 = vld [vmem:[#allocation13 + $0x50] sm:$0xff] }
 0x5bc   : > { %v1980_v30 = vmul.f32 %v2929_v57, %v1979_v23  ;;  %vm2032_vm6 = vcmp.eq.f32.partialorder %v2031_v55, 8.507059e+37 }
 0x5bd   : > { %v1996_v11 = vadd.f32 %v2927_v54, %v1995_v46 }
 0x5be   : > { %v1981_v7 = vadd.f32 %v2929_v57, %v1980_v30 }
 0x5bf   : > { %v2931_v34 = vpop.eup %2930  ;;  %v2000_v36 = vsel %vm1999_vm12, %v2927_v54, %v1996_v11  ;;  %v1970_v15 = vpop.f32.mrf.mxu0 }
 0x5c0   : > { %v2023_v38 = vmul.f32 %v2931_v34, %v4061_v10  ;;  %v1985_v41 = vsel %vm1984_vm15, %v2929_v57, %v1981_v7  ;;  %v2005_v18 = vsel %vm2002_vm14, %v2004_v35, %v2000_v36  ;;  %vm2028_vm1 = vweird.f32 %v2931_v34 }
 0x5c1   : > { %v1990_v43 = vsel %vm1987_vm0, %v1989_v39, %v1985_v41  ;;  %v2006_v47 = vmul.f32 %v2005_v18, %v1974_v28  ;;  %vm2029_vm5 = vmor %vm2027_vm4, %vm2028_vm1  ;;  %v1976_v63 = vadd.f32 %v1970_v15, %v4054_v25 }
 0x5c2   : > { %v2024_v42 = vsub.f32 1.0, %v2023_v38  ;;  %v1991_v49 = vmul.f32 %v1990_v43, %v1973_v37 }
 0x5c3   : > { %v2051_v5 = vrot.slane %v2006_v47, 4 }
 0x5c4   : > { %v2025_v53 = vmul.f32 %v2931_v34, %v2024_v42  ;;  %v2038_v59 = vsel %vm1337_vm3, %v2037_v48, %v1991_v49  ;;  %v2039_v60 = vrot.slane %v1991_v49, 4 }
 0x5c5   : > { %v2044_v54 = vperm.slane %v2038_v59, %v3934_v45 }
 0x5c6   : > { %v2026_v3 = vadd.f32 %v2931_v34, %v2025_v53  ;;  %v2040_v50 = vsel %vm1337_vm3, %v2021_v32, %v2039_v60 }
 0x5c7   : > { %v2048_v2 = vperm.slane %v2040_v50, %v3934_v45  ;;  %v2063_v13 = vrot.slane %v2044_v54, 4 }
 0x5c8   : > { %v2030_v0 = vsel %vm2029_vm5, %v2931_v34, %v2026_v3 }
 0x5c9   : > { %v2035_v16 = vsel %vm2032_vm6, %v2034_v62, %v2030_v0  ;;  %v2075_v57 = vrot.slane %v2048_v2, 4  ;;  %v2175_v0 = vld [vmem:[#allocation13 + $0x58] sm:$0xff] }
 0x5ca   : > { %v2036_v4 = vmul.f32 %v2035_v16, %v1976_v63  ;;  %2188 = vmatpush.msra.mxu1 %v2175_v0  ;;  %v2171_v16 = vld [vmem:[#allocation13 + $0x38] sm:$0xff]  ;;  %v2243_v0 = vld [vmem:[#allocation15 + $0x8] sm:$0xff] }
 0x5cc   : > { %v2049_v9 = vrot.slane %v2036_v4, 4  ;;  %v2052_v10 = vsel %vm1337_vm3, %v2036_v4, %v2051_v5  ;;  %2189 = vmatpush.msra.mxu1 %v2174_v1  ;;  %v2170_v4 = vld [vmem:[#allocation13 + $0x30] sm:$0xff]  ;;  %v2169_v5 = vld [vmem:[#allocation13 + $0x28] sm:$0xff]  ;;  %v2337_v1 = vld [vmem:[#allocation16 + $0x78] sm:$0xff] }
 0x5cd   : > { %v2060_v40 = vperm.slane %v2052_v10, %v3934_v45  ;;  %v2166_v10 = vld [vmem:[#allocation13 + $0x10] sm:$0xff]  ;;  %2358 = vmatpush.msrb.mxu0 %v2337_v1 }
 0x5ce   : > { %v2050_v25 = vsel %vm1337_vm3, %v2049_v9, %v2006_v47  ;;  %v2167_v9 = vld [vmem:[#allocation13 + $0x18] sm:$0xff] }
 0x5cf   : > { %v2056_v14 = vperm.slane %v2050_v25, %v3934_v45  ;;  %v2073_v17 = vrot.slane %v2060_v40, 4  ;;  %v2076_v26 = vsel %vm1337_vm3, %v2060_v40, %v2075_v57  ;;  %v2165_v57 = vld [vmem:[#allocation13 + $0x8] sm:$0xff]  ;;  %v2164_v40 = vld [vmem:[#allocation13] sm:$0xff] }
 0x5d0   : > { %v2084_v8 = vperm.slane %v2076_v26, %v3942_v58 }
 0x5d1   : > { %v2061_v19 = vrot.slane %v2056_v14, 4  ;;  %v2064_v20 = vsel %vm1337_vm3, %v2056_v14, %v2063_v13  ;;  %v2074_v21 = vsel %vm1337_vm3, %v2073_v17, %v2048_v2  ;;  %v2172_v2 = vld [vmem:[#allocation13 + $0x40] sm:$0xff] }
 0x5d2   : > { %v2072_v6 = vperm.slane %v2064_v20, %v3942_v58  ;;  %v2080_v22 = vperm.slane %v2074_v21, %v3942_v58  ;;  %v2091_v12 = vrot.slane %v2084_v8, 4 }
 0x5d3   : > { %v2062_v23 = vsel %vm1337_vm3, %v2061_v19, %v2044_v54  ;;  %v2168_v54 = vld [vmem:[#allocation13 + $0x20] sm:$0xff]  ;;  %v2886_v19 = vld [vmem:[%s4286_s18] ss:$0 sm:$0xff] }
 0x5d4   : > { %v2068_v46 = vperm.slane %v2062_v23, %v3942_v58  ;;  %v2087_v24 = vrot.slane %v2072_v6, 4  ;;  %v2089_v27 = vrot.slane %v2080_v22, 4  ;;  %v2092_v29 = vsel %vm1337_vm3, 0.0, %v2091_v12  ;;  %v2273_v23 = vld [vmem:[#allocation15 + $0xf8] sm:$0xff] }
 0x5d5   : > { %v2109_v30 = vrot.slane %v2092_v29, 4  ;;  %v2104_v44 = vsel %vm1337_vm3, %v2091_v12, %v2080_v22  ;;  %v3342_v22 = vmov 128.0   ;;  %v2272_v12 = vld [vmem:[#allocation15 + $0xf0] sm:$0xff]  ;;  %2300 = vmatpush.msra.mxu3 %v2273_v23 }
 0x5d6   : > { %v2085_v28 = vrot.slane %v2068_v46, 4  ;;  %v2088_v11 = vsel %vm1337_vm3, 0.0, %v2087_v24  ;;  %v2090_v33 = vsel %vm1337_vm3, 0.0, %v2089_v27  ;;  %v2093_v34 = vsel %vm1337_vm3, %v2087_v24, %v2068_v46  ;;  %v2270_v46 = vld [vmem:[#allocation15 + $0xe0] sm:$0xff]  ;;  %2280 = vmatpush.msra.mxu2 %v2272_v12  ;;  %v2271_v24 = vld [vmem:[#allocation15 + $0xe8] sm:$0xff]  ;;  %v2345_v12 = vld [vmem:[#allocation16 + $0xb8] sm:$0xff] }
 0x5d7   : > { %v2097_v35 = vperm.slane %v2093_v34, %v3934_v45  ;;  %v2098_v32 = vrot.slane %v2088_v11, 4  ;;  %v2108_v7 = vperm.slane %v2104_v44, %v3934_v45  ;;  %v2110_v36 = vsel %vm1337_vm3, %v2109_v30, %v2090_v33  ;;  %2301 = vmatpush.msra.mxu3 %v2271_v24  ;;  %v2344_v24 = vld [vmem:[#allocation16 + $0xb0] sm:$0xff] }
 0x5d8   : > { %v2086_v38 = vsel %vm1337_vm3, 0.0, %v2085_v28  ;;  %v2114_v39 = vperm.slane %v2110_v36, %v3934_v45  ;;  %2932 = vrcp.f32 %v3342_v22  ;;  %2281 = vmatpush.msra.mxu2 %v2270_v46  ;;  %v2266_v36 = vld [vmem:[#allocation15 + $0xc0] sm:$0xff]  ;;  %v2329_v22 = vld [vmem:[#allocation16 + $0x38] sm:$0xff]  ;;  %v2328_v46 = vld [vmem:[#allocation16 + $0x30] sm:$0xff] }
 0x5d9   : > { %v2099_v37 = vsel %vm1337_vm3, %v2098_v32, %v2086_v38  ;;  %v2117_v41 = vrot.slane %v2097_v35, 4  ;;  %v2129_v18 = vrot.slane %v2108_v7, 4  ;;  %v2268_v32 = vld [vmem:[#allocation15 + $0xd0] sm:$0xff]  ;;  %v2267_v38 = vld [vmem:[#allocation15 + $0xc8] sm:$0xff] }
 0x5da   : > { %v2103_v42 = vperm.slane %v2099_v37, %v3934_v45  ;;  %v2127_v43 = vrot.slane %v2114_v39, 4  ;;  %2282 = vmatpush.msra.mxu2 %v2268_v32  ;;  %v2265_v37 = vld [vmem:[#allocation15 + $0xb8] sm:$0xff] }
 0x5db   : > { %v2130_v47 = vsel %vm1337_vm3, %v2114_v39, %v2129_v18  ;;  %v2264_v39 = vld [vmem:[#allocation15 + $0xb0] sm:$0xff]  ;;  %v2263_v18 = vld [vmem:[#allocation15 + $0xa8] sm:$0xff]  ;;  %v2341_v32 = vld [vmem:[#allocation16 + $0x98] sm:$0xff] }
 0x5dc   : > { %v2118_v48 = vsel %vm1337_vm3, %v2103_v42, %v2117_v41  ;;  %v2138_v49 = vperm.slane %v2130_v47, %v3942_v58  ;;  %v2115_v52 = vrot.slane %v2103_v42, 4  ;;  %v2128_v53 = vsel %vm1337_vm3, %v2127_v43, %v2108_v7  ;;  %v2269_v7 = vld [vmem:[#allocation15 + $0xd8] sm:$0xff]  ;;  %2283 = vmatpush.msra.mxu2 %v2266_v36  ;;  %v2262_v41 = vld [vmem:[#allocation15 + $0xa0] sm:$0xff]  ;;  %v2260_v42 = vld [vmem:[#allocation15 + $0x90] sm:$0xff] }
 0x5dd   : > { %v2126_v55 = vperm.slane %v2118_v48, %v3942_v58  ;;  %v2134_v56 = vperm.slane %v2128_v53, %v3942_v58  ;;  %2302 = vmatpush.msra.mxu3 %v2269_v7  ;;  %v2261_v43 = vld [vmem:[#allocation15 + $0x98] sm:$0xff]  ;;  %v2258_v47 = vld [vmem:[#allocation15 + $0x80] sm:$0xff]  ;;  %v2259_v48 = vld [vmem:[#allocation15 + $0x88] sm:$0xff] }
 0x5de   : > { %v2143_v51 = vrot.slane %v2138_v49, 4  ;;  %v2116_v59 = vsel %vm1337_vm3, %v2115_v52, %v2097_v35  ;;  %v2933_v27 = vpop.eup %2932  ;;  %2284 = vmatpush.msra.mxu2 %v2264_v39  ;;  %v2257_v52 = vld [vmem:[#allocation15 + $0x78] sm:$0xff]  ;;  %v2254_v53 = vld [vmem:[#allocation15 + $0x60] sm:$0xff]  ;;  %v2887_v7 = vld [vmem:[%s4287_s29] ss:$0 sm:$0xff] }
 0x5df   : > { %v2145_v60 = vrot.slane %v2126_v55, 4  ;;  %v2122_v45 = vperm.slane %v2116_v59, %v3942_v58  ;;  %v2139_v15 = vrot.slane %v2134_v56, 4  ;;  %v2173_v58 = vld [vmem:[#allocation13 + $0x48] sm:$0xff]  ;;  %v2210_v29 = vmul.f32 128.0, %v2933_v27  ;;  %2303 = vmatpush.msra.mxu3 %v2267_v38  ;;  %v2250_v59 = vld [vmem:[#allocation15 + $0x40] sm:$0xff] }
 0x5e0   : > { %v2144_v3 = vsel %vm1337_vm3, %v2143_v51, %v2126_v55  ;;  %2190 = vmatpush.msra.mxu1 %v2173_v58  ;;  %2285 = vmatpush.msra.mxu2 %v2262_v41  ;;  %v2255_v55 = vld [vmem:[#allocation15 + $0x68] sm:$0xff]  ;;  %v2253_v51 = vld [vmem:[#allocation15 + $0x58] sm:$0xff] }
 0x5e1   : > { %2152 = vrot.lane.b32.xlu0 %v2144_v3, %s3339_s9  ;;  %v2146_v61 = vsel %vm1337_vm3, %v2138_v49, %v2145_v60  ;;  %v2141_v50 = vrot.slane %v2122_v45, 4  ;;  %v2140_v62 = vsel %vm1337_vm3, %v2139_v15, %v2122_v45  ;;  %v2211_v30 = vsub.f32 1.0, %v2210_v29  ;;  %2304 = vmatpush.msra.mxu3 %v2265_v37  ;;  %v2256_v49 = vld [vmem:[#allocation15 + $0x70] sm:$0xff]  ;;  %v2251_v60 = vld [vmem:[#allocation15 + $0x48] sm:$0xff]  ;;  %v2249_v15 = vld [vmem:[#allocation15 + $0x38] sm:$0xff] }
 0x5e2   : > { %2156 = vrot.lane.b32.xlu1 %v2146_v61, %s3338_s16  ;;  %2191 = vmatpush.msra.mxu1 %v2172_v2  ;;  %v2248_v45 = vld [vmem:[#allocation15 + $0x30] sm:$0xff]  ;;  %v2246_v3 = vld [vmem:[#allocation15 + $0x20] sm:$0xff]  ;;  %v2247_v61 = vld [vmem:[#allocation15 + $0x28] sm:$0xff]  ;;  %s2665_s16 = sshll.u32 %s4291_s10, 1 }
 0x5e3   : > { %v2142_v63 = vsel %vm1337_vm3, %v2134_v56, %v2141_v50  ;;  %vm2160_vm3 = vcmask 523264   ;;  %v2212_v44 = vmul.f32 %v2933_v27, %v2211_v30  ;;  %2305 = vmatpush.msra.mxu3 %v2263_v18  ;;  %2286 = vmatpush.msra.mxu2 %v2260_v42  ;;  %v2252_v56 = vld [vmem:[#allocation15 + $0x50] sm:$0xff]  ;;  %v2353_v58 = vld [vmem:[#allocation16 + $0xf8] sm:$0xff]  ;;  %v2327_v29 = vld [vmem:[#allocation16 + $0x28] sm:$0xff] }
 0x5e4   : > { %2148 = vrot.lane.b32.xlu2 %v2142_v63, %s3337_s27  ;;  %2192 = vmatpush.msra.mxu1 %v2171_v16  ;;  %v2244_v50 = vld [vmem:[#allocation15 + $0x10] sm:$0xff]  ;;  %v2242_v63 = vld [vmem:[#allocation15] sm:$0xff]  ;;  %v2343_v30 = vld [vmem:[#allocation16 + $0xa8] sm:$0xff]  ;;  %s4292_s27 = sld [smem:[#allocation27_spill]] }
 0x5e5   : > { %v2213_v28 = vadd.f32 %v2933_v27, %v2212_v44  ;;  %2306 = vmatpush.msra.mxu3 %v2261_v43  ;;  %2287 = vmatpush.msra.mxu2 %v2258_v47  ;;  %v2336_v2 = vld [vmem:[#allocation16 + $0x70] sm:$0xff]  ;;  %v2888_v39 = vld [vmem:[%s4288_s15] ss:$0 sm:$0xff] }
 0x5e6   : > { %2193 = vmatpush.msra.mxu1 %v2170_v4  ;;  %v2352_v16 = vld [vmem:[#allocation16 + $0xf0] sm:$0xff]  ;;  %2359 = vmatpush.msrb.mxu0 %v2336_v2  ;;  %v2323_v43 = vld [vmem:[#allocation16 + $0x8] sm:$0xff] }
 0x5e7   : > { %2307 = vmatpush.msra.mxu3 %v2259_v48  ;;  %2288 = vmatpush.msra.mxu2 %v2256_v49  ;;  %v2324_v18 = vld [vmem:[#allocation16 + $0x10] sm:$0xff]  ;;  %v2339_v47 = vld [vmem:[#allocation16 + $0x88] sm:$0xff]  ;;  %v2322_v48 = vld [vmem:[#allocation16] sm:$0xff] }
 0x5e8   : > { %2194 = vmatpush.msra.mxu1 %v2169_v5  ;;  %v2335_v5 = vld [vmem:[#allocation16 + $0x68] sm:$0xff]  ;;  %v2340_v42 = vld [vmem:[#allocation16 + $0x90] sm:$0xff] }
 0x5e9   : > { %2308 = vmatpush.msra.mxu3 %v2257_v52  ;;  %2289 = vmatpush.msra.mxu2 %v2254_v53  ;;  %v2274_v49 = vld [vmem:[%s4289_s12] sm:$0x3]  ;;  %s2445_s12 = sshll.u32 %s3682_s5, 4  ;;  %s2446_s12 = int_to_ptr.vmem [resolvable:$true] %s2445_s12 }
 0x5ea   : > { %2195 = vmatpush.msra.mxu1 %v2168_v54  ;;  %v2351_v54 = vld [vmem:[#allocation16 + $0xe8] sm:$0xff]  ;;  %2360 = vmatpush.msrb.mxu0 %v2335_v5  ;;  %v2276_v52 = vperm.slane %v2274_v49, 0  ;;  %v2277_v53 = vperm.slane %v2274_v49, 1  ;;  %s2441_s9 = sadd.s32 %s4292_s27, %s2665_s16 }
 0x5eb   : > { %2309 = vmatpush.msra.mxu3 %v2255_v55  ;;  %2290 = vmatpush.msra.mxu2 %v2252_v56  ;;  %s2666_s20 = sshll.u32 %s2441_s9, 3  ;;  %s3198_s9 = scalar_lea.hbm %s4294_s13, 32 }
 0x5ec   : > { %2196 = vmatpush.msra.mxu1 %v2167_v9  ;;  %s2443_s3 = scalar_lea.hbm %s4294_s13, %s2666_s20 }
 0x5ed   : > { %2310 = vmatpush.msra.mxu3 %v2253_v51  ;;  %2291 = vmatpush.msra.mxu2 %v2250_v59  ;;  %s2447_s4 = sshll.u32 %s2443_s3, 4  ;;  %s2448_s4 = int_to_ptr.hbm [resolvable:$true] %s2447_s4 }
 0x5ee   : > { %2197 = vmatpush.msra.mxu1 %v2166_v10  ;;  %v2334_v10 = vld [vmem:[#allocation16 + $0x60] sm:$0xff] }
 0x5ef   : > { %2311 = vmatpush.msra.mxu3 %v2251_v60  ;;  %2292 = vmatpush.msra.mxu2 %v2248_v45 }
 0x5f0   : > { %2198 = vmatpush.msra.mxu1 %v2165_v57  ;;  %v2350_v57 = vld [vmem:[#allocation16 + $0xe0] sm:$0xff]  ;;  %2361 = vmatpush.msrb.mxu0 %v2334_v10 }
 0x5f1   : > { %2312 = vmatpush.msra.mxu3 %v2249_v15  ;;  %2293 = vmatpush.msra.mxu2 %v2246_v3  ;;  %v2889_v15 = vld [vmem:[%s4290_s8] ss:$0 sm:$0xff]  ;;  %s3192_s8 = sshra.s32 %s2448_s4, 4  ;;  %s3193_s8 = int_to_ptr.hbm [resolvable:$true] %s3192_s8 }
 0x5f2   : > { %2199 = vmatpush.msra.mxu1 %v2164_v40  ;;  %s3194_s10 = scalar_lea.hbm %s3193_s8, 8  ;;  %p3199_p12 = scmp.lt.s32.totalorder %s3193_s8, %s4294_s13 }
 0x5f3   : > { %2313 = vmatpush.msra.mxu3 %v2247_v61  ;;  %2294 = vmatpush.msra.mxu2 %v2244_v50  ;;  %p3195_p1 = scmp.ne.s32.totalorder %s3193_s8, %s3194_s10  ;;  %p3200_p5 = scmp.lt.s32.totalorder %s3198_s9, %s3194_s10 }
 0x5f4   : > { %2378 = vmatpush.msrb.mxu1 %v2353_v58 }
 0x5f5   : > { %2295 = vmatpush.msra.mxu2 %v2242_v63  ;;  %p3196_p7 = pnand %p3195_p1, %p3604_p13  ;;  %p3201_p6 = por %p3200_p5, %p3199_p12 }
 0x5f6   : > { %2379 = vmatpush.msrb.mxu1 %v2352_v16 }
 0x5f7   : > { %p3197_p11 = pneg %p3196_p7 }
 0x5f8   : > { %2380 = vmatpush.msrb.mxu1 %v2351_v54 }
 0x5f9   : > { %p3202_p9 = pnand %p3201_p6, %p3197_p11 }
 0x5fa   : > { %2381 = vmatpush.msrb.mxu1 %v2350_v57 }
 0x63e   : > { %v2149_v25 = vpop.permute.xlu2 %2148 }
 0x63f   : > { %v2159_v13 = vsel %vm1455_vm2, %v2140_v62, %v2149_v25  ;;  %vm2214_vm2 = vweird.f32 %v2933_v27  ;;  %v2245_v62 = vld [vmem:[#allocation15 + $0x18] sm:$0xff] }
 0x640   : > { %v4126_v11 = vsel %vm2214_vm2, %v2933_v27, %v2213_v28  ;;  %2314 = vmatpush.msra.mxu3 %v2245_v62  ;;  %v2333_v25 = vld [vmem:[#allocation16 + $0x58] sm:$0xff]  ;;  %v2326_v28 = vld [vmem:[#allocation16 + $0x20] sm:$0xff] }
 0x641   : > { %2362 = vmatpush.msrb.mxu0 %v2333_v25 }
 0x642   : > { %2315 = vmatpush.msra.mxu3 %v2243_v0 }
 0x653   : > { %v2153_v14 = vpop.permute.xlu0 %2152 }
 0x654   : > { %v2161_v17 = vsel %vm2160_vm3, %v2159_v13, %v2153_v14  ;;  %v2157_v26 = vpop.permute.xlu1 %2156  ;;  %v2349_v13 = vld [vmem:[#allocation16 + $0xd8] sm:$0xff]  ;;  %v2332_v14 = vld [vmem:[#allocation16 + $0x50] sm:$0xff] }
 0x655   : > { %v2163_v8 = vsel %vm2162_vm7, %v2161_v17, %v2157_v26  ;;  %v2348_v17 = vld [vmem:[#allocation16 + $0xd0] sm:$0xff]  ;;  %2382 = vmatpush.msrb.mxu1 %v2349_v13  ;;  %v2331_v26 = vld [vmem:[#allocation16 + $0x48] sm:$0xff]  ;;  %2363 = vmatpush.msrb.mxu0 %v2332_v14 }
 0x656   : > { %2200 = vmatmul.f32.vlgmr.msra.gmra.mxu1 %v2163_v8  ;;  %v2347_v8 = vld [vmem:[#allocation16 + $0xc8] sm:$0xff] }
 0x657   : > { %2383 = vmatpush.msrb.mxu1 %v2348_v17  ;;  %2364 = vmatpush.msrb.mxu0 %v2331_v26  ;;  %v2891_v17 = vld [vmem:[%s4295_s17] ss:$0 sm:$0xff] }
 0x659   : > { %2384 = vmatpush.msrb.mxu1 %v2347_v8 }
 0x6d3   : > { %v2201_v20 = vpop.f32.mrf.mxu1 }
 0x6d4   : > { %v2202_v21 = vadd.f32 %v2886_v19, %v2201_v20  ;;  %v2330_v19 = vld [vmem:[#allocation16 + $0x40] sm:$0xff] }
 0x6d5   : > { %v2346_v20 = vld [vmem:[#allocation16 + $0xc0] sm:$0xff]  ;;  %2365 = vmatpush.msrb.mxu0 %v2330_v19 }
 0x6d6   : > { %v2204_v6 = vadd.f32 %v2202_v21, %v3925_v31  ;;  %2385 = vmatpush.msrb.mxu1 %v2346_v20 }
 0x6d7   : > { %2366 = vmatpush.msrb.mxu0 %v2329_v22 }
 0x6d8   : > { %2207 = vadd.xlane.f32.xlu0 %v2204_v6  ;;  %2386 = vmatpush.msrb.mxu1 %v2345_v12 }
 0x6d9   : > { %2367 = vmatpush.msrb.mxu0 %v2328_v46 }
 0x6da   : > { %2387 = vmatpush.msrb.mxu1 %v2344_v24 }
 0x6db   : > { %2368 = vmatpush.msrb.mxu0 %v2327_v29 }
 0x6dc   : > { %2388 = vmatpush.msrb.mxu1 %v2343_v30 }
 0x6dd   : > { %2369 = vmatpush.msrb.mxu0 %v2326_v28 }
 0x74b   : > { %v2208_v31 = vpop.xlane.xlu0 %2207 }
 0x74c   : > { %v2216_v33 = vmul.f32 %v4126_v11, %v2208_v31  ;;  %v2342_v31 = vld [vmem:[#allocation16 + $0xa0] sm:$0xff] }
 0x74d   : > { %2389 = vmatpush.msrb.mxu1 %v2342_v31 }
 0x74e   : > { %v4129_v34 = vsub.f32 %v2204_v6, %v2216_v33 }
 0x74f   : > { %2390 = vmatpush.msrb.mxu1 %v2341_v32 }
 0x750   : > { %v2218_v35 = vmul.f32 %v4129_v34, %v4129_v34 }
 0x751   : > { %2391 = vmatpush.msrb.mxu1 %v2340_v42 }
 0x752   : > { %2219 = vadd.xlane.f32.xlu2 %v2218_v35  ;;  %v2325_v35 = vld [vmem:[#allocation16 + $0x18] sm:$0xff] }
 0x753   : > { %2370 = vmatpush.msrb.mxu0 %v2325_v35  ;;  %2392 = vmatpush.msrb.mxu1 %v2339_v47 }
 0x755   : > { %2371 = vmatpush.msrb.mxu0 %v2324_v18 }
 0x757   : > { %2372 = vmatpush.msrb.mxu0 %v2323_v43 }
 0x759   : > { %2373 = vmatpush.msrb.mxu0 %v2322_v48 }
 0x7c5   : > { %v2220_v4 = vpop.xlane.xlu2 %2219 }
 0x7c6   : > { %v2221_v9 = vmul.f32 %v2220_v4, %v4126_v11 }
 0x7c8   : > { %v2222_v40 = vadd.f32 1e-06, %v2221_v9 }
 0x7ca   : > { %2934 = vrsqrt.f32 %v2222_v40  ;;  %vm2229_vm9 = vweird.f32 %v2222_v40 }
 0x7d0   : > { %v2935_v21 = vpop.eup %2934 }
 0x7d1   : > { %v2224_v6 = vmul.f32 %v2935_v21, %v2222_v40  ;;  %vm2230_vm8 = vweird.f32 %v2935_v21 }
 0x7d2   : > { %vm2231_vm10 = vmor %vm2229_vm9, %vm2230_vm8 }
 0x7d3   : > { %v2225_v23 = vmul.f32 %v2935_v21, %v2224_v6 }
 0x7d5   : > { %v2226_v27 = vmul.f32 0.5, %v2225_v23 }
 0x7d7   : > { %v2227_v44 = vsub.f32 1.5, %v2226_v27 }
 0x7d9   : > { %v2228_v33 = vmul.f32 %v2935_v21, %v2227_v44 }
 0x7db   : > { %v2232_v36 = vsel %vm2231_vm10, %v2935_v21, %v2228_v33 }
 0x7dc   : > { %v2233_v38 = vmul.f32 %v2232_v36, %v4129_v34  ;;  %v2338_v34 = vld [vmem:[#allocation16 + $0x80] sm:$0xff] }
 0x7dd   : > { %2393 = vmatpush.msrb.mxu1 %v2338_v34 }
 0x7de   : > { %v2237_v37 = vmul.f32 %v2887_v7, %v2233_v38 }
 0x7e0   : > { %v2241_v41 = vadd.f32 %v2888_v39, %v2237_v37 }
 0x7e2   : > { %2296 = vmatmul.f32.vlgmr.msra.gmra.mxu2 %v2241_v41  ;;  %2316 = vmatmul.f32.vlgmr.msra.gmra.mxu3 %v2241_v41 }
 0x865   : > { %v2297_v55 = vpop.f32.mrf.mxu2  ;;  %v2317_v56 = vpop.f32.mrf.mxu3 }
 0x866   : > { %v2298_v51 = vadd.f32 %v2297_v55, %v2276_v52  ;;  %v2318_v59 = vadd.f32 %v2317_v56, %v2277_v53 }
 0x868   : > { %v2320_v60 = vmax.f32 %v2298_v51, 0.0  ;;  %v2321_v45 = vmax.f32 %v2318_v59, 0.0 }
 0x86a   : > { %2374 = vmatmul.f32.vlgmr.msrb.gmra.mxu0 %v2320_v60  ;;  %2394 = vmatmul.f32.vlgmr.msrb.gmra.mxu1 %v2321_v45 }
 0x8e7   : > { %v2375_v3 = vpop.f32.mrf.mxu0  ;;  %v2395_v50 = vpop.f32.mrf.mxu1 }
 0x8e8   : > { %v2376_v61 = vadd.f32 %v2889_v15, %v2375_v3 }
 0x8ea   : > { %v2396_v62 = vadd.f32 %v2395_v50, %v2376_v61 }
 0x8ec   : > { %v2398_v63 = vadd.f32 %v2396_v62, %v2241_v41 }
 0x8ee   : > { %2401 = vadd.xlane.f32.xlu1 %v2398_v63 }
 0x961   : > { %v2402_v0 = vpop.xlane.xlu1 %2401 }
 0x962   : > { %v2403_v1 = vmul.f32 %v2402_v0, %v4126_v11 }
 0x964   : > { %v2404_v58 = vsub.f32 %v2398_v63, %v2403_v1 }
 0x966   : > { %v2405_v2 = vmul.f32 %v2404_v58, %v2404_v58 }
 0x968   : > { %2406 = vadd.xlane.f32.xlu0 %v2405_v2 }
 0x9db   : > { %v2407_v16 = vpop.xlane.xlu0 %2406 }
 0x9dc   : > { %v2408_v4 = vmul.f32 %v2407_v16, %v4126_v11  ;;  %v2890_v11 = vld [vmem:[%s4293_s19] ss:$0 sm:$0xff] }
 0x9de   : > { %v2409_v5 = vadd.f32 1e-06, %v2408_v4 }
 0x9e0   : > { %2936 = vrsqrt.f32 %v2409_v5  ;;  %vm2416_vm12 = vweird.f32 %v2409_v5 }
 0x9e6   : > { %v2937_v54 = vpop.eup %2936 }
 0x9e7   : > { %v2411_v9 = vmul.f32 %v2937_v54, %v2409_v5  ;;  %vm2417_vm11 = vweird.f32 %v2937_v54 }
 0x9e8   : > { %vm2418_vm13 = vmor %vm2416_vm12, %vm2417_vm11 }
 0x9e9   : > { %v2412_v10 = vmul.f32 %v2937_v54, %v2411_v9 }
 0x9eb   : > { %v2413_v57 = vmul.f32 0.5, %v2412_v10 }
 0x9ed   : > { %v2414_v40 = vsub.f32 1.5, %v2413_v57 }
 0x9ef   : > { %v2415_v25 = vmul.f32 %v2937_v54, %v2414_v40 }
 0x9f1   : > { %v2419_v13 = vsel %vm2418_vm13, %v2937_v54, %v2415_v25 }
 0x9f2   : > { %v2420_v14 = vmul.f32 %v2419_v13, %v2404_v58 }
 0x9f4   : > { %v2424_v26 = vmul.f32 %v2890_v11, %v2420_v14 }
 0x9f6   : > { %v2428_v8 = vadd.f32 %v2891_v17, %v2424_v26 }
 0x9f8   : > { %2429 = vst [vmem:[%s3682_s5] sm:$0xff] %v2428_v8 }
 0x9f9   : > { %3205 = shalt.err (!%p3202_p9)
}
 0x9fa   : > { %2730 = dma.vmem_to_hbm [thread:$0]  (%p3604_p13), %s2446_s12, 128, %s2448_s4, %s2431_s6  }
 0x9fb PF: > { %p2775_p8 = scmp.ge.s32.totalorder %s3320_s0, 2  ;;  %s2459_s2 = sand.u32 1, %s3292_s24  }
 0x9fc   : > { %s2460_s5 = scalar_lea.sflag [#allocation6], %s2459_s2 }
 0x9fd   : > { %p2759_p2 = pnand %p2775_p8, %p3612_p4 }
 0x9ff   : > { %p2760_p10 = pneg %p2759_p2 }
 0xa01   : > { %3275 = dma.done.wait (%p2760_p10), %s2460_s5, 128  }
 0xa02   : > { %3277 = vsyncadd (%p2760_p10), %s2460_s5, 4294967168  ;;  %s38_s0 = sadd.s32 1, %s3320_s0   ;;  %s4296_s18 = sld [smem:[#allocation26_spill]] }
 0xa03   : > { %p35_p0 = scmp.ge.s32.totalorder %s38_s0, 6   ;;  %s4297_s26 = sld [smem:[#allocation33_spill]] }
 0xa04   : > { %s4298_s27 = sld [smem:[#allocation29_spill]]  ;;  %s4301_s21 = smov %s3284_s22 }
 0xa05   : > { %s4299_s29 = sld [smem:[#allocation31_spill]]  ;;  %s4302_s22 = smov %s3288_s23 }
 0xa06   : > { %s4300_s19 = sld [smem:[#allocation32_spill]]  ;;  %s4303_s23 = smov %s3588_s11 }
 0xa07   : > { %s4304_s24 = smov %s3296_s25  ;;  %s4306_s28 = smov %s3316_s30 }
 0xa08   : > { %s4305_s25 = smov %s4296_s18  ;;  %37 = sbr.rel (!%p35_p0) target bundleno = 31 (0x1f), region = 170 }
 0xa0c   : > { %s4307_s30 = smov %s4300_s19 }
 0xa0d   :  { %2466 = vsyncpa [#allocation5], 1 }
 0xa0e   :  { %2468 = vsyncpa [#allocation5 + $0x1], 1 }
 0xa0f   :  { %2469 = vsyncpa [#allocation8], 1 }
 0xa10   :  { %2471 = vsyncpa [#allocation8 + $0x1], 1 }
 0xa11   :  { %2472 = vsyncpa [#allocation11], 1 }
 0xa12   :  { %2473 = vsyncpa [#allocation14], 1 }
 0xa13   :  { %2474 = vsyncpa [#allocation17], 1 }
 0xa14   :  { %2475 = vsyncpa [#allocation6], 1 }
 0xa15   :  { %2477 = vsyncpa [#allocation6 + $0x1], 1 }

// kernel: tpu_custom_call.1
= control target key start
LH: loop header
LB: loop body
LE: loop exit
PB: predicated region body
PF: predicated region fallthrough
CT: control target
= control target key end

     0   :  { %s4210_s0 = inlined_call_operand.hbm [shape: f32[2,16,128], index: 0, kind: input, shape index: {}]   ;;  %s4211_s1 = inlined_call_operand.hbm [shape: f32[2,16,128], index: 1, kind: input, shape index: {}]   ;;  %s4212_s2 = inlined_call_operand.hbm [shape: f32[128,128], index: 2, kind: input, shape index: {}]   ;;  %s4213_s3 = inlined_call_operand.hbm [shape: f32[1,128], index: 3, kind: input, shape index: {}]   ;;  %s4214_s4 = inlined_call_operand.hbm [shape: f32[128,256], index: 4, kind: input, shape index: {}]   ;;  %s4215_s5 = inlined_call_operand.vmem [shape: f32[1,256], index: 5, kind: input, shape index: {}]   ;;  %s4216_s6 = inlined_call_operand.hbm [shape: f32[128,128], index: 6, kind: input, shape index: {}]   ;;  %s4217_s7 = inlined_call_operand.vmem [shape: f32[1,128], index: 7, kind: input, shape index: {}]   ;;  %s4218_s8 = inlined_call_operand.hbm [shape: f32[128,256], index: 8, kind: input, shape index: {}]   ;;  %s4219_s9 = inlined_call_operand.vmem [shape: f32[1,256], index: 9, kind: input, shape index: {}]   ;;  %s4220_s10 = inlined_call_operand.hbm [shape: f32[256,128], index: 10, kind: input, shape index: {}]   ;;  %s4221_s11 = inlined_call_operand.vmem [shape: f32[1,128], index: 11, kind: input, shape index: {}]   ;;  %s4222_s12 = inlined_call_operand.vmem [shape: f32[1,128], index: 12, kind: input, shape index: {}]   ;;  %s4223_s13 = inlined_call_operand.vmem [shape: f32[1,128], index: 13, kind: input, shape index: {}]   ;;  %s4224_s14 = inlined_call_operand.vmem [shape: f32[1,128], index: 14, kind: input, shape index: {}]   ;;  %s4225_s15 = inlined_call_operand.vmem [shape: f32[1,128], index: 15, kind: input, shape index: {}]   ;;  %s4226_s16 = inlined_call_operand.hbm [shape: f32[2,16,128], index: 16, kind: output, shape index: {}]  }
   0x1   :  { %4237 = sst [smem:[#allocation34_spill]] %s4210_s0 }
   0x2   :  { %4238 = sst [smem:[#allocation35_spill]] %s4212_s2 }
   0x3   :  { %4239 = sst [smem:[#allocation36_spill]] %s4213_s3 }
   0x4   :  { %4240 = sst [smem:[#allocation37_spill]] %s4214_s4 }
   0x5   :  { %4241 = sst [smem:[#allocation38_spill]] %s4215_s5 }
   0x6   :  { %4242 = sst [smem:[#allocation39_spill]] %s4216_s6 }
   0x7   :  { %4243 = sst [smem:[#allocation40_spill]] %s4217_s7 }
   0x8   :  { %4244 = sst [smem:[#allocation41_spill]] %s4218_s8 }
   0x9   :  { %4245 = sst [smem:[#allocation42_spill]] %s4219_s9 }
   0xa   :  { %4246 = sst [smem:[#allocation43_spill]] %s4220_s10 }
   0xb   :  { %4247 = sst [smem:[#allocation44_spill]] %s4221_s11 }
   0xc   :  { %4248 = sst [smem:[#allocation45_spill]] %s4222_s12 }
   0xd   :  { %4249 = sst [smem:[#allocation46_spill]] %s4223_s13 }
   0xe   :  { %4250 = sst [smem:[#allocation47_spill]] %s4224_s14 }
   0xf   :  { %4251 = sst [smem:[#allocation48_spill]] %s4225_s15 }
  0x10   :  { %4252 = sst [smem:[#allocation49_spill]] %s4226_s16 }
  0x11   :  { %21 = vsyncpa [#allocation5], 0 }
  0x12   :  { %23 = vsyncpa [#allocation5 + $0x1], 0 }
  0x13   :  { %24 = vsyncpa [#allocation8], 0 }
  0x14   :  { %26 = vsyncpa [#allocation8 + $0x1], 0 }
  0x15   :  { %27 = vsyncpa [#allocation11], 0 }
  0x16   :  { %28 = vsyncpa [#allocation14], 0 }
  0x17   :  { %29 = vsyncpa [#allocation17], 0 }
  0x18   :  { %30 = vsyncpa [#allocation6], 0 }
  0x19   :  { %32 = vsyncpa [#allocation6 + $0x1], 0  ;;  %s3428_s21 = smov 0   ;;  %s3430_s22 = smov 0  }
  0x1a   :  { %s3432_s23 = smov 0   ;;  %s3434_s24 = smov 0  }
  0x1b   :  { %s3436_s25 = smov 0   ;;  %s3438_s26 = smov 0  }
  0x1c   :  { %s3440_s27 = smov 0   ;;  %s3442_s28 = smov 0  }
  0x1d   :  { %s3444_s29 = smov 0   ;;  %s3446_s30 = smov 0  }
  0x1e   :  { %s3448_s0 = smov 0  }
  0x1f LB: > { %4253 = sst [smem:[#allocation26_spill]] %s3300_s26  ;;  %s3484_s17 = sadd.s32 4294967295, %s3320_s0   ;;  %s3320_s0 = sphi %s3448_s0, %s38_s0   ;;  %s3316_s30 = sphi %s3446_s30, %s4307_s30   ;;  %s3312_s29 = sphi %s3444_s29, %s4299_s29   ;;  %s3308_s28 = sphi %s3442_s28, %s4306_s28   ;;  %s3304_s27 = sphi %s3440_s27, %s4298_s27   ;;  %s3300_s26 = sphi %s3438_s26, %s4297_s26   ;;  %s3296_s25 = sphi %s3436_s25, %s4305_s25   ;;  %s3292_s24 = sphi %s3434_s24, %s4304_s24   ;;  %s3288_s23 = sphi %s3432_s23, %s4303_s23   ;;  %s3284_s22 = sphi %s3430_s22, %s4302_s22   ;;  %s3280_s21 = sphi %s3428_s21, %s4301_s21  }
  0x20   : > { %4254 = sst [smem:[#allocation27_spill]] %s3304_s27  ;;  %p2615_p0 = scmp.ge.s32.totalorder %s3320_s0, 1 }
  0x21   : > { %4255 = sst [smem:[#allocation28_spill]] %s3308_s28  ;;  %p73_p1 = scmp.eq.s32.totalorder %s3484_s17, 0 }
  0x22   : > { %4256 = sst [smem:[#allocation29_spill]] %s3312_s29  ;;  %p431_p2 = scmp.lt.s32.totalorder %s3320_s0, 5 }
  0x23   : > { %s4257_s2 = sld [smem:[#allocation35_spill]]  ;;  %s3322_s16 = smov [#allocation9]  }
  0x24   : > { %p3492_p3 = pnand %p2615_p0, %p431_p2  ;;  %s444_s14 = sshll.u32 %s3322_s16, 4  ;;  %s445_s14 = int_to_ptr.vmem [resolvable:$true] %s444_s14 }
  0x25   : > { %s4261_s3 = sld [smem:[#allocation36_spill]]  ;;  %s4231_s19 = smov 128  }
  0x26   : > { %s4258_s15 = scalar_select %p3492_p3, 1, 0 }
  0x27   : > { %p2732_p4 = pneg %p3492_p3  ;;  %s3325_s16 = smov [#allocation10]  }
  0x28   : > { %4259 = sst [smem:[#allocation30_spill]] %s4258_s15  ;;  %s459_s13 = sshll.u32 %s3325_s16, 4  ;;  %s460_s13 = int_to_ptr.vmem [resolvable:$true] %s459_s13 }
  0x29   : > { %s442_s20 = sshll.u32 %s4257_s2, 4  ;;  %p3500_p5 = pnand %p2732_p4, %p73_p1  ;;  %s443_s20 = int_to_ptr.hbm [resolvable:$true] %s442_s20 }
  0x2a   : > { %s4232_s2 = smov 8   ;;  %s4262_s6 = sld [smem:[#allocation39_spill]] }
  0x2b   : > { %s457_s18 = sshll.u32 %s4261_s3, 4  ;;  %s4263_s4 = sld [smem:[#allocation37_spill]]  ;;  %s458_s18 = int_to_ptr.hbm [resolvable:$true] %s457_s18 }
  0x2c   : > { %2735 = dma.hbm_to_vmem [thread:$0]  (!%p3500_p5), %s443_s20, 2048, %s445_s14, [#allocation8], %s4231_s19, %s4231_s19, %s4232_s2  }
  0x2d   : > { %2738 = dma.hbm_to_vmem [thread:$0]  (!%p3500_p5), %s458_s18, 16, %s460_s13, [#allocation11]  }
  0x2e   : > { %s3326_s27 = smov [#allocation13]   ;;  %s3327_s7 = smov [#allocation12]  }
  0x2f   : > { %s487_s15 = sshll.u32 %s3326_s27, 4  ;;  %s470_s12 = sshll.u32 %s3327_s7, 4  ;;  %s488_s15 = int_to_ptr.vmem [resolvable:$true] %s487_s15  ;;  %s471_s12 = int_to_ptr.vmem [resolvable:$true] %s470_s12 }
  0x30   : > { %s485_s5 = sshll.u32 %s4262_s6, 4  ;;  %s3328_s13 = smov 256   ;;  %s486_s5 = int_to_ptr.hbm [resolvable:$true] %s485_s5 }
  0x31   : > { %s468_s3 = sshll.u32 %s4263_s4, 4  ;;  %s3329_s14 = smov 16   ;;  %s469_s3 = int_to_ptr.hbm [resolvable:$true] %s468_s3 }
  0x32   : > { %2744 = dma.hbm_to_vmem [thread:$0]  (!%p3500_p5), %s486_s5, 2048, %s488_s15, [#allocation14], %s4231_s19, %s4231_s19, %s4232_s2  }
  0x33   : > { %2741 = dma.hbm_to_vmem [thread:$0]  (!%p3500_p5), %s469_s3, 4096, %s471_s12, [#allocation11], %s3328_s13, %s3328_s13, %s3329_s14  }
  0x34   : > { %s4264_s8 = sld [smem:[#allocation41_spill]]  ;;  %s3330_s5 = smov [#allocation15]  }
  0x35   : > { %s504_s15 = sshll.u32 %s3330_s5, 4  ;;  %s4265_s10 = sld [smem:[#allocation43_spill]]  ;;  %s505_s15 = int_to_ptr.vmem [resolvable:$true] %s504_s15 }
  0x36   : > { %s3331_s3 = smov [#allocation16]   ;;  %s2614_s12 = sadd.s32 4294967294, %s3320_s0  }
  0x37   : > { %s521_s7 = sshll.u32 %s3331_s3, 4  ;;  %s59_s20 = sadd.s32 1, %s3300_s26  ;;  %s522_s7 = int_to_ptr.vmem [resolvable:$true] %s521_s7 }
  0x38   : > { %p4230_p7 = scmp.ne.s32.totalorder %s3300_s26, %s3296_s25  ;;  %p67_p8 = scmp.eq.s32.totalorder %s3320_s0, 0 }
  0x39   : > { %p4229_p10 = scmp.ne.s32.totalorder %s3296_s25, %s3292_s24  ;;  %p92_p13 = scmp.ne.s32.totalorder %s3288_s23, %s3284_s22 }
  0x3a   : > { %s502_s18 = sshll.u32 %s4264_s8, 4  ;;  %p3559_p11 = por %p67_p8, %p4230_p7  ;;  %s503_s18 = int_to_ptr.hbm [resolvable:$true] %s502_s18 }
  0x3b   : > { %s519_s11 = sshll.u32 %s4265_s10, 4  ;;  %p3571_p12 = por %p73_p1, %p4229_p10  ;;  %s520_s11 = int_to_ptr.hbm [resolvable:$true] %s519_s11 }
  0x3c   : > { %2747 = dma.hbm_to_vmem [thread:$0]  (!%p3500_p5), %s503_s18, 4096, %s505_s15, [#allocation14], %s3328_s13, %s3328_s13, %s3329_s14  }
  0x3d   : > { %2750 = dma.hbm_to_vmem [thread:$0]  (!%p3500_p5), %s520_s11, 4096, %s522_s7, [#allocation17], %s4231_s19, %s4231_s19, %s4232_s2  }
  0x3e   : > { %s47_s13 = sadd.s32 1, %s3312_s29  ;;  %s50_s14 = sadd.s32 1, %s3316_s30 }
  0x3f   : > { %p48_p6 = scmp.ge.s32.totalorder %s47_s13, 2  ;;  %s85_s18 = sadd.s32 1, %s3288_s23 }
  0x40   : > { %p98_p0 = scmp.ne.s32.totalorder %s3284_s22, %s3280_s21  ;;  %p3583_p5 = por %p92_p13, %p67_p8 }
  0x41   : > { %s4309_s13 = smov (%p48_p6, %s47_s13), 0  ;;  %s4311_s14 = smov (!%p48_p6, %s50_s14), %s3316_s30 }
  0x42   : > { %4266 = sst [smem:[#allocation31_spill]] %s4309_s13  ;;  %s55_s28 = ssub.s32 %s3312_s29, %s4309_s13 }
  0x43   : > { %p52_p9 = scmp.ge.s32.totalorder %s4311_s14, 2  ;;  %p3595_p6 = por %p98_p0, %p73_p1 }
  0x44   : > { %p424_p10 = scmp.eq.s32.totalorder %s2614_s12, 3  ;;  %p2768_p7 = scmp.lt.s32.totalorder %s3320_s0, 4 }
  0x45   : > { %s4313_s14 = smov (%p52_p9, %s4311_s14), 0  ;;  %p418_p9 = scmp.eq.s32.totalorder %s3484_s17, 3 }
  0x46   : > { %4268 = sst [smem:[#allocation32_spill]] %s4313_s14  ;;  %s54_s15 = ssub.s32 %s3316_s30, %s4313_s14 }
  0x47   : > { %s56_s16 = sor.u32 %s55_s28, %s54_s15  ;;  %p83_p2 = scmp.eq.s32.totalorder %s54_s15, 0 }
  0x48   : > { %p57_p4 = scmp.eq.s32.totalorder %s56_s16, 0  ;;  %p4273_p8 = scmp.ne.s32.totalorder %s3300_s26, %s3296_s25 }
  0x49   : > { %s3588_s11 = scalar_select %p83_p2, %s3288_s23, %s85_s18  }
  0x4a   : > { %s3591_s3 = scalar_select %p57_p4, %s3300_s26, %s59_s20  }
  0x4b   : > { %p3604_p13 = por %p418_p9, %p4273_p8  ;;  %s550_s20 = sand.u32 1, %s3300_s26  }
  0x4c   : > { %4271 = sst [smem:[#allocation33_spill]] %s3591_s3  ;;  %p4275_p2 = scmp.ne.s32.totalorder %s3296_s25, %s3292_s24 }
  0x4d   : > { %s2623_s18 = sshll.u32 %s550_s20, 3  ;;  %s2624_s15 = sshll.u32 %s3316_s30, 1 }
  0x4e   : > { %p3612_p4 = por %p424_p10, %p4275_p2  ;;  %s558_s12 = sadd.s32 %s3312_s29, %s2624_s15 }
  0x4f   : > { %s2625_s16 = sshll.u32 %s558_s12, 3  ;;  %s554_s19 = scalar_lea.vmem [#allocation4], %s2623_s18 }
  0x50   : > { %s564_s2 = sshll.u32 %s554_s19, 4  ;;  %s4277_s8 = sld [smem:[#allocation34_spill]]  ;;  %s565_s2 = int_to_ptr.vmem [resolvable:$true] %s564_s2 }
  0x51   : > { %p2752_p10 = pnand %p2768_p7, %p3559_p11  ;;  %p3629_p0 = pnand %p2768_p7, %p3583_p5 }
  0x52   : > { %s571_s15 = sand.u32 1, %s3320_s0   ;;  %s551_s18 = scalar_lea.sflag [#allocation5], %s550_s20 }
  0x53   : > { %s573_s19 = sand.u32 1, %s3288_s23   ;;  %s2669_s12 = sshll.u32 %s3316_s30, 4 }
  0x54   : > { %s2626_s4 = sshll.u32 %s573_s19, 4  ;;  %s572_s29 = scalar_lea.sflag [#allocation8], %s571_s15 }
  0x55   : > { %s4279_s3 = smov 8   ;;  %s4280_s26 = smov 128  }
  0x56   : > { %s560_s10 = scalar_lea.hbm %s4277_s8, %s2625_s16  ;;  %s575_s16 = scalar_lea.vmem [#allocation7], %s2626_s4 }
  0x57   : > { %s562_s14 = sshll.u32 %s560_s10, 4  ;;  %s580_s10 = scalar_lea.hbm %s4211_s1, %s2669_s12  ;;  %s563_s14 = int_to_ptr.hbm [resolvable:$true] %s562_s14 }
  0x58   : > { %2754 = dma.hbm_to_vmem [thread:$0]  (!%p2752_p10), %s563_s14, 128, %s565_s2, %s551_s18  }
  0x59   : > { %s581_s27 = sshll.u32 %s580_s10, 4  ;;  %s583_s9 = sshll.u32 %s575_s16, 4  ;;  %s582_s27 = int_to_ptr.hbm [resolvable:$true] %s581_s27  ;;  %s584_s9 = int_to_ptr.vmem [resolvable:$true] %s583_s9 }
  0x5a   : > { %2757 = dma.hbm_to_vmem [thread:$0]  (!%p3629_p0), %s582_s27, 256, %s584_s9, %s572_s29, %s4280_s26, %s4280_s26, %s4279_s3  }
  0x5b   : > { %595 = sbr.rel (%p3492_p3) target bundleno = 2555 (0x9fb), region = 84  ;;  %s3647_s2 = sand.u32 (!%p3492_p3), 1, %s3296_s25  }
  0x5c   : > { %s2630_s14 = sshll.u32 (!%p3492_p3), %s3647_s2, 3  ;;  %s598_s18 = scalar_lea.sflag (!%p3492_p3), [#allocation5], %s3647_s2 }
  0x5d   : > { %s3651_s19 = scalar_lea.vmem (!%p3492_p3), [#allocation4], %s2630_s14 }
  0x60   : > { %3251 = dma.done.wait (%p3571_p12), %s598_s18, 128  }
  0x61   : > { %3253 = vsyncadd (%p3571_p12), %s598_s18, 4294967168  ;;  %s607_s26 = sand.u32 1, %s3484_s17   ;;  %s609_s29 = sand.u32 1, %s3284_s22  }
  0x62   : > { %s3659_s13 = sshll.u32 %s609_s29, 4  ;;  %s608_s3 = scalar_lea.sflag [#allocation8], %s607_s26 }
  0x63   : > { %s611_s15 = scalar_lea.vmem [#allocation7], %s3659_s13 }
  0x64   : > { %3255 = dma.done.wait (%p3595_p6), %s608_s3, 256  }
  0x65   : > { %3257 = vsyncadd (%p3595_p6), %s608_s3, 4294967040 }
  0x66   : > { %3259 = dma.done.wait (%p73_p1), [#allocation8], 2048  }
  0x67   : > { %3261 = vsyncadd (%p73_p1), [#allocation8], 4294965248 }
  0x68   : > { %3263 = dma.done.wait (%p73_p1), [#allocation11], 4112  }
  0x69   : > { %3265 = vsyncadd (%p73_p1), [#allocation11], 4294963184 }
  0x6a   : > { %3267 = dma.done.wait (%p73_p1), [#allocation14], 6144  }
  0x6b   : > { %3269 = vsyncadd (%p73_p1), [#allocation14], 4294961152 }
  0x6c   : > { %3271 = dma.done.wait (%p73_p1), [#allocation17], 4096  }
  0x6d   : > { %3273 = vsyncadd (%p73_p1), [#allocation17], 4294963200  ;;  %s3682_s5 = scalar_lea.vmem [#allocation18], %s2630_s14  ;;  %s4282_s7 = sld [smem:[#allocation27_spill]] }
  0x73   : > { %p2639_p3 = scmp.ne.s32.totalorder %s4282_s7, 0 }
  0x74   : > { %s4283_s4 = sld [smem:[#allocation38_spill]] (!%p2639_p3)  ;;  %s3332_s6 = smov (!%p2639_p3), 64  }
  0x75   : > { %699 = sbr.rel (%p2639_p3) target bundleno = 472 (0x1d8), region = 120  ;;  %s3333_s8 = smov (!%p2639_p3), 96  }
  0x76   : > { %s3334_s10 = smov (!%p2639_p3), 32  }
  0x7a   : > { %v732_v0 = vld [vmem:[#allocation12 + $0xf0] sm:$0xff]  ;;  %v733_v1 = vld [vmem:[#allocation12 + $0xf8] sm:$0xff]  ;;  %v730_v2 = vld [vmem:[#allocation12 + $0xe0] sm:$0xff]  ;;  %v3335_v47 = vmov 1983009808   ;;  %vm807_vm0 = vcmask 1047556  }
  0x7b   : > { %740 = vmatpush.msra.mxu0 %v732_v0  ;;  %763 = vmatpush.msra.mxu1 %v733_v1  ;;  %v731_v3 = vld [vmem:[#allocation12 + $0xe8] sm:$0xff]  ;;  %v728_v4 = vld [vmem:[#allocation12 + $0xd0] sm:$0xff]  ;;  %v729_v5 = vld [vmem:[#allocation12 + $0xd8] sm:$0xff]  ;;  %v812_v48 = vunpack.c.l.s4 %v3335_v47  ;;  %v3336_v59 = vmov 1934713408   ;;  %vm1027_vm1 = vcmask 261120  }
  0x7c   : > { %2686 = vmatpush.msra.mxu3 %v733_v1  ;;  %2670 = vmatpush.msra.mxu2 %v732_v0  ;;  %v726_v6 = vld [vmem:[#allocation12 + $0xc0] sm:$0xff]  ;;  %v727_v7 = vld [vmem:[#allocation12 + $0xc8] sm:$0xff]  ;;  %v724_v8 = vld [vmem:[#allocation12 + $0xb0] sm:$0xff]  ;;  %v836_v60 = vunpack.c.l.s4 %v3336_v59 }
  0x7d   : > { %741 = vmatpush.msra.mxu0 %v730_v2  ;;  %764 = vmatpush.msra.mxu1 %v731_v3  ;;  %v725_v9 = vld [vmem:[#allocation12 + $0xb8] sm:$0xff]  ;;  %v722_v10 = vld [vmem:[#allocation12 + $0xa0] sm:$0xff]  ;;  %v723_v11 = vld [vmem:[#allocation12 + $0xa8] sm:$0xff]  ;;  %v3701_v54 = vunpack.c.0.s8 %v812_v48 }
  0x7e   : > { %2687 = vmatpush.msra.mxu3 %v731_v3  ;;  %2671 = vmatpush.msra.mxu2 %v730_v2  ;;  %v720_v12 = vld [vmem:[#allocation12 + $0x90] sm:$0xff]  ;;  %v721_v13 = vld [vmem:[#allocation12 + $0x98] sm:$0xff]  ;;  %v718_v14 = vld [vmem:[#allocation12 + $0x80] sm:$0xff] }
  0x7f   : > { %742 = vmatpush.msra.mxu0 %v728_v4  ;;  %765 = vmatpush.msra.mxu1 %v729_v5  ;;  %v719_v15 = vld [vmem:[#allocation12 + $0x88] sm:$0xff]  ;;  %v716_v16 = vld [vmem:[#allocation12 + $0x70] sm:$0xff]  ;;  %v717_v17 = vld [vmem:[#allocation12 + $0x78] sm:$0xff] }
  0x80   : > { %2688 = vmatpush.msra.mxu3 %v729_v5  ;;  %2672 = vmatpush.msra.mxu2 %v728_v4  ;;  %v714_v18 = vld [vmem:[#allocation12 + $0x60] sm:$0xff]  ;;  %v715_v19 = vld [vmem:[#allocation12 + $0x68] sm:$0xff]  ;;  %v712_v20 = vld [vmem:[#allocation12 + $0x50] sm:$0xff] }
  0x81   : > { %743 = vmatpush.msra.mxu0 %v726_v6  ;;  %766 = vmatpush.msra.mxu1 %v727_v7  ;;  %v713_v21 = vld [vmem:[#allocation12 + $0x58] sm:$0xff]  ;;  %v710_v22 = vld [vmem:[#allocation12 + $0x40] sm:$0xff]  ;;  %v711_v23 = vld [vmem:[#allocation12 + $0x48] sm:$0xff] }
  0x82   : > { %2689 = vmatpush.msra.mxu3 %v727_v7  ;;  %2673 = vmatpush.msra.mxu2 %v726_v6  ;;  %v708_v24 = vld [vmem:[#allocation12 + $0x30] sm:$0xff]  ;;  %v709_v25 = vld [vmem:[#allocation12 + $0x38] sm:$0xff]  ;;  %v706_v26 = vld [vmem:[#allocation12 + $0x20] sm:$0xff] }
  0x83   : > { %744 = vmatpush.msra.mxu0 %v724_v8  ;;  %767 = vmatpush.msra.mxu1 %v725_v9  ;;  %v707_v27 = vld [vmem:[#allocation12 + $0x28] sm:$0xff]  ;;  %v704_v28 = vld [vmem:[#allocation12 + $0x10] sm:$0xff]  ;;  %v705_v29 = vld [vmem:[#allocation12 + $0x18] sm:$0xff] }
  0x84   : > { %2690 = vmatpush.msra.mxu3 %v725_v9  ;;  %2674 = vmatpush.msra.mxu2 %v724_v8  ;;  %v702_v30 = vld [vmem:[#allocation12] sm:$0xff]  ;;  %v703_v31 = vld [vmem:[#allocation12 + $0x8] sm:$0xff]  ;;  %v3713_v8 = vunpack.c.0.s8 %v836_v60 }
  0x85   : > { %745 = vmatpush.msra.mxu0 %v722_v10  ;;  %768 = vmatpush.msra.mxu1 %v723_v11  ;;  %v700_v32 = vld [vmem:[%s611_s15] sm:$0xff]  ;;  %v701_v33 = vld [vmem:[%s611_s15 + $0x8] sm:$0xff] }
  0x86   : > { %2691 = vmatpush.msra.mxu3 %v723_v11  ;;  %2675 = vmatpush.msra.mxu2 %v722_v10  ;;  %v734_v34 = vld [vmem:[%s4283_s4] sm:$0x3] }
  0x87   : > { %746 = vmatpush.msra.mxu0 %v720_v12  ;;  %769 = vmatpush.msra.mxu1 %v721_v13  ;;  %v736_v35 = vperm.slane %v734_v34, 0  ;;  %v737_v36 = vperm.slane %v734_v34, 1 }
  0x88   : > { %2692 = vmatpush.msra.mxu3 %v721_v13  ;;  %2676 = vmatpush.msra.mxu2 %v720_v12 }
  0x89   : > { %747 = vmatpush.msra.mxu0 %v718_v14  ;;  %770 = vmatpush.msra.mxu1 %v719_v15 }
  0x8a   : > { %2693 = vmatpush.msra.mxu3 %v719_v15  ;;  %2677 = vmatpush.msra.mxu2 %v718_v14 }
  0x8b   : > { %748 = vmatpush.msra.mxu0 %v716_v16  ;;  %771 = vmatpush.msra.mxu1 %v717_v17 }
  0x8c   : > { %2694 = vmatpush.msra.mxu3 %v717_v17  ;;  %2678 = vmatpush.msra.mxu2 %v716_v16 }
  0x8d   : > { %749 = vmatpush.msra.mxu0 %v714_v18  ;;  %772 = vmatpush.msra.mxu1 %v715_v19 }
  0x8e   : > { %2695 = vmatpush.msra.mxu3 %v715_v19  ;;  %2679 = vmatpush.msra.mxu2 %v714_v18 }
  0x8f   : > { %750 = vmatpush.msra.mxu0 %v712_v20  ;;  %773 = vmatpush.msra.mxu1 %v713_v21 }
  0x90   : > { %2696 = vmatpush.msra.mxu3 %v713_v21  ;;  %2680 = vmatpush.msra.mxu2 %v712_v20 }
  0x91   : > { %751 = vmatpush.msra.mxu0 %v710_v22  ;;  %774 = vmatpush.msra.mxu1 %v711_v23 }
  0x92   : > { %2697 = vmatpush.msra.mxu3 %v711_v23  ;;  %2681 = vmatpush.msra.mxu2 %v710_v22 }
  0x93   : > { %752 = vmatpush.msra.mxu0 %v708_v24  ;;  %775 = vmatpush.msra.mxu1 %v709_v25 }
  0x94   : > { %2698 = vmatpush.msra.mxu3 %v709_v25  ;;  %2682 = vmatpush.msra.mxu2 %v708_v24 }
  0x95   : > { %753 = vmatpush.msra.mxu0 %v706_v26  ;;  %776 = vmatpush.msra.mxu1 %v707_v27 }
  0x96   : > { %2699 = vmatpush.msra.mxu3 %v707_v27  ;;  %2683 = vmatpush.msra.mxu2 %v706_v26 }
  0x97   : > { %754 = vmatpush.msra.mxu0 %v704_v28  ;;  %777 = vmatpush.msra.mxu1 %v705_v29 }
  0x98   : > { %2700 = vmatpush.msra.mxu3 %v705_v29  ;;  %2684 = vmatpush.msra.mxu2 %v704_v28 }
  0x99   : > { %755 = vmatpush.msra.mxu0 %v702_v30  ;;  %778 = vmatpush.msra.mxu1 %v703_v31 }
  0x9a   : > { %756 = vmatmul.f32.vlgmr.msra.gmra.mxu0 %v700_v32  ;;  %779 = vmatmul.f32.vlgmr.msra.gmra.mxu1 %v700_v32 }
  0x9b   : > { %2701 = vmatpush.msra.mxu3 %v703_v31  ;;  %2685 = vmatpush.msra.mxu2 %v702_v30 }
  0x9c   : > { %782 = vmatmul.f32.vlgmr.msra.gmra.mxu3 %v701_v33  ;;  %759 = vmatmul.f32.vlgmr.msra.gmra.mxu2 %v701_v33 }
 0x117   : > { %v757_v37 = vpop.f32.mrf.mxu0  ;;  %v780_v38 = vpop.f32.mrf.mxu1 }
 0x118   : > { %v758_v39 = vadd.f32 %v757_v37, %v736_v35  ;;  %v781_v40 = vadd.f32 %v780_v38, %v737_v36 }
 0x11a   : > { %1044 = vrot.lane.b32.xlu1 %v781_v40, %s3332_s6  ;;  %788 = vrot.lane.b32.xlu2 %v758_v39, %s3333_s8  ;;  %v809_v53 = vrot.slane %v758_v39, 4  ;;  %v1058_v57 = vrot.slane %v781_v40, 4 }
 0x11b   : > { %794 = vrot.lane.b32.xlu0 %v758_v39, %s3332_s6 }
 0x11f   : > { %v783_v41 = vpop.f32.mrf.mxu3  ;;  %v760_v43 = vpop.f32.mrf.mxu2 }
 0x120   : > { %v784_v42 = vadd.f32 %v783_v41, %v737_v36  ;;  %v3692_v44 = vadd.f32 %v760_v43, %v736_v35 }
 0x122   : > { %1046 = vrot.lane.b32.xlu1 %v784_v42, %s3332_s6  ;;  %1038 = vrot.lane.b32.xlu2 %v781_v40, %s3333_s8  ;;  %v1114_v63 = vrot.slane %v784_v42, 4  ;;  %v865_v15 = vrot.slane %v3692_v44, 4 }
 0x123   : > { %800 = vrot.lane.b32.xlu0 %v758_v39, %s3334_s10 }
 0x12a   : > { %802 = vrot.lane.b32.xlu1 %v3692_v44, %s3334_s10  ;;  %790 = vrot.lane.b32.xlu2 %v3692_v44, %s3333_s8 }
 0x12b   : > { %796 = vrot.lane.b32.xlu0 %v3692_v44, %s3332_s6 }
 0x132   : > { %1050 = vrot.lane.b32.xlu1 %v781_v40, %s3334_s10  ;;  %1052 = vrot.lane.b32.xlu2 %v784_v42, %s3334_s10 }
 0x133   : > { %1040 = vrot.lane.b32.xlu0 %v784_v42, %s3333_s8 }
 0x174   : > { %v789_v45 = vpop.permute.xlu2 %788 }
 0x175   : > { %v821_v0 = vrot.slane %v789_v45, 4 }
 0x17c   : > { %v3697_v46 = vpop.permute.xlu2 %1038 }
 0x17d   : > { %v1070_v16 = vrot.slane %v3697_v46, 4 }
 0x184   : > { %v3699_v50 = vpop.permute.xlu2 %790 }
 0x185   : > { %v877_v24 = vrot.slane %v3699_v50, 4 }
 0x18c   : > { %v1045_v49 = vpop.permute.xlu1 %1044  ;;  %v3719_v12 = vpop.permute.xlu2 %1052 }
 0x18d   : > { %v795_v51 = vpop.permute.xlu0 %794  ;;  %v1056_v55 = vrot.slane %v1045_v49, 4  ;;  %v1059_v61 = vsel %vm807_vm0, %v1045_v49, %v1058_v57  ;;  %v1124_v26 = vrot.slane %v3719_v12, 4 }
 0x18e   : > { %v806_v52 = vrot.slane %v795_v51, 4  ;;  %v810_v56 = vsel %vm807_vm0, %v795_v51, %v809_v53  ;;  %v3711_v7 = vperm.slane %v1059_v61, %v3701_v54 }
 0x18f   : > { %v818_v62 = vperm.slane %v810_v56, %v3701_v54  ;;  %v1057_v1 = vsel %vm807_vm0, %v1056_v55, %v781_v40 }
 0x190   : > { %v808_v58 = vsel %vm807_vm0, %v806_v52, %v758_v39  ;;  %v3717_v11 = vperm.slane %v1057_v1, %v3701_v54  ;;  %v1094_v25 = vrot.slane %v3711_v7, 4 }
 0x191   : > { %v814_v2 = vperm.slane %v808_v58, %v3701_v54  ;;  %v845_v13 = vrot.slane %v818_v62, 4 }
 0x192   : > { %v1082_v28 = vrot.slane %v3717_v11, 4 }
 0x193   : > { %v833_v17 = vrot.slane %v814_v2, 4 }
 0x194   : > { %v1047_v3 = vpop.permute.xlu1 %1046 }
 0x195   : > { %v1112_v4 = vrot.slane %v1047_v3, 4  ;;  %v1115_v5 = vsel %vm807_vm0, %v1047_v3, %v1114_v63  ;;  %v801_v6 = vpop.permute.xlu0 %800 }
 0x196   : > { %v819_v9 = vrot.slane %v801_v6, 4  ;;  %v822_v10 = vsel %vm807_vm0, %v801_v6, %v821_v0  ;;  %v3725_v18 = vperm.slane %v1115_v5, %v3701_v54 }
 0x197   : > { %v830_v14 = vperm.slane %v822_v10, %v3701_v54  ;;  %v1113_v20 = vsel %vm807_vm0, %v1112_v4, %v784_v42 }
 0x198   : > { %v820_v19 = vsel %vm807_vm0, %v819_v9, %v789_v45  ;;  %v3739_v32 = vperm.slane %v1113_v20, %v3701_v54  ;;  %v1150_v37 = vrot.slane %v3725_v18, 4 }
 0x199   : > { %v826_v21 = vperm.slane %v820_v19, %v3701_v54  ;;  %v843_v22 = vrot.slane %v830_v14, 4  ;;  %v846_v23 = vsel %vm807_vm0, %v830_v14, %v845_v13 }
 0x19a   : > { %v854_v27 = vperm.slane %v846_v23, %v3713_v8 }
 0x19b   : > { %v831_v29 = vrot.slane %v826_v21, 4  ;;  %v834_v30 = vsel %vm807_vm0, %v826_v21, %v833_v17  ;;  %v844_v31 = vsel %vm807_vm0, %v843_v22, %v818_v62 }
 0x19c   : > { %v842_v33 = vperm.slane %v834_v30, %v3713_v8  ;;  %v850_v34 = vperm.slane %v844_v31, %v3713_v8  ;;  %v861_v35 = vrot.slane %v854_v27, 4  ;;  %v803_v36 = vpop.permute.xlu1 %802 }
 0x19d   : > { %v832_v38 = vsel %vm807_vm0, %v831_v29, %v814_v2  ;;  %v875_v39 = vrot.slane %v803_v36, 4  ;;  %v878_v40 = vsel %vm807_vm0, %v803_v36, %v877_v24  ;;  %v797_v57 = vpop.permute.xlu0 %796 }
 0x19e   : > { %v838_v41 = vperm.slane %v832_v38, %v3713_v8  ;;  %v857_v42 = vrot.slane %v842_v33, 4  ;;  %v859_v43 = vrot.slane %v850_v34, 4  ;;  %v862_v45 = vsel %vm807_vm0, 0.0, %v861_v35 }
 0x19f   : > { %v930_v47 = vsel %vm807_vm0, %v861_v35, %v850_v34  ;;  %v935_v48 = vrot.slane %v862_v45, 4  ;;  %v876_v49 = vsel %vm807_vm0, %v875_v39, %v3699_v50  ;;  %v886_v51 = vperm.slane %v878_v40, %v3701_v54 }
 0x1a0   : > { %v855_v52 = vrot.slane %v838_v41, 4  ;;  %v858_v53 = vsel %vm807_vm0, 0.0, %v857_v42  ;;  %v860_v55 = vsel %vm807_vm0, 0.0, %v859_v43  ;;  %v919_v56 = vsel %vm807_vm0, %v857_v42, %v838_v41 }
 0x1a1   : > { %v923_v58 = vperm.slane %v919_v56, %v3701_v54  ;;  %v924_v59 = vrot.slane %v858_v53, 4  ;;  %v934_v60 = vperm.slane %v930_v47, %v3701_v54  ;;  %v936_v61 = vsel %vm807_vm0, %v935_v48, %v860_v55 }
 0x1a2   : > { %v856_v50 = vsel %vm807_vm0, 0.0, %v855_v52  ;;  %v940_v62 = vperm.slane %v936_v61, %v3701_v54  ;;  %v882_v63 = vperm.slane %v876_v49, %v3701_v54  ;;  %v899_v0 = vrot.slane %v886_v51, 4 }
 0x1a3   : > { %v925_v1 = vsel %vm807_vm0, %v924_v59, %v856_v50  ;;  %v943_v2 = vrot.slane %v923_v58, 4  ;;  %v955_v3 = vrot.slane %v934_v60, 4  ;;  %v863_v4 = vrot.slane %v797_v57, 4 }
 0x1a4   : > { %v929_v5 = vperm.slane %v925_v1, %v3701_v54  ;;  %v953_v6 = vrot.slane %v940_v62, 4  ;;  %v887_v9 = vrot.slane %v882_v63, 4  ;;  %v866_v10 = vsel %vm807_vm0, %v797_v57, %v865_v15  ;;  %v1051_v13 = vpop.permute.xlu1 %1050 }
 0x1a5   : > { %v956_v14 = vsel %vm807_vm0, %v940_v62, %v955_v3  ;;  %v864_v17 = vsel %vm807_vm0, %v863_v4, %v3692_v44  ;;  %v874_v19 = vperm.slane %v866_v10, %v3701_v54  ;;  %v1068_v20 = vrot.slane %v1051_v13, 4  ;;  %v3790_v57 = vpop.permute.xlu0 %1040 }
 0x1a6   : > { %v941_v21 = vrot.slane %v929_v5, 4  ;;  %v944_v22 = vsel %vm807_vm0, %v929_v5, %v943_v2  ;;  %v954_v23 = vsel %vm807_vm0, %v953_v6, %v934_v60  ;;  %v964_v24 = vperm.slane %v956_v14, %v3713_v8 }
 0x1a7   : > { %v952_v27 = vperm.slane %v944_v22, %v3713_v8  ;;  %v960_v15 = vperm.slane %v954_v23, %v3713_v8  ;;  %v870_v29 = vperm.slane %v864_v17, %v3701_v54  ;;  %v900_v30 = vsel %vm807_vm0, %v899_v0, %v874_v19 }
 0x1a8   : > { %v942_v44 = vsel %vm807_vm0, %v941_v21, %v923_v58  ;;  %v969_v31 = vrot.slane %v964_v24, 4  ;;  %v901_v33 = vrot.slane %v874_v19, 4  ;;  %v906_v34 = vperm.slane %v900_v30, %v3713_v8 }
 0x1a9   : > { %v948_v35 = vperm.slane %v942_v44, %v3713_v8  ;;  %v965_v36 = vrot.slane %v960_v15, 4  ;;  %v971_v38 = vrot.slane %v952_v27, 4  ;;  %v888_v39 = vsel %vm807_vm0, %v887_v9, %v870_v29 }
 0x1aa   : > { %v970_v40 = vsel %vm807_vm0, %v969_v31, %v952_v27  ;;  %v889_v41 = vrot.slane %v870_v29, 4  ;;  %v894_v42 = vperm.slane %v888_v39, %v3713_v8  ;;  %v902_v43 = vsel %vm807_vm0, %v886_v51, %v901_v33 }
 0x1ab   : > { %v966_v45 = vsel %vm807_vm0, %v965_v36, %v948_v35  ;;  %v967_v47 = vrot.slane %v948_v35, 4  ;;  %v972_v48 = vsel %vm807_vm0, %v964_v24, %v971_v38  ;;  %1032 = vst.msk [vmem:[#allocation2 + $0x20] sm:$0xff] %vm1027_vm1, %v970_v40  ;;  %v910_v49 = vperm.slane %v902_v43, %v3713_v8 }
 0x1ac   : > { %1028 = vst.msk [vmem:[#allocation2] sm:$0xff] %vm1027_vm1, %v966_v45  ;;  %v890_v52 = vsel %vm807_vm0, %v882_v63, %v889_v41  ;;  %v911_v53 = vrot.slane %v894_v42, 4  ;;  %v915_v55 = vrot.slane %v906_v34, 4  ;;  %v1069_v56 = vsel %vm807_vm0, %v1068_v20, %v3697_v46 }
 0x1ad   : > { %v968_v51 = vsel %vm807_vm0, %v960_v15, %v967_v47  ;;  %1034 = vst.msk [vmem:[#allocation2 + $0x30] sm:$0xff] %vm1027_vm1, %v972_v48  ;;  %v898_v58 = vperm.slane %v890_v52, %v3713_v8  ;;  %v917_v59 = vrot.slane %v910_v49, 4  ;;  %v1071_v60 = vsel %vm807_vm0, %v1051_v13, %v1070_v16 }
 0x1ae   : > { %1030 = vst.msk [vmem:[#allocation2 + $0x10] sm:$0xff] %vm1027_vm1, %v968_v51  ;;  %v912_v61 = vsel %vm807_vm0, 0.0, %v911_v53  ;;  %v916_v50 = vsel %vm807_vm0, 0.0, %v915_v55  ;;  %v1075_v62 = vperm.slane %v1069_v56, %v3701_v54  ;;  %v1079_v63 = vperm.slane %v1071_v60, %v3701_v54 }
 0x1af   : > { %v913_v0 = vrot.slane %v898_v58, 4  ;;  %v918_v1 = vsel %vm807_vm0, 0.0, %v917_v59  ;;  %v984_v2 = vsel %vm807_vm0, %v917_v59, %v906_v34  ;;  %v3809_v46 = vsel %vm807_vm0, %v1124_v26, %v3790_v57 }
 0x1b0   : > { %v988_v16 = vperm.slane %v984_v2, %v3701_v54  ;;  %v989_v3 = vrot.slane %v918_v1, 4  ;;  %v1080_v4 = vrot.slane %v1075_v62, 4  ;;  %v1083_v5 = vsel %vm807_vm0, %v1075_v62, %v1082_v28 }
 0x1b1   : > { %v914_v6 = vsel %vm807_vm0, 0.0, %v913_v0  ;;  %v973_v9 = vsel %vm807_vm0, %v913_v0, %v894_v42  ;;  %v1091_v10 = vperm.slane %v1083_v5, %v3713_v8  ;;  %v1092_v13 = vrot.slane %v1079_v63, 4 }
 0x1b2   : > { %v977_v14 = vperm.slane %v973_v9, %v3701_v54  ;;  %v978_v17 = vrot.slane %v914_v6, 4  ;;  %v990_v26 = vsel %vm807_vm0, %v989_v3, %v916_v50  ;;  %v1009_v19 = vrot.slane %v988_v16, 4 }
 0x1b3   : > { %v994_v20 = vperm.slane %v990_v26, %v3701_v54  ;;  %v1081_v21 = vsel %vm807_vm0, %v1080_v4, %v3717_v11  ;;  %v1093_v28 = vsel %vm807_vm0, %v1092_v13, %v3711_v7  ;;  %v1095_v22 = vsel %vm807_vm0, %v1079_v63, %v1094_v25 }
 0x1b4   : > { %v979_v23 = vsel %vm807_vm0, %v978_v17, %v912_v61  ;;  %v997_v24 = vrot.slane %v977_v14, 4  ;;  %v1087_v27 = vperm.slane %v1081_v21, %v3713_v8  ;;  %v1099_v15 = vperm.slane %v1093_v28, %v3713_v8 }
 0x1b5   : > { %v983_v29 = vperm.slane %v979_v23, %v3701_v54  ;;  %v1007_v30 = vrot.slane %v994_v20, 4  ;;  %v1010_v44 = vsel %vm807_vm0, %v994_v20, %v1009_v19  ;;  %v1103_v11 = vperm.slane %v1095_v22, %v3713_v8 }
 0x1b6   : > { %v1018_v31 = vperm.slane %v1010_v44, %v3713_v8  ;;  %v1104_v33 = vrot.slane %v1087_v27, 4  ;;  %v1106_v7 = vrot.slane %v1091_v10, 4  ;;  %v1108_v34 = vrot.slane %v1099_v15, 4 }
 0x1b7   : > { %v995_v25 = vrot.slane %v983_v29, 4  ;;  %v998_v35 = vsel %vm807_vm0, %v983_v29, %v997_v24  ;;  %v1008_v36 = vsel %vm807_vm0, %v1007_v30, %v988_v16  ;;  %v1110_v38 = vrot.slane %v1103_v11, 4 }
 0x1b8   : > { %v1006_v39 = vperm.slane %v998_v35, %v3713_v8  ;;  %v1014_v40 = vperm.slane %v1008_v36, %v3713_v8  ;;  %v1023_v41 = vrot.slane %v1018_v31, 4  ;;  %v1105_v42 = vsel %vm807_vm0, 0.0, %v1104_v33 }
 0x1b9   : > { %v996_v43 = vsel %vm807_vm0, %v995_v25, %v977_v14  ;;  %v1107_v45 = vsel %vm807_vm0, 0.0, %v1106_v7  ;;  %v1109_v47 = vsel %vm807_vm0, 0.0, %v1108_v34  ;;  %v1111_v48 = vsel %vm807_vm0, 0.0, %v1110_v38 }
 0x1ba   : > { %v1002_v49 = vperm.slane %v996_v43, %v3713_v8  ;;  %v1019_v52 = vrot.slane %v1014_v40, 4  ;;  %v1024_v53 = vsel %vm807_vm0, %v1023_v41, %v1006_v39  ;;  %v1025_v55 = vrot.slane %v1006_v39, 4 }
 0x1bb   : > { %1033 = vst.msk [vmem:[#allocation2 + $0x28] sm:$0xff] %vm1027_vm1, %v1024_v53  ;;  %v1168_v56 = vsel %vm807_vm0, %v1106_v7, %v1087_v27  ;;  %v1173_v51 = vrot.slane %v1107_v45, 4  ;;  %v1179_v58 = vsel %vm807_vm0, %v1110_v38, %v1099_v15  ;;  %v1184_v59 = vrot.slane %v1111_v48, 4 }
 0x1bc   : > { %v1020_v60 = vsel %vm807_vm0, %v1019_v52, %v1002_v49  ;;  %v1021_v61 = vrot.slane %v1002_v49, 4  ;;  %v1026_v50 = vsel %vm807_vm0, %v1018_v31, %v1025_v55  ;;  %v1172_v62 = vperm.slane %v1168_v56, %v3701_v54 }
 0x1bd   : > { %1029 = vst.msk [vmem:[#allocation2 + $0x8] sm:$0xff] %vm1027_vm1, %v1020_v60  ;;  %v1174_v63 = vsel %vm807_vm0, %v1173_v51, %v1105_v42  ;;  %v1183_v0 = vperm.slane %v1179_v58, %v3701_v54  ;;  %v1185_v1 = vsel %vm807_vm0, %v1184_v59, %v1109_v47  ;;  %v1126_v2 = vrot.slane %v3790_v57, 4 }
 0x1be   : > { %v1022_v16 = vsel %vm807_vm0, %v1014_v40, %v1021_v61  ;;  %1035 = vst.msk [vmem:[#allocation2 + $0x38] sm:$0xff] %vm1027_vm1, %v1026_v50  ;;  %v1178_v3 = vperm.slane %v1174_v63, %v3701_v54  ;;  %v1189_v4 = vperm.slane %v1185_v1, %v3701_v54  ;;  %v1192_v5 = vrot.slane %v1172_v62, 4 }
 0x1bf   : > { %v1138_v6 = vrot.slane %v3739_v32, 4  ;;  %1031 = vst.msk [vmem:[#allocation2 + $0x18] sm:$0xff] %vm1027_vm1, %v1022_v16  ;;  %v1204_v9 = vrot.slane %v1183_v0, 4  ;;  %v1127_v10 = vsel %vm807_vm0, %v3719_v12, %v1126_v2  ;;  %v1131_v57 = vperm.slane %v3809_v46, %v3701_v54 }
 0x1c0   : > { %v1190_v13 = vrot.slane %v1178_v3, 4  ;;  %v1193_v14 = vsel %vm807_vm0, %v1178_v3, %v1192_v5  ;;  %v1202_v17 = vrot.slane %v1189_v4, 4  ;;  %v1135_v26 = vperm.slane %v1127_v10, %v3701_v54 }
 0x1c1   : > { %v1201_v19 = vperm.slane %v1193_v14, %v3713_v8  ;;  %v1205_v20 = vsel %vm807_vm0, %v1189_v4, %v1204_v9  ;;  %v1136_v21 = vrot.slane %v1131_v57, 4  ;;  %v1139_v28 = vsel %vm807_vm0, %v1131_v57, %v1138_v6 }
 0x1c2   : > { %v1191_v22 = vsel %vm807_vm0, %v1190_v13, %v1172_v62  ;;  %v1203_v12 = vsel %vm807_vm0, %v1202_v17, %v1183_v0  ;;  %v1213_v23 = vperm.slane %v1205_v20, %v3713_v8  ;;  %v1147_v46 = vperm.slane %v1139_v28, %v3713_v8 }
 0x1c3   : > { %v1197_v24 = vperm.slane %v1191_v22, %v3713_v8  ;;  %v1209_v27 = vperm.slane %v1203_v12, %v3713_v8  ;;  %v1220_v15 = vrot.slane %v1201_v19, 4  ;;  %v1137_v29 = vsel %vm807_vm0, %v1136_v21, %v3739_v32 }
 0x1c4   : > { %v1218_v30 = vrot.slane %v1213_v23, 4  ;;  %v1143_v44 = vperm.slane %v1137_v29, %v3713_v8  ;;  %v1148_v11 = vrot.slane %v1135_v26, 4  ;;  %v1151_v31 = vsel %vm807_vm0, %v1135_v26, %v1150_v37 }
 0x1c5   : > { %v1214_v33 = vrot.slane %v1209_v27, 4  ;;  %v1216_v7 = vrot.slane %v1197_v24, 4  ;;  %v1221_v34 = vsel %vm807_vm0, %v1213_v23, %v1220_v15  ;;  %v1159_v25 = vperm.slane %v1151_v31, %v3713_v8 }
 0x1c6   : > { %v1219_v35 = vsel %vm807_vm0, %v1218_v30, %v1201_v19  ;;  %1282 = vst.msk [vmem:[#allocation3 + $0x30] sm:$0xff] %vm1027_vm1, %v1221_v34  ;;  %v1149_v32 = vsel %vm807_vm0, %v1148_v11, %v3725_v18  ;;  %v1160_v36 = vrot.slane %v1143_v44, 4  ;;  %v1162_v38 = vrot.slane %v1147_v46, 4 }
 0x1c7   : > { %v1215_v39 = vsel %vm807_vm0, %v1214_v33, %v1197_v24  ;;  %v1217_v40 = vsel %vm807_vm0, %v1209_v27, %v1216_v7  ;;  %1280 = vst.msk [vmem:[#allocation3 + $0x20] sm:$0xff] %vm1027_vm1, %v1219_v35  ;;  %v1155_v37 = vperm.slane %v1149_v32, %v3713_v8  ;;  %v1166_v41 = vrot.slane %v1159_v25, 4 }
 0x1c8   : > { %1276 = vst.msk [vmem:[#allocation3] sm:$0xff] %vm1027_vm1, %v1215_v39  ;;  %v1161_v42 = vsel %vm807_vm0, 0.0, %v1160_v36  ;;  %v1163_v43 = vsel %vm807_vm0, 0.0, %v1162_v38  ;;  %v1222_v45 = vsel %vm807_vm0, %v1162_v38, %v1143_v44 }
 0x1c9   : > { %1278 = vst.msk [vmem:[#allocation3 + $0x10] sm:$0xff] %vm1027_vm1, %v1217_v40  ;;  %v1164_v18 = vrot.slane %v1155_v37, 4  ;;  %v1167_v47 = vsel %vm807_vm0, 0.0, %v1166_v41  ;;  %v1226_v48 = vperm.slane %v1222_v45, %v3701_v54  ;;  %v1227_v49 = vrot.slane %v1163_v43, 4 }
 0x1ca   : > { %v1233_v52 = vsel %vm807_vm0, %v1166_v41, %v1155_v37  ;;  %v1238_v53 = vrot.slane %v1167_v47, 4 }
 0x1cb   : > { %v1165_v55 = vsel %vm807_vm0, 0.0, %v1164_v18  ;;  %v1228_v56 = vsel %vm807_vm0, %v1227_v49, %v1161_v42  ;;  %v1237_v51 = vperm.slane %v1233_v52, %v3701_v54  ;;  %v1246_v58 = vrot.slane %v1226_v48, 4 }
 0x1cc   : > { %v1232_v59 = vperm.slane %v1228_v56, %v3701_v54  ;;  %v1239_v60 = vsel %vm807_vm0, %v1238_v53, %v1165_v55 }
 0x1cd   : > { %v1243_v61 = vperm.slane %v1239_v60, %v3701_v54  ;;  %v1258_v50 = vrot.slane %v1237_v51, 4 }
 0x1ce   : > { %v1244_v62 = vrot.slane %v1232_v59, 4  ;;  %v1247_v63 = vsel %vm807_vm0, %v1232_v59, %v1246_v58 }
 0x1cf   : > { %v1255_v0 = vperm.slane %v1247_v63, %v3713_v8  ;;  %v1256_v1 = vrot.slane %v1243_v61, 4  ;;  %v1259_v2 = vsel %vm807_vm0, %v1243_v61, %v1258_v50 }
 0x1d0   : > { %v1245_v16 = vsel %vm807_vm0, %v1244_v62, %v1226_v48  ;;  %v1267_v3 = vperm.slane %v1259_v2, %v3713_v8 }
 0x1d1   : > { %v1251_v4 = vperm.slane %v1245_v16, %v3713_v8  ;;  %v1257_v5 = vsel %vm807_vm0, %v1256_v1, %v1237_v51  ;;  %v1274_v6 = vrot.slane %v1255_v0, 4 }
 0x1d2   : > { %v1263_v54 = vperm.slane %v1257_v5, %v3713_v8  ;;  %v1272_v9 = vrot.slane %v1267_v3, 4 }
 0x1d3   : > { %v1270_v10 = vrot.slane %v1251_v4, 4  ;;  %v1275_v57 = vsel %vm807_vm0, %v1267_v3, %v1274_v6 }
 0x1d4   : > { %v1268_v13 = vrot.slane %v1263_v54, 4  ;;  %v1273_v14 = vsel %vm807_vm0, %v1272_v9, %v1255_v0  ;;  %1283 = vst.msk [vmem:[#allocation3 + $0x38] sm:$0xff] %vm1027_vm1, %v1275_v57 }
 0x1d5   : > { %v1271_v17 = vsel %vm807_vm0, %v1263_v54, %v1270_v10  ;;  %1281 = vst.msk [vmem:[#allocation3 + $0x28] sm:$0xff] %vm1027_vm1, %v1273_v14 }
 0x1d6   : > { %v1269_v26 = vsel %vm807_vm0, %v1268_v13, %v1251_v4  ;;  %1279 = vst.msk [vmem:[#allocation3 + $0x18] sm:$0xff] %vm1027_vm1, %v1271_v17 }
 0x1d7   : > { %1277 = vst.msk [vmem:[#allocation3 + $0x8] sm:$0xff] %vm1027_vm1, %v1269_v26 }
 0x1d8 PF: > { %v1300_v8 = vld [vmem:[#allocation9 + $0x78] sm:$0xff]  ;;  %v1299_v19 = vld [vmem:[#allocation9 + $0x70] sm:$0xff]  ;;  %v1298_v20 = vld [vmem:[#allocation9 + $0x68] sm:$0xff]  ;;  %s3337_s27 = smov 32   ;;  %s3338_s16 = smov 96   ;;  %vm1455_vm2 = vcmask 261120  }
 0x1d9   : > { %1305 = vmatpush.msra.mxu0 %v1300_v8  ;;  %v1297_v21 = vld [vmem:[#allocation9 + $0x60] sm:$0xff]  ;;  %v1296_v28 = vld [vmem:[#allocation9 + $0x58] sm:$0xff]  ;;  %v1295_v22 = vld [vmem:[#allocation9 + $0x50] sm:$0xff]  ;;  %s3339_s9 = smov 64   ;;  %v3340_v36 = vmov 1983009808  }
 0x1da   : > { %v1294_v12 = vld [vmem:[#allocation9 + $0x48] sm:$0xff]  ;;  %v1293_v23 = vld [vmem:[#allocation9 + $0x40] sm:$0xff]  ;;  %v1292_v46 = vld [vmem:[#allocation9 + $0x38] sm:$0xff]  ;;  %v1342_v38 = vunpack.c.l.s4 %v3340_v36  ;;  %vm1337_vm3 = vcmask 1047556   ;;  %v3341_v49 = vmov 1934713408  }
 0x1db   : > { %1306 = vmatpush.msra.mxu0 %v1299_v19  ;;  %v1291_v24 = vld [vmem:[#allocation9 + $0x30] sm:$0xff]  ;;  %v1290_v27 = vld [vmem:[#allocation9 + $0x28] sm:$0xff]  ;;  %v1289_v15 = vld [vmem:[#allocation9 + $0x20] sm:$0xff]  ;;  %v1366_v52 = vunpack.c.l.s4 %v3341_v49  ;;  %vm1560_vm4 = vcmask 64512   ;;  %s4286_s18 = sld [smem:[#allocation40_spill]]  ;;  %s2431_s6 = scalar_lea.sflag [#allocation6], %s3647_s2 }
 0x1dc   : > { %v1288_v29 = vld [vmem:[#allocation9 + $0x18] sm:$0xff]  ;;  %v1287_v30 = vld [vmem:[#allocation9 + $0x10] sm:$0xff]  ;;  %v1286_v44 = vld [vmem:[#allocation9 + $0x8] sm:$0xff]  ;;  %v3934_v45 = vunpack.c.0.s8 %v1342_v38  ;;  %s4287_s29 = sld [smem:[#allocation45_spill]] }
 0x1dd   : > { %1307 = vmatpush.msra.mxu0 %v1298_v20  ;;  %v1285_v11 = vld [vmem:[#allocation9] sm:$0xff]  ;;  %v3925_v31 = vld [vmem:[%s3651_s19] sm:$0xff]  ;;  %v1718_v39 = vld [vmem:[#allocation2 + $0x18] sm:$0xff]  ;;  %v3942_v58 = vunpack.c.0.s8 %v1366_v52  ;;  %s4288_s15 = sld [smem:[#allocation46_spill]] }
 0x1de   : > { %v2885_v33 = vld [vmem:[#allocation10] ss:$0 sm:$0xff]  ;;  %v1449_v35 = vld [vmem:[#allocation2 + $0x20] sm:$0xff]  ;;  %2654 = vmatpush.xpose.msk.msra.mxu1 %vm1455_vm2, %v1718_v39  ;;  %s4289_s12 = sld [smem:[#allocation42_spill]] }
 0x1df   : > { %1308 = vmatpush.msra.mxu0 %v1297_v21  ;;  %v1447_v32 = vld [vmem:[#allocation2] sm:$0xff]  ;;  %2644 = vmatpush.xpose.msk.msra.mxu3 %vm1455_vm2, %v1449_v35  ;;  %v1448_v43 = vld [vmem:[#allocation2 + $0x10] sm:$0xff]  ;;  %s4290_s8 = sld [smem:[#allocation44_spill]] }
 0x1e0   : > { %2640 = vmatpush.xpose.msk.msra.mxu2 %vm1455_vm2, %v1447_v32  ;;  %v1450_v47 = vld [vmem:[#allocation2 + $0x30] sm:$0xff]  ;;  %s4291_s10 = sld [smem:[#allocation28_spill]] }
 0x1e1   : > { %1309 = vmatpush.msra.mxu0 %v1296_v28  ;;  %s4293_s19 = sld [smem:[#allocation47_spill]] }
 0x1e2   : > { %s4294_s13 = sld [smem:[#allocation49_spill]] }
 0x1e3   : > { %1310 = vmatpush.msra.mxu0 %v1295_v22  ;;  %2646 = vmatpush.xpose.msk.msrb.mxu3 %vm1455_vm2, %v1450_v47  ;;  %s4295_s17 = sld [smem:[#allocation48_spill]] }
 0x1e4   : > { %2642 = vmatpush.xpose.msk.msrb.mxu2 %vm1455_vm2, %v1448_v43 }
 0x1e5   : > { %1311 = vmatpush.msra.mxu0 %v1294_v12 }
 0x1e7   : > { %1312 = vmatpush.msra.mxu0 %v1293_v23 }
 0x1e9   : > { %1313 = vmatpush.msra.mxu0 %v1292_v46 }
 0x1eb   : > { %1314 = vmatpush.msra.mxu0 %v1291_v24 }
 0x1ed   : > { %1315 = vmatpush.msra.mxu0 %v1290_v27 }
 0x1ef   : > { %1316 = vmatpush.msra.mxu0 %v1289_v15 }
 0x1f1   : > { %1317 = vmatpush.msra.mxu0 %v1288_v29 }
 0x1f3   : > { %1318 = vmatpush.msra.mxu0 %v1287_v30 }
 0x1f5   : > { %1319 = vmatpush.msra.mxu0 %v1286_v44 }
 0x1f7   : > { %1320 = vmatpush.msra.mxu0 %v1285_v11 }
 0x1f8   : > { %1321 = vmatmul.f32.vlgmr.msra.gmra.mxu0 %v3925_v31 }
 0x275   : > { %v1322_v7 = vpop.f32.mrf.mxu0 }
 0x276   : > { %v1323_v34 = vadd.f32 %v2885_v33, %v1322_v7 }
 0x278   : > { %v1325_v25 = vmul.f32 0.17677669, %v1323_v34 }
 0x27a   : > { %1333 = vrot.lane.b32.xlu1 %v1325_v25, %s3337_s27  ;;  %1327 = vrot.lane.b32.xlu0 %v1325_v25, %s3338_s16  ;;  %v1339_v55 = vrot.slane %v1325_v25, 4 }
 0x282   : > { %1330 = vrot.lane.b32.xlu0 %v1325_v25, %s3339_s9 }
 0x2ec   : > { %v1334_v40 = vpop.permute.xlu1 %1333  ;;  %v1328_v37 = vpop.permute.xlu0 %1327 }
 0x2ed   : > { %v1349_v41 = vrot.slane %v1334_v40, 4  ;;  %v1351_v42 = vrot.slane %v1328_v37, 4 }
 0x2ef   : > { %v1352_v18 = vsel %vm1337_vm3, %v1334_v40, %v1351_v42  ;;  %v1350_v48 = vsel %vm1337_vm3, %v1349_v41, %v1328_v37 }
 0x2f0   : > { %v1360_v53 = vperm.slane %v1352_v18, %v3934_v45  ;;  %v1356_v56 = vperm.slane %v1350_v48, %v3934_v45 }
 0x2f2   : > { %v1373_v61 = vrot.slane %v1360_v53, 4  ;;  %v1361_v63 = vrot.slane %v1356_v56, 4 }
 0x2f4   : > { %v1331_v51 = vpop.permute.xlu0 %1330 }
 0x2f5   : > { %v1336_v59 = vrot.slane %v1331_v51, 4  ;;  %v1340_v60 = vsel %vm1337_vm3, %v1331_v51, %v1339_v55 }
 0x2f6   : > { %v1348_v50 = vperm.slane %v1340_v60, %v3934_v45 }
 0x2f7   : > { %v1338_v62 = vsel %vm1337_vm3, %v1336_v59, %v1325_v25 }
 0x2f8   : > { %v1344_v0 = vperm.slane %v1338_v62, %v3934_v45  ;;  %v1374_v1 = vsel %vm1337_vm3, %v1373_v61, %v1348_v50  ;;  %v1375_v2 = vrot.slane %v1348_v50, 4  ;;  %v1453_v62 = vld [vmem:[#allocation3 + $0x20] sm:$0xff] }
 0x2f9   : > { %v1380_v16 = vperm.slane %v1374_v1, %v3942_v58  ;;  %1685 = vmatpush.msrb.mxu0 %v1453_v62  ;;  %v1454_v1 = vld [vmem:[#allocation3 + $0x30] sm:$0xff] }
 0x2fa   : > { %v1362_v3 = vsel %vm1337_vm3, %v1361_v63, %v1344_v0  ;;  %v1363_v4 = vrot.slane %v1344_v0, 4  ;;  %v1376_v5 = vsel %vm1337_vm3, %v1360_v53, %v1375_v2  ;;  %v1451_v63 = vld [vmem:[#allocation3] sm:$0xff]  ;;  %v1452_v0 = vld [vmem:[#allocation3 + $0x10] sm:$0xff]  ;;  %v1717_v2 = vld [vmem:[#allocation2 + $0x8] sm:$0xff] }
 0x2fb   : > { %v1368_v6 = vperm.slane %v1362_v3, %v3942_v58  ;;  %v1384_v54 = vperm.slane %v1376_v5, %v3942_v58  ;;  %v1389_v57 = vrot.slane %v1380_v16, 4 }
 0x2fc   : > { %v1364_v9 = vsel %vm1337_vm3, %v1356_v56, %v1363_v4 }
 0x2fd   : > { %v1372_v10 = vperm.slane %v1364_v9, %v3942_v58  ;;  %v1391_v13 = vrot.slane %v1384_v54, 4  ;;  %v1385_v14 = vrot.slane %v1368_v6, 4  ;;  %v1390_v28 = vsel %vm1337_vm3, 0.0, %v1389_v57 }
 0x2ff   : > { %v1387_v17 = vrot.slane %v1372_v10, 4  ;;  %v1392_v26 = vsel %vm1337_vm3, 0.0, %v1391_v13  ;;  %v1404_v8 = vsel %vm1337_vm3, %v1391_v13, %v1380_v16  ;;  %v1386_v27 = vsel %vm1337_vm3, 0.0, %v1385_v14 }
 0x300   : > { %v1408_v19 = vperm.slane %v1404_v8, %v3934_v45  ;;  %v1409_v20 = vrot.slane %v1392_v26, 4  ;;  %v1719_v26 = vld [vmem:[#allocation2 + $0x28] sm:$0xff] }
 0x301   : > { %v1388_v21 = vsel %vm1337_vm3, 0.0, %v1387_v17  ;;  %v1393_v22 = vsel %vm1337_vm3, %v1387_v17, %v1368_v6 }
 0x302   : > { %v1410_v12 = vsel %vm1337_vm3, %v1409_v20, %v1390_v28  ;;  %v1397_v23 = vperm.slane %v1393_v22, %v3934_v45  ;;  %v1398_v46 = vrot.slane %v1388_v21, 4  ;;  %v1429_v24 = vrot.slane %v1408_v19, 4 }
 0x303   : > { %v1414_v15 = vperm.slane %v1410_v12, %v3934_v45  ;;  %v1720_v12 = vld [vmem:[#allocation2 + $0x38] sm:$0xff] }
 0x304   : > { %v1399_v29 = vsel %vm1337_vm3, %v1398_v46, %v1386_v27  ;;  %v1417_v30 = vrot.slane %v1397_v23, 4 }
 0x305   : > { %v1403_v44 = vperm.slane %v1399_v29, %v3934_v45  ;;  %v1430_v11 = vsel %vm1337_vm3, %v1414_v15, %v1429_v24  ;;  %v1427_v33 = vrot.slane %v1414_v15, 4 }
 0x306   : > { %v1438_v7 = vperm.slane %v1430_v11, %v3942_v58 }
 0x307   : > { %v1418_v34 = vsel %vm1337_vm3, %v1403_v44, %v1417_v30  ;;  %v1415_v25 = vrot.slane %v1403_v44, 4  ;;  %v1428_v35 = vsel %vm1337_vm3, %v1427_v33, %v1408_v19  ;;  %v1722_v30 = vld [vmem:[#allocation3 + $0x18] sm:$0xff] }
 0x308   : > { %v1426_v32 = vperm.slane %v1418_v34, %v3942_v58  ;;  %v1443_v36 = vrot.slane %v1438_v7, 4  ;;  %v1434_v38 = vperm.slane %v1428_v35, %v3942_v58 }
 0x309   : > { %v1416_v39 = vsel %vm1337_vm3, %v1415_v25, %v1397_v23 }
 0x30a   : > { %v3976_v40 = vsel %vm1337_vm3, %v1443_v36, %v1426_v32  ;;  %v1422_v37 = vperm.slane %v1416_v39, %v3942_v58  ;;  %v1439_v41 = vrot.slane %v1434_v38, 4  ;;  %v1445_v47 = vrot.slane %v1426_v32, 4 }
 0x30b   : > { %2645 = vmatmul.msk.f32.vlgmr.msra.gmra.mxu3 %vm1455_vm2, %v3976_v40 }
 0x30c   : > { %v3982_v42 = vsel %vm1337_vm3, %v1439_v41, %v1422_v37  ;;  %v1441_v43 = vrot.slane %v1422_v37, 4  ;;  %v3989_v48 = vsel %vm1337_vm3, %v1438_v7, %v1445_v47  ;;  %1662 = vmatpush.msra.mxu3 %v1452_v0 }
 0x30d   : > { %2641 = vmatmul.msk.f32.vlgmr.msra.gmra.mxu2 %vm1455_vm2, %v3982_v42 }
 0x30e   : > { %v1442_v18 = vsel %vm1337_vm3, %v1434_v38, %v1441_v43  ;;  %1639 = vmatpush.msra.mxu2 %v1451_v63 }
 0x30f   : > { %2655 = vmatmul.msk.f32.vlgmr.msra.gmra.mxu1 %vm1455_vm2, %v1442_v18 }
 0x313   : > { %2647 = vmatmul.msk.f32.vlgmr.msrb.gmra.mxu3 %vm1455_vm2, %v3989_v48 }
 0x314   : > { %2652 = vmatpush.xpose.msk.msrb.mxu3 %vm1455_vm2, %v1717_v2 }
 0x315   : > { %2643 = vmatmul.msk.f32.vlgmr.msrb.gmra.mxu2 %vm1455_vm2, %v1442_v18 }
 0x316   : > { %1708 = vmatpush.msrb.mxu2 %v1454_v1 }
 0x38c   : > { %v1768_v61 = vpop.f32.mrf.mxu1 }
 0x38d   : > { %v1820_v50 = vsel %vm1560_vm4, %v1768_v61, -inf }
 0x38e   : > { %v1531_v49 = vpop.f32.mrf.mxu3 }
 0x38f   : > { %v1567_v52 = vsel %vm1560_vm4, %v1531_v49, -inf }
 0x390   : > { %1568 = vmax.xlane.f32.xlu0 %v1567_v52  ;;  %v1479_v53 = vpop.f32.mrf.mxu2 }
 0x391   : > { %v1561_v55 = vsel %vm1560_vm4, %v1479_v53, -inf }
 0x392   : > { %1562 = vmax.xlane.f32.xlu1 %v1561_v55 }
 0x396   : > { %v1557_v59 = vpop.f32.mrf.mxu3 }
 0x397   : > { %v1570_v60 = vsel %vm1560_vm4, %v1557_v59, -inf }
 0x398   : > { %v1505_v56 = vpop.f32.mrf.mxu2 }
 0x399   : > { %v1564_v51 = vsel %vm1560_vm4, %v1505_v56, -inf }
 0x39a   : > { %1565 = vmax.xlane.f32.xlu2 %v1564_v51 }
 0x3a2   : > { %1571 = vmax.xlane.f32.xlu2 %v1570_v60  ;;  %v1723_v60 = vld [vmem:[#allocation3 + $0x28] sm:$0xff] }
 0x3aa   : > { %1821 = vmax.xlane.f32.xlu2 %v1820_v50  ;;  %v1724_v50 = vld [vmem:[#allocation3 + $0x38] sm:$0xff] }
 0x3ab   : > { %1968 = vmatpush.msra.mxu0 %v1724_v50 }
 0x403   : > { %v1569_v16 = vpop.xlane.xlu0 %1568 }
 0x404   : > { %v4000_v3 = vmax.f32 %v1569_v16, -1e+30 }
 0x405   : > { %v1563_v4 = vpop.xlane.xlu1 %1562 }
 0x406   : > { %v1591_v5 = vsub.f32 %v1531_v49, %v4000_v3  ;;  %v4003_v6 = vmax.f32 %v1563_v4, -1e+30 }
 0x408   : > { %v1597_v54 = vmul.f32 1.442695, %v1591_v5  ;;  %v1589_v9 = vsub.f32 %v1479_v53, %v4003_v6  ;;  %v1577_v63 = vsub.f32 -1e+30, %v4003_v6 }
 0x40a   : > { %2892 = vpow2.f32 %v1597_v54  ;;  %v1593_v10 = vmul.f32 1.442695, %v1589_v9  ;;  %v1581_v2 = vmul.f32 1.442695, %v1577_v63 }
 0x40c   : > { %2894 = vpow2.f32 %v1593_v10 }
 0x40d   : > { %v1566_v57 = vpop.xlane.xlu2 %1565 }
 0x40e   : > { %v1574_v13 = vmax.f32 %v1566_v57, -1e+30 }
 0x410   : > { %v2893_v14 = vpop.eup %2892  ;;  %v1590_v17 = vsub.f32 %v1505_v56, %v1574_v13  ;;  %v1578_v34 = vsub.f32 -1e+30, %v1574_v13 }
 0x411   : > { %2650 = vmatmul.msk.f32.vlgmr.msrb.gmra.mxu0 %vm1560_vm4, %v2893_v14  ;;  %v1611_v51 = vsel %vm1560_vm4, %v2893_v14, 0.0 }
 0x412   : > { %v2895_v8 = vpop.eup %2894  ;;  %v1595_v19 = vmul.f32 1.442695, %v1590_v17  ;;  %v1583_v25 = vmul.f32 1.442695, %v1578_v34 }
 0x413   : > { %2648 = vmatmul.msk.f32.vlgmr.msra.gmra.mxu2 %vm1560_vm4, %v2895_v8  ;;  %v1605_v20 = vsel %vm1560_vm4, %v2895_v8, 0.0 }
 0x414   : > { %2896 = vpow2.f32 %v1595_v19  ;;  %1606 = vadd.xlane.f32.xlu1 %v1605_v20  ;;  %2656 = vmatpush.xpose.msk.msra.mxu2 %vm1455_vm2, %v1719_v26 }
 0x415   : > { %v1572_v21 = vpop.xlane.xlu2 %1571 }
 0x416   : > { %v4010_v28 = vmax.f32 %v1572_v21, -1e+30 }
 0x418   : > { %v1592_v22 = vsub.f32 %v1557_v59, %v4010_v28  ;;  %v1580_v5 = vsub.f32 -1e+30, %v4010_v28 }
 0x41a   : > { %v2897_v23 = vpop.eup %2896  ;;  %v1599_v46 = vmul.f32 1.442695, %v1592_v22  ;;  %v1587_v57 = vmul.f32 1.442695, %v1580_v5 }
 0x41b   : > { %2649 = vmatmul.msk.f32.vlgmr.msra.gmra.mxu3 %vm1560_vm4, %v2897_v23  ;;  %v1608_v24 = vsel %vm1560_vm4, %v2897_v23, 0.0 }
 0x41c   : > { %2898 = vpow2.f32 %v1599_v46  ;;  %1609 = vadd.xlane.f32.xlu0 %v1608_v24  ;;  %2658 = vmatpush.xpose.msk.msra.mxu3 %vm1455_vm2, %v1720_v12 }
 0x41d   : > { %v1822_v27 = vpop.xlane.xlu2 %1821 }
 0x41e   : > { %v1830_v15 = vmax.f32 %v1574_v13, %v1822_v27 }
 0x420   : > { %v1834_v29 = vsub.f32 %v1574_v13, %v1830_v15  ;;  %v1846_v11 = vsub.f32 %v1768_v61, %v1830_v15  ;;  %v1721_v61 = vld [vmem:[#allocation3 + $0x8] sm:$0xff] }
 0x421   : > { %1899 = vmatpush.msrb.mxu1 %v1721_v61 }
 0x422   : > { %v2899_v44 = vpop.eup %2898  ;;  %v1851_v33 = vmul.f32 1.442695, %v1846_v11  ;;  %v1839_v35 = vmul.f32 1.442695, %v1834_v29 }
 0x423   : > { %2651 = vmatmul.msk.f32.vlgmr.msrb.gmra.mxu2 %vm1560_vm4, %v2899_v44  ;;  %2653 = vmatmul.msk.f32.vlgmr.msrb.gmra.mxu3 %vm1455_vm2, %v3982_v42  ;;  %v1614_v59 = vsel %vm1560_vm4, %v2899_v44, 0.0 }
 0x424   : > { %1922 = vmatpush.msrb.mxu2 %v1722_v30  ;;  %2900 = vpow2.f32 %v1851_v33  ;;  %1945 = vmatpush.msrb.mxu3 %v1723_v60 }
 0x425   : > { %2902 = vpow2.f32 %v1583_v25 }
 0x426   : > { %2904 = vpow2.f32 %v1839_v35 }
 0x42a   : > { %v4023_v7 = vpop.eup %2900 }
 0x42b   : > { %2657 = vmatmul.msk.f32.vlgmr.msra.gmra.mxu2 %vm1455_vm2, %v3976_v40  ;;  %2659 = vmatmul.msk.f32.vlgmr.msra.gmra.mxu3 %vm1455_vm2, %v3989_v48  ;;  %v2903_v32 = vpop.eup %2902  ;;  %v1864_v30 = vsel %vm1560_vm4, %v4023_v7, 0.0 }
 0x42c   : > { %v1602_v36 = vmul.f32 0.0, %v2903_v32  ;;  %v2905_v37 = vpop.eup %2904  ;;  %v1579_v32 = vsub.f32 -1e+30, %v4000_v3 }
 0x433   : > { %2661 = vmatmul.msk.f32.vlgmr.msrb.gmra.mxu2 %vm1560_vm4, %v4023_v7  ;;  %v1585_v7 = vmul.f32 1.442695, %v1579_v32 }
 0x48f   : > { %v1610_v38 = vpop.xlane.xlu0 %1609 }
 0x490   : > { %v1618_v39 = vadd.f32 %v1610_v38, %v1602_v36 }
 0x492   : > { %v4027_v40 = vmul.f32 %v2905_v37, %v1618_v39 }
 0x496   : > { %v1641_v41 = vpop.f32.mrf.mxu2 }
 0x49e   : > { %v1664_v42 = vpop.f32.mrf.mxu3 }
 0x49f   : > { %v1714_v43 = vadd.f32 %v1664_v42, %v1602_v36 }
 0x4a1   : > { %v4029_v18 = vmul.f32 %v2905_v37, %v1714_v43 }
 0x4a6   : > { %v4031_v47 = vpop.f32.mrf.mxu2  ;;  %v1745_v52 = vpop.f32.mrf.mxu3 }
 0x4a7   : > { %v1817_v53 = vsel %vm1560_vm4, %v1745_v52, -inf }
 0x4ae   : > { %v1791_v48 = vpop.f32.mrf.mxu2  ;;  %v1814_v55 = vpop.f32.mrf.mxu3 }
 0x4af   : > { %v1823_v49 = vsel %vm1560_vm4, %v1791_v48, -inf  ;;  %v1826_v56 = vsel %vm1560_vm4, %v1814_v55, -inf }
 0x4b0   : > { %1824 = vmax.xlane.f32.xlu2 %v1823_v49 }
 0x4b8   : > { %1818 = vmax.xlane.f32.xlu2 %v1817_v53 }
 0x4c0   : > { %1827 = vmax.xlane.f32.xlu2 %v1826_v56 }
 0x4c8   : > { %1612 = vadd.xlane.f32.xlu2 %v1611_v51 }
 0x4d0   : > { %1615 = vadd.xlane.f32.xlu2 %v1614_v59 }
 0x523   : > { %v1825_v62 = vpop.xlane.xlu2 %1824 }
 0x524   : > { %v1831_v0 = vmax.f32 %v4000_v3, %v1825_v62 }
 0x526   : > { %v1847_v1 = vsub.f32 %v1791_v48, %v1831_v0  ;;  %v1835_v36 = vsub.f32 %v4000_v3, %v1831_v0 }
 0x528   : > { %v1853_v16 = vmul.f32 1.442695, %v1847_v1  ;;  %v1841_v38 = vmul.f32 1.442695, %v1835_v36  ;;  %v1687_v1 = vpop.f32.mrf.mxu0 }
 0x52a   : > { %2906 = vpow2.f32 %v1853_v16 }
 0x52b   : > { %v1819_v4 = vpop.xlane.xlu2 %1818  ;;  %2908 = vpow2.f32 %v1581_v2 }
 0x52c   : > { %v1829_v54 = vmax.f32 %v4003_v6, %v1819_v4 }
 0x52e   : > { %v1833_v9 = vsub.f32 %v4003_v6, %v1829_v54  ;;  %v1845_v10 = vsub.f32 %v1745_v52, %v1829_v54 }
 0x530   : > { %v1837_v13 = vmul.f32 1.442695, %v1833_v9  ;;  %v1849_v14 = vmul.f32 1.442695, %v1845_v10  ;;  %v2907_v17 = vpop.eup %2906 }
 0x531   : > { %v2909_v26 = vpop.eup %2908  ;;  %2662 = vmatmul.msk.f32.vlgmr.msrb.gmra.mxu3 %vm1560_vm4, %v2907_v17  ;;  %v1867_v8 = vsel %vm1560_vm4, %v2907_v17, 0.0 }
 0x532   : > { %2910 = vpow2.f32 %v1837_v13  ;;  %1868 = vadd.xlane.f32.xlu1 %v1867_v8  ;;  %v1601_v21 = vmul.f32 0.0, %v2909_v26 }
 0x533   : > { %2912 = vpow2.f32 %v1849_v14  ;;  %v1828_v19 = vpop.xlane.xlu2 %1827 }
 0x534   : > { %2914 = vpow2.f32 %v1587_v57  ;;  %v1832_v20 = vmax.f32 %v4010_v28, %v1828_v19  ;;  %v1713_v12 = vadd.f32 %v1641_v41, %v1601_v21  ;;  %v1607_v41 = vpop.xlane.xlu1 %1606 }
 0x536   : > { %v1836_v6 = vsub.f32 %v4010_v28, %v1832_v20  ;;  %v1848_v22 = vsub.f32 %v1814_v55, %v1832_v20  ;;  %v1617_v55 = vadd.f32 %v1607_v41, %v1601_v21 }
 0x538   : > { %v2911_v23 = vpop.eup %2910  ;;  %v1843_v46 = vmul.f32 1.442695, %v1836_v6  ;;  %v1855_v24 = vmul.f32 1.442695, %v1848_v22  ;;  %v1924_v6 = vpop.f32.mrf.mxu2 }
 0x539   : > { %v2913_v27 = vpop.eup %2912  ;;  %v4047_v15 = vmul.f32 %v2911_v23, %v1713_v12  ;;  %v1857_v56 = vmul.f32 %v2911_v23, %v1617_v55 }
 0x53a   : > { %v2915_v29 = vpop.eup %2914  ;;  %2916 = vpow2.f32 %v1843_v46  ;;  %2660 = vmatmul.msk.f32.vlgmr.msrb.gmra.mxu1 %vm1560_vm4, %v2913_v27  ;;  %v1861_v44 = vsel %vm1560_vm4, %v2913_v27, 0.0  ;;  %1865 = vadd.xlane.f32.xlu1 %v1864_v30 }
 0x53b   : > { %2918 = vpow2.f32 %v1855_v24  ;;  %1862 = vadd.xlane.f32.xlu2 %v1861_v44  ;;  %v1604_v28 = vmul.f32 0.0, %v2915_v29  ;;  %v1613_v37 = vpop.xlane.xlu2 %1612 }
 0x53c   : > { %2920 = vpow2.f32 %v1585_v7 }
 0x53d   : > { %v1716_v11 = vadd.f32 %v4031_v47, %v1604_v28  ;;  %2922 = vpow2.f32 %v1841_v38 }
 0x540   : > { %v2917_v33 = vpop.eup %2916 }
 0x541   : > { %v2919_v34 = vpop.eup %2918  ;;  %v4054_v25 = vmul.f32 %v2917_v33, %v1716_v11 }
 0x542   : > { %2663 = vmatmul.msk.f32.vlgmr.msra.gmra.mxu0 %vm1560_vm4, %v2919_v34  ;;  %v1870_v35 = vsel %vm1560_vm4, %v2919_v34, 0.0  ;;  %v2921_v39 = vpop.eup %2920 }
 0x543   : > { %1871 = vadd.xlane.f32.xlu0 %v1870_v35  ;;  %v1603_v42 = vmul.f32 0.0, %v2921_v39  ;;  %v2923_v47 = vpop.eup %2922  ;;  %v1616_v49 = vpop.xlane.xlu2 %1615 }
 0x544   : > { %v1620_v62 = vadd.f32 %v1616_v49, %v1604_v28  ;;  %v1974_v28 = vadd.f32 %v1924_v6, %v4029_v18 }
 0x545   : > { %v1619_v43 = vadd.f32 %v1613_v37, %v1603_v42 }
 0x546   : > { %v1860_v2 = vmul.f32 %v2917_v33, %v1620_v62 }
 0x547   : > { %v1859_v48 = vmul.f32 %v2923_v47, %v1619_v43 }
 0x5a5   : > { %v1869_v52 = vpop.xlane.xlu1 %1868 }
 0x5a6   : > { %v1875_v53 = vadd.f32 %v1869_v52, %v1859_v48 }
 0x5a8   : > { %2924 = vrcp.f32 %v1875_v53  ;;  %v2018_v4 = vand.u32 2147483648, %v1875_v53  ;;  %vm2012_vm6 = vweird.f32 %v1875_v53  ;;  %v2016_v9 = vand.u32 2147483647, %v1875_v53 }
 0x5aa   : > { %v2019_v21 = vor.u32 1.1754944e-38, %v2018_v4  ;;  %vm2017_vm8 = vcmp.eq.f32.partialorder %v2016_v9, 8.507059e+37 }
 0x5ad   : > { %v1866_v51 = vpop.xlane.xlu1 %1865 }
 0x5ae   : > { %v1863_v59 = vpop.xlane.xlu2 %1862  ;;  %v2925_v60 = vpop.eup %2924  ;;  %v1874_v3 = vadd.f32 %v1866_v51, %v4027_v40  ;;  %v1715_v40 = vadd.f32 %v1687_v1, %v1603_v42  ;;  %v2178_v51 = vld [vmem:[#allocation13 + $0x70] sm:$0xff]  ;;  %v2176_v1 = vld [vmem:[#allocation13 + $0x60] sm:$0xff] }
 0x5af   : > { %v1873_v61 = vadd.f32 %v1863_v59, %v1857_v56  ;;  %v2008_v50 = vmul.f32 %v2925_v60, %v1875_v53  ;;  %vm2013_vm5 = vweird.f32 %v2925_v60  ;;  %v2179_v56 = vld [vmem:[#allocation13 + $0x78] sm:$0xff] }
 0x5b0   : > { %2926 = vrcp.f32 %v1874_v3  ;;  %vm4063_vm7 = vmor %vm2012_vm6, %vm2013_vm5  ;;  %v1879_v19 = vmul.f32 %v2923_v47, %v1715_v40  ;;  %v2001_v22 = vand.u32 2147483647, %v1874_v3  ;;  %v2003_v12 = vand.u32 2147483648, %v1874_v3  ;;  %2184 = vmatpush.msra.mxu1 %v2179_v56 }
 0x5b1   : > { %v2009_v63 = vsub.f32 1.0, %v2008_v50  ;;  %2928 = vrcp.f32 %v1873_v61  ;;  %v1988_v27 = vand.u32 2147483648, %v1873_v61  ;;  %v1986_v44 = vand.u32 2147483647, %v1873_v61 }
 0x5b2   : > { %vm1997_vm11 = vweird.f32 %v1874_v3  ;;  %v2004_v35 = vor.u32 1.1754944e-38, %v2003_v12  ;;  %vm1982_vm13 = vweird.f32 %v1873_v61  ;;  %vm2002_vm14 = vcmp.eq.f32.partialorder %v2001_v22, 8.507059e+37  ;;  %2185 = vmatpush.msra.mxu1 %v2178_v51 }
 0x5b3   : > { %v2010_v0 = vmul.f32 %v2925_v60, %v2009_v63  ;;  %v1989_v39 = vor.u32 1.1754944e-38, %v1988_v27  ;;  %vm1987_vm0 = vcmp.eq.f32.partialorder %v1986_v44, 8.507059e+37 }
 0x5b4   : > { %v1947_v20 = vpop.f32.mrf.mxu3 }
 0x5b5   : > { %v2011_v16 = vadd.f32 %v2925_v60, %v2010_v0  ;;  %v1975_v29 = vadd.f32 %v1947_v20, %v1879_v19 }
 0x5b6   : > { %v1872_v5 = vpop.xlane.xlu0 %1871  ;;  %v2927_v54 = vpop.eup %2926 }
 0x5b7   : > { %v4061_v10 = vadd.f32 %v1872_v5, %v1860_v2  ;;  %v2929_v57 = vpop.eup %2928  ;;  %v1993_v13 = vmul.f32 %v2927_v54, %v1874_v3  ;;  %v2015_v26 = vsel %vm4063_vm7, %v2925_v60, %v2011_v16  ;;  %vm1998_vm9 = vweird.f32 %v2927_v54  ;;  %v1901_v33 = vpop.f32.mrf.mxu1 }
 0x5b8   : > { %v1978_v17 = vmul.f32 %v2929_v57, %v1873_v61  ;;  %v2020_v24 = vsel %vm2017_vm8, %v2019_v21, %v2015_v26  ;;  %vm1983_vm10 = vweird.f32 %v2929_v57  ;;  %vm1999_vm12 = vmor %vm1997_vm11, %vm1998_vm9  ;;  %v1973_v37 = vadd.f32 %v1901_v33, %v4047_v15  ;;  %v2177_v61 = vld [vmem:[#allocation13 + $0x68] sm:$0xff] }
 0x5b9   : > { %2930 = vrcp.f32 %v4061_v10  ;;  %v1994_v8 = vsub.f32 1.0, %v1993_v13  ;;  %v2021_v32 = vmul.f32 %v2020_v24, %v1975_v29  ;;  %vm1984_vm15 = vmor %vm1982_vm13, %vm1983_vm10  ;;  %v2033_v52 = vand.u32 2147483648, %v4061_v10  ;;  %2186 = vmatpush.msra.mxu1 %v2177_v61 }
 0x5ba   : > { %v1979_v23 = vsub.f32 1.0, %v1978_v17  ;;  %v2031_v55 = vand.u32 2147483647, %v4061_v10  ;;  %vm2027_vm4 = vweird.f32 %v4061_v10  ;;  %vm2162_vm7 = vcmask 785408  }
 0x5bb   : > { %v1995_v46 = vmul.f32 %v2927_v54, %v1994_v8  ;;  %v2037_v48 = vrot.slane %v2021_v32, 4  ;;  %v2034_v62 = vor.u32 1.1754944e-38, %v2033_v52  ;;  %2187 = vmatpush.msra.mxu1 %v2176_v1  ;;  %v2174_v1 = vld [vmem:[#allocation13 + $0x50] sm:$0xff] }
 0x5bc   : > { %v1980_v30 = vmul.f32 %v2929_v57, %v1979_v23  ;;  %vm2032_vm6 = vcmp.eq.f32.partialorder %v2031_v55, 8.507059e+37 }
 0x5bd   : > { %v1996_v11 = vadd.f32 %v2927_v54, %v1995_v46 }
 0x5be   : > { %v1981_v7 = vadd.f32 %v2929_v57, %v1980_v30 }
 0x5bf   : > { %v2931_v34 = vpop.eup %2930  ;;  %v2000_v36 = vsel %vm1999_vm12, %v2927_v54, %v1996_v11  ;;  %v1970_v15 = vpop.f32.mrf.mxu0 }
 0x5c0   : > { %v2023_v38 = vmul.f32 %v2931_v34, %v4061_v10  ;;  %v1985_v41 = vsel %vm1984_vm15, %v2929_v57, %v1981_v7  ;;  %v2005_v18 = vsel %vm2002_vm14, %v2004_v35, %v2000_v36  ;;  %vm2028_vm1 = vweird.f32 %v2931_v34 }
 0x5c1   : > { %v1990_v43 = vsel %vm1987_vm0, %v1989_v39, %v1985_v41  ;;  %v2006_v47 = vmul.f32 %v2005_v18, %v1974_v28  ;;  %vm2029_vm5 = vmor %vm2027_vm4, %vm2028_vm1  ;;  %v1976_v63 = vadd.f32 %v1970_v15, %v4054_v25 }
 0x5c2   : > { %v2024_v42 = vsub.f32 1.0, %v2023_v38  ;;  %v1991_v49 = vmul.f32 %v1990_v43, %v1973_v37 }
 0x5c3   : > { %v2051_v5 = vrot.slane %v2006_v47, 4 }
 0x5c4   : > { %v2025_v53 = vmul.f32 %v2931_v34, %v2024_v42  ;;  %v2038_v59 = vsel %vm1337_vm3, %v2037_v48, %v1991_v49  ;;  %v2039_v60 = vrot.slane %v1991_v49, 4 }
 0x5c5   : > { %v2044_v54 = vperm.slane %v2038_v59, %v3934_v45 }
 0x5c6   : > { %v2026_v3 = vadd.f32 %v2931_v34, %v2025_v53  ;;  %v2040_v50 = vsel %vm1337_vm3, %v2021_v32, %v2039_v60 }
 0x5c7   : > { %v2048_v2 = vperm.slane %v2040_v50, %v3934_v45  ;;  %v2063_v13 = vrot.slane %v2044_v54, 4 }
 0x5c8   : > { %v2030_v0 = vsel %vm2029_vm5, %v2931_v34, %v2026_v3 }
 0x5c9   : > { %v2035_v16 = vsel %vm2032_vm6, %v2034_v62, %v2030_v0  ;;  %v2075_v57 = vrot.slane %v2048_v2, 4  ;;  %v2175_v0 = vld [vmem:[#allocation13 + $0x58] sm:$0xff] }
 0x5ca   : > { %v2036_v4 = vmul.f32 %v2035_v16, %v1976_v63  ;;  %2188 = vmatpush.msra.mxu1 %v2175_v0  ;;  %v2171_v16 = vld [vmem:[#allocation13 + $0x38] sm:$0xff]  ;;  %v2243_v0 = vld [vmem:[#allocation15 + $0x8] sm:$0xff] }
 0x5cc   : > { %v2049_v9 = vrot.slane %v2036_v4, 4  ;;  %v2052_v10 = vsel %vm1337_vm3, %v2036_v4, %v2051_v5  ;;  %2189 = vmatpush.msra.mxu1 %v2174_v1  ;;  %v2170_v4 = vld [vmem:[#allocation13 + $0x30] sm:$0xff]  ;;  %v2169_v5 = vld [vmem:[#allocation13 + $0x28] sm:$0xff]  ;;  %v2337_v1 = vld [vmem:[#allocation16 + $0x78] sm:$0xff] }
 0x5cd   : > { %v2060_v40 = vperm.slane %v2052_v10, %v3934_v45  ;;  %v2166_v10 = vld [vmem:[#allocation13 + $0x10] sm:$0xff]  ;;  %2358 = vmatpush.msrb.mxu0 %v2337_v1 }
 0x5ce   : > { %v2050_v25 = vsel %vm1337_vm3, %v2049_v9, %v2006_v47  ;;  %v2167_v9 = vld [vmem:[#allocation13 + $0x18] sm:$0xff] }
 0x5cf   : > { %v2056_v14 = vperm.slane %v2050_v25, %v3934_v45  ;;  %v2073_v17 = vrot.slane %v2060_v40, 4  ;;  %v2076_v26 = vsel %vm1337_vm3, %v2060_v40, %v2075_v57  ;;  %v2165_v57 = vld [vmem:[#allocation13 + $0x8] sm:$0xff]  ;;  %v2164_v40 = vld [vmem:[#allocation13] sm:$0xff] }
 0x5d0   : > { %v2084_v8 = vperm.slane %v2076_v26, %v3942_v58 }
 0x5d1   : > { %v2061_v19 = vrot.slane %v2056_v14, 4  ;;  %v2064_v20 = vsel %vm1337_vm3, %v2056_v14, %v2063_v13  ;;  %v2074_v21 = vsel %vm1337_vm3, %v2073_v17, %v2048_v2  ;;  %v2172_v2 = vld [vmem:[#allocation13 + $0x40] sm:$0xff] }
 0x5d2   : > { %v2072_v6 = vperm.slane %v2064_v20, %v3942_v58  ;;  %v2080_v22 = vperm.slane %v2074_v21, %v3942_v58  ;;  %v2091_v12 = vrot.slane %v2084_v8, 4 }
 0x5d3   : > { %v2062_v23 = vsel %vm1337_vm3, %v2061_v19, %v2044_v54  ;;  %v2168_v54 = vld [vmem:[#allocation13 + $0x20] sm:$0xff]  ;;  %v2886_v19 = vld [vmem:[%s4286_s18] ss:$0 sm:$0xff] }
 0x5d4   : > { %v2068_v46 = vperm.slane %v2062_v23, %v3942_v58  ;;  %v2087_v24 = vrot.slane %v2072_v6, 4  ;;  %v2089_v27 = vrot.slane %v2080_v22, 4  ;;  %v2092_v29 = vsel %vm1337_vm3, 0.0, %v2091_v12  ;;  %v2273_v23 = vld [vmem:[#allocation15 + $0xf8] sm:$0xff] }
 0x5d5   : > { %v2109_v30 = vrot.slane %v2092_v29, 4  ;;  %v2104_v44 = vsel %vm1337_vm3, %v2091_v12, %v2080_v22  ;;  %v3342_v22 = vmov 128.0   ;;  %v2272_v12 = vld [vmem:[#allocation15 + $0xf0] sm:$0xff]  ;;  %2300 = vmatpush.msra.mxu3 %v2273_v23 }
 0x5d6   : > { %v2085_v28 = vrot.slane %v2068_v46, 4  ;;  %v2088_v11 = vsel %vm1337_vm3, 0.0, %v2087_v24  ;;  %v2090_v33 = vsel %vm1337_vm3, 0.0, %v2089_v27  ;;  %v2093_v34 = vsel %vm1337_vm3, %v2087_v24, %v2068_v46  ;;  %v2270_v46 = vld [vmem:[#allocation15 + $0xe0] sm:$0xff]  ;;  %2280 = vmatpush.msra.mxu2 %v2272_v12  ;;  %v2271_v24 = vld [vmem:[#allocation15 + $0xe8] sm:$0xff]  ;;  %v2345_v12 = vld [vmem:[#allocation16 + $0xb8] sm:$0xff] }
 0x5d7   : > { %v2097_v35 = vperm.slane %v2093_v34, %v3934_v45  ;;  %v2098_v32 = vrot.slane %v2088_v11, 4  ;;  %v2108_v7 = vperm.slane %v2104_v44, %v3934_v45  ;;  %v2110_v36 = vsel %vm1337_vm3, %v2109_v30, %v2090_v33  ;;  %2301 = vmatpush.msra.mxu3 %v2271_v24  ;;  %v2344_v24 = vld [vmem:[#allocation16 + $0xb0] sm:$0xff] }
 0x5d8   : > { %v2086_v38 = vsel %vm1337_vm3, 0.0, %v2085_v28  ;;  %v2114_v39 = vperm.slane %v2110_v36, %v3934_v45  ;;  %2932 = vrcp.f32 %v3342_v22  ;;  %2281 = vmatpush.msra.mxu2 %v2270_v46  ;;  %v2266_v36 = vld [vmem:[#allocation15 + $0xc0] sm:$0xff]  ;;  %v2329_v22 = vld [vmem:[#allocation16 + $0x38] sm:$0xff]  ;;  %v2328_v46 = vld [vmem:[#allocation16 + $0x30] sm:$0xff] }
 0x5d9   : > { %v2099_v37 = vsel %vm1337_vm3, %v2098_v32, %v2086_v38  ;;  %v2117_v41 = vrot.slane %v2097_v35, 4  ;;  %v2129_v18 = vrot.slane %v2108_v7, 4  ;;  %v2268_v32 = vld [vmem:[#allocation15 + $0xd0] sm:$0xff]  ;;  %v2267_v38 = vld [vmem:[#allocation15 + $0xc8] sm:$0xff] }
 0x5da   : > { %v2103_v42 = vperm.slane %v2099_v37, %v3934_v45  ;;  %v2127_v43 = vrot.slane %v2114_v39, 4  ;;  %2282 = vmatpush.msra.mxu2 %v2268_v32  ;;  %v2265_v37 = vld [vmem:[#allocation15 + $0xb8] sm:$0xff] }
 0x5db   : > { %v2130_v47 = vsel %vm1337_vm3, %v2114_v39, %v2129_v18  ;;  %v2264_v39 = vld [vmem:[#allocation15 + $0xb0] sm:$0xff]  ;;  %v2263_v18 = vld [vmem:[#allocation15 + $0xa8] sm:$0xff]  ;;  %v2341_v32 = vld [vmem:[#allocation16 + $0x98] sm:$0xff] }
 0x5dc   : > { %v2118_v48 = vsel %vm1337_vm3, %v2103_v42, %v2117_v41  ;;  %v2138_v49 = vperm.slane %v2130_v47, %v3942_v58  ;;  %v2115_v52 = vrot.slane %v2103_v42, 4  ;;  %v2128_v53 = vsel %vm1337_vm3, %v2127_v43, %v2108_v7  ;;  %v2269_v7 = vld [vmem:[#allocation15 + $0xd8] sm:$0xff]  ;;  %2283 = vmatpush.msra.mxu2 %v2266_v36  ;;  %v2262_v41 = vld [vmem:[#allocation15 + $0xa0] sm:$0xff]  ;;  %v2260_v42 = vld [vmem:[#allocation15 + $0x90] sm:$0xff] }
 0x5dd   : > { %v2126_v55 = vperm.slane %v2118_v48, %v3942_v58  ;;  %v2134_v56 = vperm.slane %v2128_v53, %v3942_v58  ;;  %2302 = vmatpush.msra.mxu3 %v2269_v7  ;;  %v2261_v43 = vld [vmem:[#allocation15 + $0x98] sm:$0xff]  ;;  %v2258_v47 = vld [vmem:[#allocation15 + $0x80] sm:$0xff]  ;;  %v2259_v48 = vld [vmem:[#allocation15 + $0x88] sm:$0xff] }
 0x5de   : > { %v2143_v51 = vrot.slane %v2138_v49, 4  ;;  %v2116_v59 = vsel %vm1337_vm3, %v2115_v52, %v2097_v35  ;;  %v2933_v27 = vpop.eup %2932  ;;  %2284 = vmatpush.msra.mxu2 %v2264_v39  ;;  %v2257_v52 = vld [vmem:[#allocation15 + $0x78] sm:$0xff]  ;;  %v2254_v53 = vld [vmem:[#allocation15 + $0x60] sm:$0xff]  ;;  %v2887_v7 = vld [vmem:[%s4287_s29] ss:$0 sm:$0xff] }
 0x5df   : > { %v2145_v60 = vrot.slane %v2126_v55, 4  ;;  %v2122_v45 = vperm.slane %v2116_v59, %v3942_v58  ;;  %v2139_v15 = vrot.slane %v2134_v56, 4  ;;  %v2173_v58 = vld [vmem:[#allocation13 + $0x48] sm:$0xff]  ;;  %v2210_v29 = vmul.f32 128.0, %v2933_v27  ;;  %2303 = vmatpush.msra.mxu3 %v2267_v38  ;;  %v2250_v59 = vld [vmem:[#allocation15 + $0x40] sm:$0xff] }
 0x5e0   : > { %v2144_v3 = vsel %vm1337_vm3, %v2143_v51, %v2126_v55  ;;  %2190 = vmatpush.msra.mxu1 %v2173_v58  ;;  %2285 = vmatpush.msra.mxu2 %v2262_v41  ;;  %v2255_v55 = vld [vmem:[#allocation15 + $0x68] sm:$0xff]  ;;  %v2253_v51 = vld [vmem:[#allocation15 + $0x58] sm:$0xff] }
 0x5e1   : > { %2152 = vrot.lane.b32.xlu0 %v2144_v3, %s3339_s9  ;;  %v2146_v61 = vsel %vm1337_vm3, %v2138_v49, %v2145_v60  ;;  %v2141_v50 = vrot.slane %v2122_v45, 4  ;;  %v2140_v62 = vsel %vm1337_vm3, %v2139_v15, %v2122_v45  ;;  %v2211_v30 = vsub.f32 1.0, %v2210_v29  ;;  %2304 = vmatpush.msra.mxu3 %v2265_v37  ;;  %v2256_v49 = vld [vmem:[#allocation15 + $0x70] sm:$0xff]  ;;  %v2251_v60 = vld [vmem:[#allocation15 + $0x48] sm:$0xff]  ;;  %v2249_v15 = vld [vmem:[#allocation15 + $0x38] sm:$0xff] }
 0x5e2   : > { %2156 = vrot.lane.b32.xlu1 %v2146_v61, %s3338_s16  ;;  %2191 = vmatpush.msra.mxu1 %v2172_v2  ;;  %v2248_v45 = vld [vmem:[#allocation15 + $0x30] sm:$0xff]  ;;  %v2246_v3 = vld [vmem:[#allocation15 + $0x20] sm:$0xff]  ;;  %v2247_v61 = vld [vmem:[#allocation15 + $0x28] sm:$0xff]  ;;  %s2665_s16 = sshll.u32 %s4291_s10, 1 }
 0x5e3   : > { %v2142_v63 = vsel %vm1337_vm3, %v2134_v56, %v2141_v50  ;;  %vm2160_vm3 = vcmask 523264   ;;  %v2212_v44 = vmul.f32 %v2933_v27, %v2211_v30  ;;  %2305 = vmatpush.msra.mxu3 %v2263_v18  ;;  %2286 = vmatpush.msra.mxu2 %v2260_v42  ;;  %v2252_v56 = vld [vmem:[#allocation15 + $0x50] sm:$0xff]  ;;  %v2353_v58 = vld [vmem:[#allocation16 + $0xf8] sm:$0xff]  ;;  %v2327_v29 = vld [vmem:[#allocation16 + $0x28] sm:$0xff] }
 0x5e4   : > { %2148 = vrot.lane.b32.xlu2 %v2142_v63, %s3337_s27  ;;  %2192 = vmatpush.msra.mxu1 %v2171_v16  ;;  %v2244_v50 = vld [vmem:[#allocation15 + $0x10] sm:$0xff]  ;;  %v2242_v63 = vld [vmem:[#allocation15] sm:$0xff]  ;;  %v2343_v30 = vld [vmem:[#allocation16 + $0xa8] sm:$0xff]  ;;  %s4292_s27 = sld [smem:[#allocation27_spill]] }
 0x5e5   : > { %v2213_v28 = vadd.f32 %v2933_v27, %v2212_v44  ;;  %2306 = vmatpush.msra.mxu3 %v2261_v43  ;;  %2287 = vmatpush.msra.mxu2 %v2258_v47  ;;  %v2336_v2 = vld [vmem:[#allocation16 + $0x70] sm:$0xff]  ;;  %v2888_v39 = vld [vmem:[%s4288_s15] ss:$0 sm:$0xff] }
 0x5e6   : > { %2193 = vmatpush.msra.mxu1 %v2170_v4  ;;  %v2352_v16 = vld [vmem:[#allocation16 + $0xf0] sm:$0xff]  ;;  %2359 = vmatpush.msrb.mxu0 %v2336_v2  ;;  %v2323_v43 = vld [vmem:[#allocation16 + $0x8] sm:$0xff] }
 0x5e7   : > { %2307 = vmatpush.msra.mxu3 %v2259_v48  ;;  %2288 = vmatpush.msra.mxu2 %v2256_v49  ;;  %v2324_v18 = vld [vmem:[#allocation16 + $0x10] sm:$0xff]  ;;  %v2339_v47 = vld [vmem:[#allocation16 + $0x88] sm:$0xff]  ;;  %v2322_v48 = vld [vmem:[#allocation16] sm:$0xff] }
 0x5e8   : > { %2194 = vmatpush.msra.mxu1 %v2169_v5  ;;  %v2335_v5 = vld [vmem:[#allocation16 + $0x68] sm:$0xff]  ;;  %v2340_v42 = vld [vmem:[#allocation16 + $0x90] sm:$0xff] }
 0x5e9   : > { %2308 = vmatpush.msra.mxu3 %v2257_v52  ;;  %2289 = vmatpush.msra.mxu2 %v2254_v53  ;;  %v2274_v49 = vld [vmem:[%s4289_s12] sm:$0x3]  ;;  %s2445_s12 = sshll.u32 %s3682_s5, 4  ;;  %s2446_s12 = int_to_ptr.vmem [resolvable:$true] %s2445_s12 }
 0x5ea   : > { %2195 = vmatpush.msra.mxu1 %v2168_v54  ;;  %v2351_v54 = vld [vmem:[#allocation16 + $0xe8] sm:$0xff]  ;;  %2360 = vmatpush.msrb.mxu0 %v2335_v5  ;;  %v2276_v52 = vperm.slane %v2274_v49, 0  ;;  %v2277_v53 = vperm.slane %v2274_v49, 1  ;;  %s2441_s9 = sadd.s32 %s4292_s27, %s2665_s16 }
 0x5eb   : > { %2309 = vmatpush.msra.mxu3 %v2255_v55  ;;  %2290 = vmatpush.msra.mxu2 %v2252_v56  ;;  %s2666_s20 = sshll.u32 %s2441_s9, 3  ;;  %s3198_s9 = scalar_lea.hbm %s4294_s13, 32 }
 0x5ec   : > { %2196 = vmatpush.msra.mxu1 %v2167_v9  ;;  %s2443_s3 = scalar_lea.hbm %s4294_s13, %s2666_s20 }
 0x5ed   : > { %2310 = vmatpush.msra.mxu3 %v2253_v51  ;;  %2291 = vmatpush.msra.mxu2 %v2250_v59  ;;  %s2447_s4 = sshll.u32 %s2443_s3, 4  ;;  %s2448_s4 = int_to_ptr.hbm [resolvable:$true] %s2447_s4 }
 0x5ee   : > { %2197 = vmatpush.msra.mxu1 %v2166_v10  ;;  %v2334_v10 = vld [vmem:[#allocation16 + $0x60] sm:$0xff] }
 0x5ef   : > { %2311 = vmatpush.msra.mxu3 %v2251_v60  ;;  %2292 = vmatpush.msra.mxu2 %v2248_v45 }
 0x5f0   : > { %2198 = vmatpush.msra.mxu1 %v2165_v57  ;;  %v2350_v57 = vld [vmem:[#allocation16 + $0xe0] sm:$0xff]  ;;  %2361 = vmatpush.msrb.mxu0 %v2334_v10 }
 0x5f1   : > { %2312 = vmatpush.msra.mxu3 %v2249_v15  ;;  %2293 = vmatpush.msra.mxu2 %v2246_v3  ;;  %v2889_v15 = vld [vmem:[%s4290_s8] ss:$0 sm:$0xff]  ;;  %s3192_s8 = sshra.s32 %s2448_s4, 4  ;;  %s3193_s8 = int_to_ptr.hbm [resolvable:$true] %s3192_s8 }
 0x5f2   : > { %2199 = vmatpush.msra.mxu1 %v2164_v40  ;;  %s3194_s10 = scalar_lea.hbm %s3193_s8, 8  ;;  %p3199_p12 = scmp.lt.s32.totalorder %s3193_s8, %s4294_s13 }
 0x5f3   : > { %2313 = vmatpush.msra.mxu3 %v2247_v61  ;;  %2294 = vmatpush.msra.mxu2 %v2244_v50  ;;  %p3195_p1 = scmp.ne.s32.totalorder %s3193_s8, %s3194_s10  ;;  %p3200_p5 = scmp.lt.s32.totalorder %s3198_s9, %s3194_s10 }
 0x5f4   : > { %2378 = vmatpush.msrb.mxu1 %v2353_v58 }
 0x5f5   : > { %2295 = vmatpush.msra.mxu2 %v2242_v63  ;;  %p3196_p7 = pnand %p3195_p1, %p3604_p13  ;;  %p3201_p6 = por %p3200_p5, %p3199_p12 }
 0x5f6   : > { %2379 = vmatpush.msrb.mxu1 %v2352_v16 }
 0x5f7   : > { %p3197_p11 = pneg %p3196_p7 }
 0x5f8   : > { %2380 = vmatpush.msrb.mxu1 %v2351_v54 }
 0x5f9   : > { %p3202_p9 = pnand %p3201_p6, %p3197_p11 }
 0x5fa   : > { %2381 = vmatpush.msrb.mxu1 %v2350_v57 }
 0x63e   : > { %v2149_v25 = vpop.permute.xlu2 %2148 }
 0x63f   : > { %v2159_v13 = vsel %vm1455_vm2, %v2140_v62, %v2149_v25  ;;  %vm2214_vm2 = vweird.f32 %v2933_v27  ;;  %v2245_v62 = vld [vmem:[#allocation15 + $0x18] sm:$0xff] }
 0x640   : > { %v4126_v11 = vsel %vm2214_vm2, %v2933_v27, %v2213_v28  ;;  %2314 = vmatpush.msra.mxu3 %v2245_v62  ;;  %v2333_v25 = vld [vmem:[#allocation16 + $0x58] sm:$0xff]  ;;  %v2326_v28 = vld [vmem:[#allocation16 + $0x20] sm:$0xff] }
 0x641   : > { %2362 = vmatpush.msrb.mxu0 %v2333_v25 }
 0x642   : > { %2315 = vmatpush.msra.mxu3 %v2243_v0 }
 0x653   : > { %v2153_v14 = vpop.permute.xlu0 %2152 }
 0x654   : > { %v2161_v17 = vsel %vm2160_vm3, %v2159_v13, %v2153_v14  ;;  %v2157_v26 = vpop.permute.xlu1 %2156  ;;  %v2349_v13 = vld [vmem:[#allocation16 + $0xd8] sm:$0xff]  ;;  %v2332_v14 = vld [vmem:[#allocation16 + $0x50] sm:$0xff] }
 0x655   : > { %v2163_v8 = vsel %vm2162_vm7, %v2161_v17, %v2157_v26  ;;  %v2348_v17 = vld [vmem:[#allocation16 + $0xd0] sm:$0xff]  ;;  %2382 = vmatpush.msrb.mxu1 %v2349_v13  ;;  %v2331_v26 = vld [vmem:[#allocation16 + $0x48] sm:$0xff]  ;;  %2363 = vmatpush.msrb.mxu0 %v2332_v14 }
 0x656   : > { %2200 = vmatmul.f32.vlgmr.msra.gmra.mxu1 %v2163_v8  ;;  %v2347_v8 = vld [vmem:[#allocation16 + $0xc8] sm:$0xff] }
 0x657   : > { %2383 = vmatpush.msrb.mxu1 %v2348_v17  ;;  %2364 = vmatpush.msrb.mxu0 %v2331_v26  ;;  %v2891_v17 = vld [vmem:[%s4295_s17] ss:$0 sm:$0xff] }
 0x659   : > { %2384 = vmatpush.msrb.mxu1 %v2347_v8 }
 0x6d3   : > { %v2201_v20 = vpop.f32.mrf.mxu1 }
 0x6d4   : > { %v2202_v21 = vadd.f32 %v2886_v19, %v2201_v20  ;;  %v2330_v19 = vld [vmem:[#allocation16 + $0x40] sm:$0xff] }
 0x6d5   : > { %v2346_v20 = vld [vmem:[#allocation16 + $0xc0] sm:$0xff]  ;;  %2365 = vmatpush.msrb.mxu0 %v2330_v19 }
 0x6d6   : > { %v2204_v6 = vadd.f32 %v2202_v21, %v3925_v31  ;;  %2385 = vmatpush.msrb.mxu1 %v2346_v20 }
 0x6d7   : > { %2366 = vmatpush.msrb.mxu0 %v2329_v22 }
 0x6d8   : > { %2207 = vadd.xlane.f32.xlu0 %v2204_v6  ;;  %2386 = vmatpush.msrb.mxu1 %v2345_v12 }
 0x6d9   : > { %2367 = vmatpush.msrb.mxu0 %v2328_v46 }
 0x6da   : > { %2387 = vmatpush.msrb.mxu1 %v2344_v24 }
 0x6db   : > { %2368 = vmatpush.msrb.mxu0 %v2327_v29 }
 0x6dc   : > { %2388 = vmatpush.msrb.mxu1 %v2343_v30 }
 0x6dd   : > { %2369 = vmatpush.msrb.mxu0 %v2326_v28 }
 0x74b   : > { %v2208_v31 = vpop.xlane.xlu0 %2207 }
 0x74c   : > { %v2216_v33 = vmul.f32 %v4126_v11, %v2208_v31  ;;  %v2342_v31 = vld [vmem:[#allocation16 + $0xa0] sm:$0xff] }
 0x74d   : > { %2389 = vmatpush.msrb.mxu1 %v2342_v31 }
 0x74e   : > { %v4129_v34 = vsub.f32 %v2204_v6, %v2216_v33 }
 0x74f   : > { %2390 = vmatpush.msrb.mxu1 %v2341_v32 }
 0x750   : > { %v2218_v35 = vmul.f32 %v4129_v34, %v4129_v34 }
 0x751   : > { %2391 = vmatpush.msrb.mxu1 %v2340_v42 }
 0x752   : > { %2219 = vadd.xlane.f32.xlu2 %v2218_v35  ;;  %v2325_v35 = vld [vmem:[#allocation16 + $0x18] sm:$0xff] }
 0x753   : > { %2370 = vmatpush.msrb.mxu0 %v2325_v35  ;;  %2392 = vmatpush.msrb.mxu1 %v2339_v47 }
 0x755   : > { %2371 = vmatpush.msrb.mxu0 %v2324_v18 }
 0x757   : > { %2372 = vmatpush.msrb.mxu0 %v2323_v43 }
 0x759   : > { %2373 = vmatpush.msrb.mxu0 %v2322_v48 }
 0x7c5   : > { %v2220_v4 = vpop.xlane.xlu2 %2219 }
 0x7c6   : > { %v2221_v9 = vmul.f32 %v2220_v4, %v4126_v11 }
 0x7c8   : > { %v2222_v40 = vadd.f32 1e-06, %v2221_v9 }
 0x7ca   : > { %2934 = vrsqrt.f32 %v2222_v40  ;;  %vm2229_vm9 = vweird.f32 %v2222_v40 }
 0x7d0   : > { %v2935_v21 = vpop.eup %2934 }
 0x7d1   : > { %v2224_v6 = vmul.f32 %v2935_v21, %v2222_v40  ;;  %vm2230_vm8 = vweird.f32 %v2935_v21 }
 0x7d2   : > { %vm2231_vm10 = vmor %vm2229_vm9, %vm2230_vm8 }
 0x7d3   : > { %v2225_v23 = vmul.f32 %v2935_v21, %v2224_v6 }
 0x7d5   : > { %v2226_v27 = vmul.f32 0.5, %v2225_v23 }
 0x7d7   : > { %v2227_v44 = vsub.f32 1.5, %v2226_v27 }
 0x7d9   : > { %v2228_v33 = vmul.f32 %v2935_v21, %v2227_v44 }
 0x7db   : > { %v2232_v36 = vsel %vm2231_vm10, %v2935_v21, %v2228_v33 }
 0x7dc   : > { %v2233_v38 = vmul.f32 %v2232_v36, %v4129_v34  ;;  %v2338_v34 = vld [vmem:[#allocation16 + $0x80] sm:$0xff] }
 0x7dd   : > { %2393 = vmatpush.msrb.mxu1 %v2338_v34 }
 0x7de   : > { %v2237_v37 = vmul.f32 %v2887_v7, %v2233_v38 }
 0x7e0   : > { %v2241_v41 = vadd.f32 %v2888_v39, %v2237_v37 }
 0x7e2   : > { %2296 = vmatmul.f32.vlgmr.msra.gmra.mxu2 %v2241_v41  ;;  %2316 = vmatmul.f32.vlgmr.msra.gmra.mxu3 %v2241_v41 }
 0x865   : > { %v2297_v55 = vpop.f32.mrf.mxu2  ;;  %v2317_v56 = vpop.f32.mrf.mxu3 }
 0x866   : > { %v2298_v51 = vadd.f32 %v2297_v55, %v2276_v52  ;;  %v2318_v59 = vadd.f32 %v2317_v56, %v2277_v53 }
 0x868   : > { %v2320_v60 = vmax.f32 %v2298_v51, 0.0  ;;  %v2321_v45 = vmax.f32 %v2318_v59, 0.0 }
 0x86a   : > { %2374 = vmatmul.f32.vlgmr.msrb.gmra.mxu0 %v2320_v60  ;;  %2394 = vmatmul.f32.vlgmr.msrb.gmra.mxu1 %v2321_v45 }
 0x8e7   : > { %v2375_v3 = vpop.f32.mrf.mxu0  ;;  %v2395_v50 = vpop.f32.mrf.mxu1 }
 0x8e8   : > { %v2376_v61 = vadd.f32 %v2889_v15, %v2375_v3 }
 0x8ea   : > { %v2396_v62 = vadd.f32 %v2395_v50, %v2376_v61 }
 0x8ec   : > { %v2398_v63 = vadd.f32 %v2396_v62, %v2241_v41 }
 0x8ee   : > { %2401 = vadd.xlane.f32.xlu1 %v2398_v63 }
 0x961   : > { %v2402_v0 = vpop.xlane.xlu1 %2401 }
 0x962   : > { %v2403_v1 = vmul.f32 %v2402_v0, %v4126_v11 }
 0x964   : > { %v2404_v58 = vsub.f32 %v2398_v63, %v2403_v1 }
 0x966   : > { %v2405_v2 = vmul.f32 %v2404_v58, %v2404_v58 }
 0x968   : > { %2406 = vadd.xlane.f32.xlu0 %v2405_v2 }
 0x9db   : > { %v2407_v16 = vpop.xlane.xlu0 %2406 }
 0x9dc   : > { %v2408_v4 = vmul.f32 %v2407_v16, %v4126_v11  ;;  %v2890_v11 = vld [vmem:[%s4293_s19] ss:$0 sm:$0xff] }
 0x9de   : > { %v2409_v5 = vadd.f32 1e-06, %v2408_v4 }
 0x9e0   : > { %2936 = vrsqrt.f32 %v2409_v5  ;;  %vm2416_vm12 = vweird.f32 %v2409_v5 }
 0x9e6   : > { %v2937_v54 = vpop.eup %2936 }
 0x9e7   : > { %v2411_v9 = vmul.f32 %v2937_v54, %v2409_v5  ;;  %vm2417_vm11 = vweird.f32 %v2937_v54 }
 0x9e8   : > { %vm2418_vm13 = vmor %vm2416_vm12, %vm2417_vm11 }
 0x9e9   : > { %v2412_v10 = vmul.f32 %v2937_v54, %v2411_v9 }
 0x9eb   : > { %v2413_v57 = vmul.f32 0.5, %v2412_v10 }
 0x9ed   : > { %v2414_v40 = vsub.f32 1.5, %v2413_v57 }
 0x9ef   : > { %v2415_v25 = vmul.f32 %v2937_v54, %v2414_v40 }
 0x9f1   : > { %v2419_v13 = vsel %vm2418_vm13, %v2937_v54, %v2415_v25 }
 0x9f2   : > { %v2420_v14 = vmul.f32 %v2419_v13, %v2404_v58 }
 0x9f4   : > { %v2424_v26 = vmul.f32 %v2890_v11, %v2420_v14 }
 0x9f6   : > { %v2428_v8 = vadd.f32 %v2891_v17, %v2424_v26 }
 0x9f8   : > { %2429 = vst [vmem:[%s3682_s5] sm:$0xff] %v2428_v8 }
 0x9f9   : > { %3205 = shalt.err (!%p3202_p9)
}
 0x9fa   : > { %2730 = dma.vmem_to_hbm [thread:$0]  (%p3604_p13), %s2446_s12, 128, %s2448_s4, %s2431_s6  }
 0x9fb PF: > { %p2775_p8 = scmp.ge.s32.totalorder %s3320_s0, 2  ;;  %s2459_s2 = sand.u32 1, %s3292_s24  }
 0x9fc   : > { %s2460_s5 = scalar_lea.sflag [#allocation6], %s2459_s2 }
 0x9fd   : > { %p2759_p2 = pnand %p2775_p8, %p3612_p4 }
 0x9ff   : > { %p2760_p10 = pneg %p2759_p2 }
 0xa01   : > { %3275 = dma.done.wait (%p2760_p10), %s2460_s5, 128  }
 0xa02   : > { %3277 = vsyncadd (%p2760_p10), %s2460_s5, 4294967168  ;;  %s38_s0 = sadd.s32 1, %s3320_s0   ;;  %s4296_s18 = sld [smem:[#allocation26_spill]] }
 0xa03   : > { %p35_p0 = scmp.ge.s32.totalorder %s38_s0, 6   ;;  %s4297_s26 = sld [smem:[#allocation33_spill]] }
 0xa04   : > { %s4298_s27 = sld [smem:[#allocation29_spill]]  ;;  %s4301_s21 = smov %s3284_s22 }
 0xa05   : > { %s4299_s29 = sld [smem:[#allocation31_spill]]  ;;  %s4302_s22 = smov %s3288_s23 }
 0xa06   : > { %s4300_s19 = sld [smem:[#allocation32_spill]]  ;;  %s4303_s23 = smov %s3588_s11 }
 0xa07   : > { %s4304_s24 = smov %s3296_s25  ;;  %s4306_s28 = smov %s3316_s30 }
 0xa08   : > { %s4305_s25 = smov %s4296_s18  ;;  %37 = sbr.rel (!%p35_p0) target bundleno = 31 (0x1f), region = 170 }
 0xa0c   : > { %s4307_s30 = smov %s4300_s19 }
 0xa0d   :  { %2466 = vsyncpa [#allocation5], 1 }
 0xa0e   :  { %2468 = vsyncpa [#allocation5 + $0x1], 1 }
 0xa0f   :  { %2469 = vsyncpa [#allocation8], 1 }
 0xa10   :  { %2471 = vsyncpa [#allocation8 + $0x1], 1 }
 0xa11   :  { %2472 = vsyncpa [#allocation11], 1 }
 0xa12   :  { %2473 = vsyncpa [#allocation14], 1 }
 0xa13   :  { %2474 = vsyncpa [#allocation17], 1 }
 0xa14   :  { %2475 = vsyncpa [#allocation6], 1 }
 0xa15   :  { %2477 = vsyncpa [#allocation6 + $0x1], 1 }

</bundles_post_ra>
